<compile_context>
chip_gen: v7x
topology: tpu7x:2x2x1
jax: 0.10.0
libtpu: 0.0.40
codegen_flags: <defaults>
</compile_context>

<pallas_src>
import functools

import jax
import jax.numpy as jnp
from jax.experimental import pallas as pl
from jax.experimental.pallas import tpu as pltpu


# ----------------------------------------------------------------------------
# Small helpers
# ----------------------------------------------------------------------------
def _round_up(n, m):
    return ((n + m - 1) // m) * m


def _pick_tile(n, preferred):
    if n <= preferred:
        return n                    # whole dim as one block (always legal)
    for t in (preferred, 256, 128, 64, 32, 16, 8):
        if n % t == 0:
            return t
    return n


def _pick_time_chunk(T, max_chunk=16, min_chunk=4):
    """Largest chunk <= max_chunk that divides T (no padded serial steps)."""
    for tc in range(min(T, max_chunk), min_chunk - 1, -1):
        if T % tc == 0:
            return tc
    return min(T, 8)                # pad; padded steps skipped via pl.when


def _num_tensorcores():
    # v7x has 2 TensorCores per chip; v5e/v6e have 1.
    try:
        kind = (jax.devices()[0].device_kind or "").lower()
        return 2 if "v7" in kind else 1
    except Exception:  # pragma: no cover
        return 1


def _batch_tiling(B, n_cores, bt_cap=512):
    n_tiles = 1
    if n_cores >= 2 and B > 8:
        n_tiles = n_cores            # shard the batch across both v7x TCs
    n_tiles = max(n_tiles, -(-B // bt_cap))
    Bp = _round_up(B, 8 * n_tiles)
    return Bp, Bp // n_tiles


def _reorder_gates(w):
    """Permute the leading 4H axis: PyTorch (i, f, g, o) -> (i, f, o, g)."""
    i, f, g, o = jnp.split(w, 4, axis=0)
    return jnp.concatenate([i, f, o, g], axis=0)


# ----------------------------------------------------------------------------
# Fused LSTM kernel: chunked x@Wx (MXU) + serial recurrence per time chunk.
# ----------------------------------------------------------------------------
def lstm_fused_kernel(x_ref, wx_ref, b_ref, wh_ref, h_out_ref, h_sc, c_sc,
                      *, seq_len, time_padded):
    """One grid step == tc time steps for one batch tile.

    x_ref    : (tc, bt, E)   inputs for this time chunk (compute dtype)
    wx_ref   : (E, 4H)       input->gates weights (compute dtype, gate-permuted)
    b_ref    : (1, 4H)       combined bias b_ih + b_hh (f32, gate-permuted)
    wh_ref   : (H, 4H)       hidden->gates weights (f32, gate-permuted)
    h_out_ref: (tc, bt, H)   hidden states for this chunk (compute dtype)
    h_sc,c_sc: (bt, H) f32 scratch carried across time chunks (per batch tile)
    """
    t = pl.program_id(1)             # time-chunk index (inner, "arbitrary")

    @pl.when(t == 0)
    def _():
        h_sc[...] = jnp.zeros_like(h_sc)
        c_sc[...] = jnp.zeros_like(c_sc)

    tc, bt, E = x_ref.shape
    H = wh_ref.shape[0]

    # Fused input->gates matmul for the whole chunk: one chunky MXU dot with
    # the combined bias folded in, so only h@Wh + gate math stay per-step.
    gx = (
        jnp.dot(x_ref[...].reshape(tc * bt, E), wx_ref[...],
                preferred_element_type=jnp.float32)
        + b_ref[...]
    ).reshape(tc, bt, 4 * H)

    def step(s):
        h = h_sc[...]
        gates = gx[s] + jnp.dot(h, wh_ref[...],
                                preferred_element_type=jnp.float32)
        # Gate columns are pre-permuted to (i, f, o, g): one sigmoid over 3H.
        sig = jax.nn.sigmoid(gates[:, : 3 * H])
        g = jnp.tanh(gates[:, 3 * H:])
        c = sig[:, H:2 * H] * c_sc[...] + sig[:, :H] * g
        h_new = sig[:, 2 * H:3 * H] * jnp.tanh(c)
        c_sc[...] = c
        h_sc[...] = h_new
        h_out_ref[s] = h_new.astype(h_out_ref.dtype)

    for s in range(tc):
        if time_padded:
            # Skip padded tail timesteps entirely (seq_len is a static int,
            # the compare is a cheap scalar op).
            pl.when(t * tc + s < seq_len)(functools.partial(step, s))
        else:
            step(s)


def lstm_recurrence_pallas(x, wx, b, wh, *, bt, tc, seq_len, out_dtype):
    """x: (Tp, Bp, E) compute-dtype, time-major padded. Returns (Tp, Bp, H)."""
    Tp, Bp, E = x.shape
    H = wh.shape[0]
    G = wh.shape[1]
    kernel = functools.partial(lstm_fused_kernel, seq_len=seq_len,
                               time_padded=(Tp != seq_len))
    return pl.pallas_call(
        kernel,
        out_shape=jax.ShapeDtypeStruct((Tp, Bp, H), out_dtype),
        grid_spec=pltpu.PrefetchScalarGridSpec(
            num_scalar_prefetch=0,
            grid=(Bp // bt, Tp // tc),          # (batch tiles, time chunks)
            in_specs=[
                pl.BlockSpec((tc, bt, E), lambda bi, ti: (ti, bi, 0)),
                pl.BlockSpec((E, G), lambda bi, ti: (0, 0)),
                pl.BlockSpec((1, G), lambda bi, ti: (0, 0)),
                pl.BlockSpec((H, G), lambda bi, ti: (0, 0)),
            ],
            out_specs=pl.BlockSpec((tc, bt, H), lambda bi, ti: (ti, bi, 0)),
            scratch_shapes=[
                pltpu.VMEM((bt, H), jnp.float32),   # h carry (per batch tile)
                pltpu.VMEM((bt, H), jnp.float32),   # c carry
            ],
        ),
        compiler_params=pltpu.CompilerParams(
            # Batch tiles are independent (megacore / 2nd TC on v7x);
            # the time axis is the true recurrence.
            dimension_semantics=("parallel", "arbitrary"),
        ),
    )(x, wx, b, wh)


# ----------------------------------------------------------------------------
# "A @ W + b" Pallas matmul (used for the FC projection)
# ----------------------------------------------------------------------------
def matmul_bias_kernel(a_ref, w_ref, b_ref, o_ref):
    o_ref[...] = (
        jnp.dot(a_ref[...], w_ref[...], preferred_element_type=jnp.float32)
        + b_ref[...]
    ).astype(o_ref.dtype)


def matmul_bias_pallas(a, w, b):
    """a: (M, K), w: (K, N), b: (1, N) -> (M, N) float32."""
    M, K = a.shape
    _, N = w.shape
    tm = _pick_tile(M, 256)
    tn = _pick_tile(N, 256)
    # TODO(synk): add a K grid axis + f32 VMEM accumulator (and raise
    # vmem_limit_bytes) before K grows large enough to threaten v7x's 64 MiB.
    return pl.pallas_call(
        matmul_bias_kernel,
        out_shape=jax.ShapeDtypeStruct((M, N), jnp.float32),
        grid_spec=pltpu.PrefetchScalarGridSpec(
            num_scalar_prefetch=0,
            grid=(M // tm, N // tn),
            in_specs=[
                pl.BlockSpec((tm, K), lambda i, j: (i, 0)),
                pl.BlockSpec((K, tn), lambda i, j: (0, j)),
                pl.BlockSpec((1, tn), lambda i, j: (0, j)),
            ],
            out_specs=pl.BlockSpec((tm, tn), lambda i, j: (i, j)),
        ),
        compiler_params=pltpu.CompilerParams(
            dimension_semantics=("parallel", "parallel"),
        ),
    )(a, w, b)


# ----------------------------------------------------------------------------
# Parameters & forward
# ----------------------------------------------------------------------------
def init_params(key, embed_size, hidden_size, vocab_size):
    ks = jax.random.split(key, 8)
    s = 0.1
    return {
        "embed": s * jax.random.normal(ks[0], (vocab_size, embed_size), jnp.float32),
        "w_ih":  s * jax.random.normal(ks[1], (4 * hidden_size, embed_size), jnp.float32),
        "w_hh":  s * jax.random.normal(ks[2], (4 * hidden_size, hidden_size), jnp.float32),
        "b_ih":  s * jax.random.normal(ks[3], (4 * hidden_size,), jnp.float32),
        "b_hh":  s * jax.random.normal(ks[4], (4 * hidden_size,), jnp.float32),
        "fc_w":  s * jax.random.normal(ks[5], (vocab_size, hidden_size), jnp.float32),
        "fc_b":  s * jax.random.normal(ks[6], (vocab_size,), jnp.float32),
        # feature_projection exists in __init__ but is unused on the training
        # forward path (only used by init_hidden); kept for shape fidelity.
        "proj_w": s * jax.random.normal(ks[7], (hidden_size, embed_size), jnp.float32),
        "proj_b": jnp.zeros((hidden_size,), jnp.float32),
    }


@functools.partial(jax.jit, static_argnames=("compute_dtype",))
def lstm_decoder_forward(params, features, captions, compute_dtype=jnp.bfloat16):
    """Training-mode forward.

    features: (B, 1, E) float32
    captions: (B, T_cap) int32
    returns:  logits (B, T, vocab) with T = 1 + (T_cap - 1)
    compute_dtype: operand dtype of the two big MXU matmuls (x@Wx and FC) and
        of the stored hidden states; the recurrent h@Wh dot, gate math, c/h
        state and all accumulation stay f32.
    """
    # Embedding lookup + concat (XLA gather; no win from a Pallas gather here).
    emb = jnp.take(params["embed"], captions[:, :-1], axis=0)   # (B, T-1, E)
    inputs = jnp.concatenate([features, emb], axis=1)           # (B, T, E)
    B, T, E = inputs.shape
    H = params["w_hh"].shape[1]
    V = params["fc_w"].shape[0]

    # Tiling: tc divides T when possible (no padded serial steps); batch tile
    # scales with B and splits across both TensorCores on v7x.
    tc = _pick_time_chunk(T)
    Tp = _round_up(T, tc)
    Bp, bt = _batch_tiling(B, _num_tensorcores())
    Vp = _round_up(V, 128)          # lane-aligned vocab for full-vreg FC stores

    # Weights: gate columns permuted to (i, f, o, g), pre-transposed so every
    # in-kernel dot is row-major (M,K)@(K,N).
    wx = _reorder_gates(params["w_ih"]).T.astype(compute_dtype)     # (E, 4H)
    wh = _reorder_gates(params["w_hh"]).T                           # (H, 4H) f32
    b = _reorder_gates((params["b_ih"] + params["b_hh"])[:, None])  # (4H, 1)
    b = b.T                                                         # (1, 4H) f32
    wfc = jnp.pad(params["fc_w"].T, ((0, 0), (0, Vp - V))).astype(compute_dtype)
    bfc = jnp.pad(params["fc_b"][None, :], ((0, 0), (0, Vp - V)))

    # Time-major, padded inputs for the recurrence (small transpose; the big
    # logits tensor is written batch-first directly below).
    x = jnp.transpose(inputs, (1, 0, 2))                    # (T, B, E)
    x = jnp.pad(x, ((0, Tp - T), (0, Bp - B), (0, 0))).astype(compute_dtype)

    # 1) Fused input->gates matmul + serial recurrence in one pallas_call.
    h_all = lstm_recurrence_pallas(x, wx, b, wh, bt=bt, tc=tc, seq_len=T,
                                   out_dtype=compute_dtype)  # (Tp, Bp, H)

    # 2) FC projection over all (b, t) rows, writing batch-first logits.
    #    Transposing the small (bf16) h_all here is ~4x cheaper in HBM bytes
    #    than transposing the f32 logits afterwards (which is now gone).
    h_bf = jnp.transpose(h_all, (1, 0, 2)).reshape(Bp * Tp, H)
    logits = matmul_bias_pallas(h_bf, wfc, bfc)              # (Bp*Tp, Vp) f32
    logits = logits.reshape(Bp, Tp, Vp)[:B, :T, :V]
    return logits                                            # (B, T, V)


# ----------------------------------------------------------------------------
# Pure-JAX reference (torch.nn.LSTM + Linear semantics, full f32 precision)
# ----------------------------------------------------------------------------
def reference_forward(params, features, captions):
    emb = jnp.take(params["embed"], captions[:, :-1], axis=0)
    inputs = jnp.concatenate([features, emb], axis=1)         # (B, T, E)
    B, T, E = inputs.shape
    H = params["w_hh"].shape[1]
    hp = jax.lax.Precision.HIGHEST

    wx = params["w_ih"].T
    wh = params["w_hh"].T
    b = params["b_ih"] + params["b_hh"]

    def step(carry, x_t):
        h, c = carry
        gates = (jnp.dot(x_t, wx, precision=hp)
                 + jnp.dot(h, wh, precision=hp) + b)
        i = jax.nn.sigmoid(gates[:, 0 * H:1 * H])
        f = jax.nn.sigmoid(gates[:, 1 * H:2 * H])
        g = jnp.tanh(gates[:, 2 * H:3 * H])
        o = jax.nn.sigmoid(gates[:, 3 * H:4 * H])
        c = f * c + i * g
        h = o * jnp.tanh(c)
        return (h, c), h

    h0 = jnp.zeros((B, H), jnp.float32)
    c0 = jnp.zeros((B, H), jnp.float32)
    _, hs = jax.lax.scan(step, (h0, c0), jnp.transpose(inputs, (1, 0, 2)))
    lstm_out = jnp.transpose(hs, (1, 0, 2))                   # (B, T, H)
    return jnp.dot(lstm_out, params["fc_w"].T, precision=hp) + params["fc_b"]


if __name__ == "__main__":
    embed_size = 128
    hidden_size = 128          # H multiple of 128 -> lane-aligned gate slices
    vocab_size = 500           # deliberately not a multiple of 128 (padded to 512)
    B = 2                      # padded to 8 inside the wrapper
    T_cap = 10                 # LSTM sequence length T = 1 + (T_cap - 1) = 10

    key = jax.random.PRNGKey(0)
    kp, kf, kc = jax.random.split(key, 3)

    params = init_params(kp, embed_size, hidden_size, vocab_size)
    features = jax.random.normal(kf, (B, 1, embed_size), jnp.float32)
    captions = jax.random.randint(kc, (B, T_cap), 0, vocab_size, dtype=jnp.int32)

    ref = reference_forward(params, features, captions)

    # f32 path: exact-ish check against the reference.
    out = lstm_decoder_forward(params, features, captions,
                               compute_dtype=jnp.float32)
    out = jax.block_until_ready(out)
    assert out.shape == (B, T_cap, vocab_size), out.shape
    assert jnp.allclose(out, ref, atol=1e-3, rtol=1e-3), (
        float(jnp.max(jnp.abs(out - ref))))

    # Default path: bf16 operands on the two big MXU matmuls, f32 recurrence.
    out_bf16 = lstm_decoder_forward(params, features, captions)
    out_bf16 = jax.block_until_ready(out_bf16)
    assert out_bf16.shape == (B, T_cap, vocab_size), out_bf16.shape
    assert bool(jnp.all(jnp.isfinite(out_bf16)))
    assert jnp.allclose(out_bf16, ref, atol=0.25, rtol=0.0), (
        float(jnp.max(jnp.abs(out_bf16 - ref))))

    print("KERNEL_OK")
</pallas_src>

<mosaic_0001>
module attributes {stable_mosaic.version = 11 : i64} {
  func.func @lstm_fused_kernel(%arg0: i32, %arg1: i32, %arg2: memref<10x8x128xf32, #tpu.memory_space<vmem>>, %arg3: memref<128x512xf32, #tpu.memory_space<vmem>>, %arg4: memref<1x512xf32, #tpu.memory_space<vmem>>, %arg5: memref<128x512xf32, #tpu.memory_space<vmem>>, %arg6: memref<10x8x128xf32, #tpu.memory_space<vmem>>, %arg7: memref<8x128xf32, #tpu.memory_space<vmem>>, %arg8: memref<8x128xf32, #tpu.memory_space<vmem>>) attributes {dimension_semantics = [#tpu.dimension_semantics<parallel>, #tpu.dimension_semantics<arbitrary>], iteration_bounds = array<i64: 1, 1>, scalar_prefetch = 0 : i64, scratch_operands = 2 : i64, tpu.core_type = #tpu.core_type<tc>, window_params = [{transform_indices = @transform_0, window_bounds = array<i64: 10, 8, 128>}, {pipeline_mode = #tpu.pipeline_mode<synchronous>, transform_indices = @transform_1, window_bounds = array<i64: 128, 512>}, {pipeline_mode = #tpu.pipeline_mode<synchronous>, transform_indices = @transform_2, window_bounds = array<i64: 1, 512>}, {pipeline_mode = #tpu.pipeline_mode<synchronous>, transform_indices = @transform_3, window_bounds = array<i64: 128, 512>}, {transform_indices = @transform_4, window_bounds = array<i64: 10, 8, 128>}]} {
    %c0_i32 = arith.constant 0 : i32
    %0 = arith.cmpi eq, %arg1, %c0_i32 : i32
    %1 = arith.extui %0 : i1 to i32
    %c0_i32_0 = arith.constant 0 : i32
    %2 = arith.cmpi ne, %1, %c0_i32_0 : i32
    scf.if %2 {
      %cst_148 = arith.constant 0.000000e+00 : f32
      %291 = vector.broadcast %cst_148 : f32 to vector<8x128xf32>
      %c0_149 = arith.constant 0 : index
      %c0_150 = arith.constant 0 : index
      %292 = vector.load %arg7[%c0_149, %c0_150] : memref<8x128xf32, #tpu.memory_space<vmem>>, vector<8x128xf32>
      tpu.vector_store %arg7[%c0_149, %c0_150], %291 {strides = array<i32>} : memref<8x128xf32, #tpu.memory_space<vmem>>, vector<8x128xf32>,
      %cst_151 = arith.constant 0.000000e+00 : f32
      %293 = vector.broadcast %cst_151 : f32 to vector<8x128xf32>
      %c0_152 = arith.constant 0 : index
      %c0_153 = arith.constant 0 : index
      %294 = vector.load %arg8[%c0_152, %c0_153] : memref<8x128xf32, #tpu.memory_space<vmem>>, vector<8x128xf32>
      tpu.vector_store %arg8[%c0_152, %c0_153], %293 {strides = array<i32>} : memref<8x128xf32, #tpu.memory_space<vmem>>, vector<8x128xf32>,
    } else {
    }
    %c0 = arith.constant 0 : index
    %c0_1 = arith.constant 0 : index
    %c0_2 = arith.constant 0 : index
    %3 = vector.load %arg2[%c0, %c0_1, %c0_2] : memref<10x8x128xf32, #tpu.memory_space<vmem>>, vector<10x8x128xf32>
    %4 = vector.shape_cast %3 : vector<10x8x128xf32> to vector<80x128xf32>
    %c0_3 = arith.constant 0 : index
    %c0_4 = arith.constant 0 : index
    %5 = vector.load %arg3[%c0_3, %c0_4] : memref<128x512xf32, #tpu.memory_space<vmem>>, vector<128x512xf32>
    %cst = arith.constant dense<0.000000e+00> : vector<80x512xf32>
    %6 = tpu.matmul %4, %5, %cst {dimension_numbers = #tpu.dot_dimension_numbers<[1], [0], [0], [1], [0, 0, 1, 1], [], []>} : vector<80x128xf32>, vector<128x512xf32>, vector<80x512xf32> -> vector<80x512xf32>
    %c0_5 = arith.constant 0 : index
    %c0_6 = arith.constant 0 : index
    %7 = vector.load %arg4[%c0_5, %c0_6] : memref<1x512xf32, #tpu.memory_space<vmem>>, vector<1x512xf32>
    %8 = vector.broadcast %7 : vector<1x512xf32> to vector<80x512xf32>
    %9 = arith.addf %6, %8 : vector<80x512xf32>
    %10 = vector.shape_cast %9 : vector<80x512xf32> to vector<10x8x512xf32>
    %c0_7 = arith.constant 0 : index
    %c0_8 = arith.constant 0 : index
    %11 = vector.load %arg7[%c0_7, %c0_8] : memref<8x128xf32, #tpu.memory_space<vmem>>, vector<8x128xf32>
    %12 = vector.extract_strided_slice %10 {offsets = [0, 0, 0], sizes = [1, 8, 512], strides = [1, 1, 1]} : vector<10x8x512xf32> to vector<1x8x512xf32>
    %13 = vector.shape_cast %12 : vector<1x8x512xf32> to vector<8x512xf32>
    %c0_9 = arith.constant 0 : index
    %c0_10 = arith.constant 0 : index
    %14 = vector.load %arg5[%c0_9, %c0_10] : memref<128x512xf32, #tpu.memory_space<vmem>>, vector<128x512xf32>
    %cst_11 = arith.constant dense<0.000000e+00> : vector<8x512xf32>
    %15 = tpu.matmul %11, %14, %cst_11 {dimension_numbers = #tpu.dot_dimension_numbers<[1], [0], [0], [1], [0, 0, 1, 1], [], []>} : vector<8x128xf32>, vector<128x512xf32>, vector<8x512xf32> -> vector<8x512xf32>
    %16 = arith.addf %13, %15 : vector<8x512xf32>
    %17 = vector.extract_strided_slice %16 {offsets = [0, 0], sizes = [8, 384], strides = [1, 1]} : vector<8x512xf32> to vector<8x384xf32>
    %18 = arith.negf %17 : vector<8x384xf32>
    %19 = math.exp %18 : vector<8x384xf32>
    %cst_12 = arith.constant 1.000000e+00 : f32
    %20 = vector.broadcast %cst_12 : f32 to vector<8x384xf32>
    %21 = arith.addf %20, %19 : vector<8x384xf32>
    %22 = arith.divf %20, %21 : vector<8x384xf32>
    %23 = vector.extract_strided_slice %16 {offsets = [0, 384], sizes = [8, 128], strides = [1, 1]} : vector<8x512xf32> to vector<8x128xf32>
    %24 = math.tanh %23 : vector<8x128xf32>
    %25 = vector.extract_strided_slice %22 {offsets = [0, 128], sizes = [8, 128], strides = [1, 1]} : vector<8x384xf32> to vector<8x128xf32>
    %c0_13 = arith.constant 0 : index
    %c0_14 = arith.constant 0 : index
    %26 = vector.load %arg8[%c0_13, %c0_14] : memref<8x128xf32, #tpu.memory_space<vmem>>, vector<8x128xf32>
    %27 = arith.mulf %25, %26 : vector<8x128xf32>
    %28 = vector.extract_strided_slice %22 {offsets = [0, 0], sizes = [8, 128], strides = [1, 1]} : vector<8x384xf32> to vector<8x128xf32>
    %29 = arith.mulf %28, %24 : vector<8x128xf32>
    %30 = arith.addf %27, %29 : vector<8x128xf32>
    %31 = vector.extract_strided_slice %22 {offsets = [0, 256], sizes = [8, 128], strides = [1, 1]} : vector<8x384xf32> to vector<8x128xf32>
    %32 = math.tanh %30 : vector<8x128xf32>
    %33 = arith.mulf %31, %32 : vector<8x128xf32>
    %c0_15 = arith.constant 0 : index
    %c0_16 = arith.constant 0 : index
    %34 = vector.load %arg8[%c0_15, %c0_16] : memref<8x128xf32, #tpu.memory_space<vmem>>, vector<8x128xf32>
    tpu.vector_store %arg8[%c0_15, %c0_16], %30 {strides = array<i32>} : memref<8x128xf32, #tpu.memory_space<vmem>>, vector<8x128xf32>,
    %c0_17 = arith.constant 0 : index
    %c0_18 = arith.constant 0 : index
    %35 = vector.load %arg7[%c0_17, %c0_18] : memref<8x128xf32, #tpu.memory_space<vmem>>, vector<8x128xf32>
    tpu.vector_store %arg7[%c0_17, %c0_18], %33 {strides = array<i32>} : memref<8x128xf32, #tpu.memory_space<vmem>>, vector<8x128xf32>,
    %c0_19 = arith.constant 0 : index
    %c0_20 = arith.constant 0 : index
    %c0_21 = arith.constant 0 : index
    %36 = vector.load %arg6[%c0_19, %c0_20, %c0_21] : memref<10x8x128xf32, #tpu.memory_space<vmem>>, vector<1x8x128xf32>
    %37 = vector.shape_cast %36 : vector<1x8x128xf32> to vector<8x128xf32>
    %38 = vector.shape_cast %33 : vector<8x128xf32> to vector<1x8x128xf32>
    tpu.vector_store %arg6[%c0_19, %c0_20, %c0_21], %38 {strides = array<i32>} : memref<10x8x128xf32, #tpu.memory_space<vmem>>, vector<1x8x128xf32>,
    %c0_22 = arith.constant 0 : index
    %c0_23 = arith.constant 0 : index
    %39 = vector.load %arg7[%c0_22, %c0_23] : memref<8x128xf32, #tpu.memory_space<vmem>>, vector<8x128xf32>
    %40 = vector.extract_strided_slice %10 {offsets = [1, 0, 0], sizes = [1, 8, 512], strides = [1, 1, 1]} : vector<10x8x512xf32> to vector<1x8x512xf32>
    %41 = vector.shape_cast %40 : vector<1x8x512xf32> to vector<8x512xf32>
    %c0_24 = arith.constant 0 : index
    %c0_25 = arith.constant 0 : index
    %42 = vector.load %arg5[%c0_24, %c0_25] : memref<128x512xf32, #tpu.memory_space<vmem>>, vector<128x512xf32>
    %cst_26 = arith.constant dense<0.000000e+00> : vector<8x512xf32>
    %43 = tpu.matmul %39, %42, %cst_26 {dimension_numbers = #tpu.dot_dimension_numbers<[1], [0], [0], [1], [0, 0, 1, 1], [], []>} : vector<8x128xf32>, vector<128x512xf32>, vector<8x512xf32> -> vector<8x512xf32>
    %44 = arith.addf %41, %43 : vector<8x512xf32>
    %45 = vector.extract_strided_slice %44 {offsets = [0, 0], sizes = [8, 384], strides = [1, 1]} : vector<8x512xf32> to vector<8x384xf32>
    %46 = arith.negf %45 : vector<8x384xf32>
    %47 = math.exp %46 : vector<8x384xf32>
    %cst_27 = arith.constant 1.000000e+00 : f32
    %48 = vector.broadcast %cst_27 : f32 to vector<8x384xf32>
    %49 = arith.addf %48, %47 : vector<8x384xf32>
    %50 = arith.divf %48, %49 : vector<8x384xf32>
    %51 = vector.extract_strided_slice %44 {offsets = [0, 384], sizes = [8, 128], strides = [1, 1]} : vector<8x512xf32> to vector<8x128xf32>
    %52 = math.tanh %51 : vector<8x128xf32>
    %53 = vector.extract_strided_slice %50 {offsets = [0, 128], sizes = [8, 128], strides = [1, 1]} : vector<8x384xf32> to vector<8x128xf32>
    %c0_28 = arith.constant 0 : index
    %c0_29 = arith.constant 0 : index
    %54 = vector.load %arg8[%c0_28, %c0_29] : memref<8x128xf32, #tpu.memory_space<vmem>>, vector<8x128xf32>
    %55 = arith.mulf %53, %54 : vector<8x128xf32>
    %56 = vector.extract_strided_slice %50 {offsets = [0, 0], sizes = [8, 128], strides = [1, 1]} : vector<8x384xf32> to vector<8x128xf32>
    %57 = arith.mulf %56, %52 : vector<8x128xf32>
    %58 = arith.addf %55, %57 : vector<8x128xf32>
    %59 = vector.extract_strided_slice %50 {offsets = [0, 256], sizes = [8, 128], strides = [1, 1]} : vector<8x384xf32> to vector<8x128xf32>
    %60 = math.tanh %58 : vector<8x128xf32>
    %61 = arith.mulf %59, %60 : vector<8x128xf32>
    %c0_30 = arith.constant 0 : index
    %c0_31 = arith.constant 0 : index
    %62 = vector.load %arg8[%c0_30, %c0_31] : memref<8x128xf32, #tpu.memory_space<vmem>>, vector<8x128xf32>
    tpu.vector_store %arg8[%c0_30, %c0_31], %58 {strides = array<i32>} : memref<8x128xf32, #tpu.memory_space<vmem>>, vector<8x128xf32>,
    %c0_32 = arith.constant 0 : index
    %c0_33 = arith.constant 0 : index
    %63 = vector.load %arg7[%c0_32, %c0_33] : memref<8x128xf32, #tpu.memory_space<vmem>>, vector<8x128xf32>
    tpu.vector_store %arg7[%c0_32, %c0_33], %61 {strides = array<i32>} : memref<8x128xf32, #tpu.memory_space<vmem>>, vector<8x128xf32>,
    %c1 = arith.constant 1 : index
    %c0_34 = arith.constant 0 : index
    %c0_35 = arith.constant 0 : index
    %64 = vector.load %arg6[%c1, %c0_34, %c0_35] : memref<10x8x128xf32, #tpu.memory_space<vmem>>, vector<1x8x128xf32>
    %65 = vector.shape_cast %64 : vector<1x8x128xf32> to vector<8x128xf32>
    %66 = vector.shape_cast %61 : vector<8x128xf32> to vector<1x8x128xf32>
    tpu.vector_store %arg6[%c1, %c0_34, %c0_35], %66 {strides = array<i32>} : memref<10x8x128xf32, #tpu.memory_space<vmem>>, vector<1x8x128xf32>,
    %c0_36 = arith.constant 0 : index
    %c0_37 = arith.constant 0 : index
    %67 = vector.load %arg7[%c0_36, %c0_37] : memref<8x128xf32, #tpu.memory_space<vmem>>, vector<8x128xf32>
    %68 = vector.extract_strided_slice %10 {offsets = [2, 0, 0], sizes = [1, 8, 512], strides = [1, 1, 1]} : vector<10x8x512xf32> to vector<1x8x512xf32>
    %69 = vector.shape_cast %68 : vector<1x8x512xf32> to vector<8x512xf32>
    %c0_38 = arith.constant 0 : index
    %c0_39 = arith.constant 0 : index
    %70 = vector.load %arg5[%c0_38, %c0_39] : memref<128x512xf32, #tpu.memory_space<vmem>>, vector<128x512xf32>
    %cst_40 = arith.constant dense<0.000000e+00> : vector<8x512xf32>
    %71 = tpu.matmul %67, %70, %cst_40 {dimension_numbers = #tpu.dot_dimension_numbers<[1], [0], [0], [1], [0, 0, 1, 1], [], []>} : vector<8x128xf32>, vector<128x512xf32>, vector<8x512xf32> -> vector<8x512xf32>
    %72 = arith.addf %69, %71 : vector<8x512xf32>
    %73 = vector.extract_strided_slice %72 {offsets = [0, 0], sizes = [8, 384], strides = [1, 1]} : vector<8x512xf32> to vector<8x384xf32>
    %74 = arith.negf %73 : vector<8x384xf32>
    %75 = math.exp %74 : vector<8x384xf32>
    %cst_41 = arith.constant 1.000000e+00 : f32
    %76 = vector.broadcast %cst_41 : f32 to vector<8x384xf32>
    %77 = arith.addf %76, %75 : vector<8x384xf32>
    %78 = arith.divf %76, %77 : vector<8x384xf32>
    %79 = vector.extract_strided_slice %72 {offsets = [0, 384], sizes = [8, 128], strides = [1, 1]} : vector<8x512xf32> to vector<8x128xf32>
    %80 = math.tanh %79 : vector<8x128xf32>
    %81 = vector.extract_strided_slice %78 {offsets = [0, 128], sizes = [8, 128], strides = [1, 1]} : vector<8x384xf32> to vector<8x128xf32>
    %c0_42 = arith.constant 0 : index
    %c0_43 = arith.constant 0 : index
    %82 = vector.load %arg8[%c0_42, %c0_43] : memref<8x128xf32, #tpu.memory_space<vmem>>, vector<8x128xf32>
    %83 = arith.mulf %81, %82 : vector<8x128xf32>
    %84 = vector.extract_strided_slice %78 {offsets = [0, 0], sizes = [8, 128], strides = [1, 1]} : vector<8x384xf32> to vector<8x128xf32>
    %85 = arith.mulf %84, %80 : vector<8x128xf32>
    %86 = arith.addf %83, %85 : vector<8x128xf32>
    %87 = vector.extract_strided_slice %78 {offsets = [0, 256], sizes = [8, 128], strides = [1, 1]} : vector<8x384xf32> to vector<8x128xf32>
    %88 = math.tanh %86 : vector<8x128xf32>
    %89 = arith.mulf %87, %88 : vector<8x128xf32>
    %c0_44 = arith.constant 0 : index
    %c0_45 = arith.constant 0 : index
    %90 = vector.load %arg8[%c0_44, %c0_45] : memref<8x128xf32, #tpu.memory_space<vmem>>, vector<8x128xf32>
    tpu.vector_store %arg8[%c0_44, %c0_45], %86 {strides = array<i32>} : memref<8x128xf32, #tpu.memory_space<vmem>>, vector<8x128xf32>,
    %c0_46 = arith.constant 0 : index
    %c0_47 = arith.constant 0 : index
    %91 = vector.load %arg7[%c0_46, %c0_47] : memref<8x128xf32, #tpu.memory_space<vmem>>, vector<8x128xf32>
    tpu.vector_store %arg7[%c0_46, %c0_47], %89 {strides = array<i32>} : memref<8x128xf32, #tpu.memory_space<vmem>>, vector<8x128xf32>,
    %c2 = arith.constant 2 : index
    %c0_48 = arith.constant 0 : index
    %c0_49 = arith.constant 0 : index
    %92 = vector.load %arg6[%c2, %c0_48, %c0_49] : memref<10x8x128xf32, #tpu.memory_space<vmem>>, vector<1x8x128xf32>
    %93 = vector.shape_cast %92 : vector<1x8x128xf32> to vector<8x128xf32>
    %94 = vector.shape_cast %89 : vector<8x128xf32> to vector<1x8x128xf32>
    tpu.vector_store %arg6[%c2, %c0_48, %c0_49], %94 {strides = array<i32>} : memref<10x8x128xf32, #tpu.memory_space<vmem>>, vector<1x8x128xf32>,
    %c0_50 = arith.constant 0 : index
    %c0_51 = arith.constant 0 : index
    %95 = vector.load %arg7[%c0_50, %c0_51] : memref<8x128xf32, #tpu.memory_space<vmem>>, vector<8x128xf32>
    %96 = vector.extract_strided_slice %10 {offsets = [3, 0, 0], sizes = [1, 8, 512], strides = [1, 1, 1]} : vector<10x8x512xf32> to vector<1x8x512xf32>
    %97 = vector.shape_cast %96 : vector<1x8x512xf32> to vector<8x512xf32>
    %c0_52 = arith.constant 0 : index
    %c0_53 = arith.constant 0 : index
    %98 = vector.load %arg5[%c0_52, %c0_53] : memref<128x512xf32, #tpu.memory_space<vmem>>, vector<128x512xf32>
    %cst_54 = arith.constant dense<0.000000e+00> : vector<8x512xf32>
    %99 = tpu.matmul %95, %98, %cst_54 {dimension_numbers = #tpu.dot_dimension_numbers<[1], [0], [0], [1], [0, 0, 1, 1], [], []>} : vector<8x128xf32>, vector<128x512xf32>, vector<8x512xf32> -> vector<8x512xf32>
    %100 = arith.addf %97, %99 : vector<8x512xf32>
    %101 = vector.extract_strided_slice %100 {offsets = [0, 0], sizes = [8, 384], strides = [1, 1]} : vector<8x512xf32> to vector<8x384xf32>
    %102 = arith.negf %101 : vector<8x384xf32>
    %103 = math.exp %102 : vector<8x384xf32>
    %cst_55 = arith.constant 1.000000e+00 : f32
    %104 = vector.broadcast %cst_55 : f32 to vector<8x384xf32>
    %105 = arith.addf %104, %103 : vector<8x384xf32>
    %106 = arith.divf %104, %105 : vector<8x384xf32>
    %107 = vector.extract_strided_slice %100 {offsets = [0, 384], sizes = [8, 128], strides = [1, 1]} : vector<8x512xf32> to vector<8x128xf32>
    %108 = math.tanh %107 : vector<8x128xf32>
    %109 = vector.extract_strided_slice %106 {offsets = [0, 128], sizes = [8, 128], strides = [1, 1]} : vector<8x384xf32> to vector<8x128xf32>
    %c0_56 = arith.constant 0 : index
    %c0_57 = arith.constant 0 : index
    %110 = vector.load %arg8[%c0_56, %c0_57] : memref<8x128xf32, #tpu.memory_space<vmem>>, vector<8x128xf32>
    %111 = arith.mulf %109, %110 : vector<8x128xf32>
    %112 = vector.extract_strided_slice %106 {offsets = [0, 0], sizes = [8, 128], strides = [1, 1]} : vector<8x384xf32> to vector<8x128xf32>
    %113 = arith.mulf %112, %108 : vector<8x128xf32>
    %114 = arith.addf %111, %113 : vector<8x128xf32>
    %115 = vector.extract_strided_slice %106 {offsets = [0, 256], sizes = [8, 128], strides = [1, 1]} : vector<8x384xf32> to vector<8x128xf32>
    %116 = math.tanh %114 : vector<8x128xf32>
    %117 = arith.mulf %115, %116 : vector<8x128xf32>
    %c0_58 = arith.constant 0 : index
    %c0_59 = arith.constant 0 : index
    %118 = vector.load %arg8[%c0_58, %c0_59] : memref<8x128xf32, #tpu.memory_space<vmem>>, vector<8x128xf32>
    tpu.vector_store %arg8[%c0_58, %c0_59], %114 {strides = array<i32>} : memref<8x128xf32, #tpu.memory_space<vmem>>, vector<8x128xf32>,
    %c0_60 = arith.constant 0 : index
    %c0_61 = arith.constant 0 : index
    %119 = vector.load %arg7[%c0_60, %c0_61] : memref<8x128xf32, #tpu.memory_space<vmem>>, vector<8x128xf32>
    tpu.vector_store %arg7[%c0_60, %c0_61], %117 {strides = array<i32>} : memref<8x128xf32, #tpu.memory_space<vmem>>, vector<8x128xf32>,
    %c3 = arith.constant 3 : index
    %c0_62 = arith.constant 0 : index
    %c0_63 = arith.constant 0 : index
    %120 = vector.load %arg6[%c3, %c0_62, %c0_63] : memref<10x8x128xf32, #tpu.memory_space<vmem>>, vector<1x8x128xf32>
    %121 = vector.shape_cast %120 : vector<1x8x128xf32> to vector<8x128xf32>
    %122 = vector.shape_cast %117 : vector<8x128xf32> to vector<1x8x128xf32>
    tpu.vector_store %arg6[%c3, %c0_62, %c0_63], %122 {strides = array<i32>} : memref<10x8x128xf32, #tpu.memory_space<vmem>>, vector<1x8x128xf32>,
    %c0_64 = arith.constant 0 : index
    %c0_65 = arith.constant 0 : index
    %123 = vector.load %arg7[%c0_64, %c0_65] : memref<8x128xf32, #tpu.memory_space<vmem>>, vector<8x128xf32>
    %124 = vector.extract_strided_slice %10 {offsets = [4, 0, 0], sizes = [1, 8, 512], strides = [1, 1, 1]} : vector<10x8x512xf32> to vector<1x8x512xf32>
    %125 = vector.shape_cast %124 : vector<1x8x512xf32> to vector<8x512xf32>
    %c0_66 = arith.constant 0 : index
    %c0_67 = arith.constant 0 : index
    %126 = vector.load %arg5[%c0_66, %c0_67] : memref<128x512xf32, #tpu.memory_space<vmem>>, vector<128x512xf32>
    %cst_68 = arith.constant dense<0.000000e+00> : vector<8x512xf32>
    %127 = tpu.matmul %123, %126, %cst_68 {dimension_numbers = #tpu.dot_dimension_numbers<[1], [0], [0], [1], [0, 0, 1, 1], [], []>} : vector<8x128xf32>, vector<128x512xf32>, vector<8x512xf32> -> vector<8x512xf32>
    %128 = arith.addf %125, %127 : vector<8x512xf32>
    %129 = vector.extract_strided_slice %128 {offsets = [0, 0], sizes = [8, 384], strides = [1, 1]} : vector<8x512xf32> to vector<8x384xf32>
    %130 = arith.negf %129 : vector<8x384xf32>
    %131 = math.exp %130 : vector<8x384xf32>
    %cst_69 = arith.constant 1.000000e+00 : f32
    %132 = vector.broadcast %cst_69 : f32 to vector<8x384xf32>
    %133 = arith.addf %132, %131 : vector<8x384xf32>
    %134 = arith.divf %132, %133 : vector<8x384xf32>
    %135 = vector.extract_strided_slice %128 {offsets = [0, 384], sizes = [8, 128], strides = [1, 1]} : vector<8x512xf32> to vector<8x128xf32>
    %136 = math.tanh %135 : vector<8x128xf32>
    %137 = vector.extract_strided_slice %134 {offsets = [0, 128], sizes = [8, 128], strides = [1, 1]} : vector<8x384xf32> to vector<8x128xf32>
    %c0_70 = arith.constant 0 : index
    %c0_71 = arith.constant 0 : index
    %138 = vector.load %arg8[%c0_70, %c0_71] : memref<8x128xf32, #tpu.memory_space<vmem>>, vector<8x128xf32>
    %139 = arith.mulf %137, %138 : vector<8x128xf32>
    %140 = vector.extract_strided_slice %134 {offsets = [0, 0], sizes = [8, 128], strides = [1, 1]} : vector<8x384xf32> to vector<8x128xf32>
    %141 = arith.mulf %140, %136 : vector<8x128xf32>
    %142 = arith.addf %139, %141 : vector<8x128xf32>
    %143 = vector.extract_strided_slice %134 {offsets = [0, 256], sizes = [8, 128], strides = [1, 1]} : vector<8x384xf32> to vector<8x128xf32>
    %144 = math.tanh %142 : vector<8x128xf32>
    %145 = arith.mulf %143, %144 : vector<8x128xf32>
    %c0_72 = arith.constant 0 : index
    %c0_73 = arith.constant 0 : index
    %146 = vector.load %arg8[%c0_72, %c0_73] : memref<8x128xf32, #tpu.memory_space<vmem>>, vector<8x128xf32>
    tpu.vector_store %arg8[%c0_72, %c0_73], %142 {strides = array<i32>} : memref<8x128xf32, #tpu.memory_space<vmem>>, vector<8x128xf32>,
    %c0_74 = arith.constant 0 : index
    %c0_75 = arith.constant 0 : index
    %147 = vector.load %arg7[%c0_74, %c0_75] : memref<8x128xf32, #tpu.memory_space<vmem>>, vector<8x128xf32>
    tpu.vector_store %arg7[%c0_74, %c0_75], %145 {strides = array<i32>} : memref<8x128xf32, #tpu.memory_space<vmem>>, vector<8x128xf32>,
    %c4 = arith.constant 4 : index
    %c0_76 = arith.constant 0 : index
    %c0_77 = arith.constant 0 : index
    %148 = vector.load %arg6[%c4, %c0_76, %c0_77] : memref<10x8x128xf32, #tpu.memory_space<vmem>>, vector<1x8x128xf32>
    %149 = vector.shape_cast %148 : vector<1x8x128xf32> to vector<8x128xf32>
    %150 = vector.shape_cast %145 : vector<8x128xf32> to vector<1x8x128xf32>
    tpu.vector_store %arg6[%c4, %c0_76, %c0_77], %150 {strides = array<i32>} : memref<10x8x128xf32, #tpu.memory_space<vmem>>, vector<1x8x128xf32>,
    %c0_78 = arith.constant 0 : index
    %c0_79 = arith.constant 0 : index
    %151 = vector.load %arg7[%c0_78, %c0_79] : memref<8x128xf32, #tpu.memory_space<vmem>>, vector<8x128xf32>
    %152 = vector.extract_strided_slice %10 {offsets = [5, 0, 0], sizes = [1, 8, 512], strides = [1, 1, 1]} : vector<10x8x512xf32> to vector<1x8x512xf32>
    %153 = vector.shape_cast %152 : vector<1x8x512xf32> to vector<8x512xf32>
    %c0_80 = arith.constant 0 : index
    %c0_81 = arith.constant 0 : index
    %154 = vector.load %arg5[%c0_80, %c0_81] : memref<128x512xf32, #tpu.memory_space<vmem>>, vector<128x512xf32>
    %cst_82 = arith.constant dense<0.000000e+00> : vector<8x512xf32>
    %155 = tpu.matmul %151, %154, %cst_82 {dimension_numbers = #tpu.dot_dimension_numbers<[1], [0], [0], [1], [0, 0, 1, 1], [], []>} : vector<8x128xf32>, vector<128x512xf32>, vector<8x512xf32> -> vector<8x512xf32>
    %156 = arith.addf %153, %155 : vector<8x512xf32>
    %157 = vector.extract_strided_slice %156 {offsets = [0, 0], sizes = [8, 384], strides = [1, 1]} : vector<8x512xf32> to vector<8x384xf32>
    %158 = arith.negf %157 : vector<8x384xf32>
    %159 = math.exp %158 : vector<8x384xf32>
    %cst_83 = arith.constant 1.000000e+00 : f32
    %160 = vector.broadcast %cst_83 : f32 to vector<8x384xf32>
    %161 = arith.addf %160, %159 : vector<8x384xf32>
    %162 = arith.divf %160, %161 : vector<8x384xf32>
    %163 = vector.extract_strided_slice %156 {offsets = [0, 384], sizes = [8, 128], strides = [1, 1]} : vector<8x512xf32> to vector<8x128xf32>
    %164 = math.tanh %163 : vector<8x128xf32>
    %165 = vector.extract_strided_slice %162 {offsets = [0, 128], sizes = [8, 128], strides = [1, 1]} : vector<8x384xf32> to vector<8x128xf32>
    %c0_84 = arith.constant 0 : index
    %c0_85 = arith.constant 0 : index
    %166 = vector.load %arg8[%c0_84, %c0_85] : memref<8x128xf32, #tpu.memory_space<vmem>>, vector<8x128xf32>
    %167 = arith.mulf %165, %166 : vector<8x128xf32>
    %168 = vector.extract_strided_slice %162 {offsets = [0, 0], sizes = [8, 128], strides = [1, 1]} : vector<8x384xf32> to vector<8x128xf32>
    %169 = arith.mulf %168, %164 : vector<8x128xf32>
    %170 = arith.addf %167, %169 : vector<8x128xf32>
    %171 = vector.extract_strided_slice %162 {offsets = [0, 256], sizes = [8, 128], strides = [1, 1]} : vector<8x384xf32> to vector<8x128xf32>
    %172 = math.tanh %170 : vector<8x128xf32>
    %173 = arith.mulf %171, %172 : vector<8x128xf32>
    %c0_86 = arith.constant 0 : index
    %c0_87 = arith.constant 0 : index
    %174 = vector.load %arg8[%c0_86, %c0_87] : memref<8x128xf32, #tpu.memory_space<vmem>>, vector<8x128xf32>
    tpu.vector_store %arg8[%c0_86, %c0_87], %170 {strides = array<i32>} : memref<8x128xf32, #tpu.memory_space<vmem>>, vector<8x128xf32>,
    %c0_88 = arith.constant 0 : index
    %c0_89 = arith.constant 0 : index
    %175 = vector.load %arg7[%c0_88, %c0_89] : memref<8x128xf32, #tpu.memory_space<vmem>>, vector<8x128xf32>
    tpu.vector_store %arg7[%c0_88, %c0_89], %173 {strides = array<i32>} : memref<8x128xf32, #tpu.memory_space<vmem>>, vector<8x128xf32>,
    %c5 = arith.constant 5 : index
    %c0_90 = arith.constant 0 : index
    %c0_91 = arith.constant 0 : index
    %176 = vector.load %arg6[%c5, %c0_90, %c0_91] : memref<10x8x128xf32, #tpu.memory_space<vmem>>, vector<1x8x128xf32>
    %177 = vector.shape_cast %176 : vector<1x8x128xf32> to vector<8x128xf32>
    %178 = vector.shape_cast %173 : vector<8x128xf32> to vector<1x8x128xf32>
    tpu.vector_store %arg6[%c5, %c0_90, %c0_91], %178 {strides = array<i32>} : memref<10x8x128xf32, #tpu.memory_space<vmem>>, vector<1x8x128xf32>,
    %c0_92 = arith.constant 0 : index
    %c0_93 = arith.constant 0 : index
    %179 = vector.load %arg7[%c0_92, %c0_93] : memref<8x128xf32, #tpu.memory_space<vmem>>, vector<8x128xf32>
    %180 = vector.extract_strided_slice %10 {offsets = [6, 0, 0], sizes = [1, 8, 512], strides = [1, 1, 1]} : vector<10x8x512xf32> to vector<1x8x512xf32>
    %181 = vector.shape_cast %180 : vector<1x8x512xf32> to vector<8x512xf32>
    %c0_94 = arith.constant 0 : index
    %c0_95 = arith.constant 0 : index
    %182 = vector.load %arg5[%c0_94, %c0_95] : memref<128x512xf32, #tpu.memory_space<vmem>>, vector<128x512xf32>
    %cst_96 = arith.constant dense<0.000000e+00> : vector<8x512xf32>
    %183 = tpu.matmul %179, %182, %cst_96 {dimension_numbers = #tpu.dot_dimension_numbers<[1], [0], [0], [1], [0, 0, 1, 1], [], []>} : vector<8x128xf32>, vector<128x512xf32>, vector<8x512xf32> -> vector<8x512xf32>
    %184 = arith.addf %181, %183 : vector<8x512xf32>
    %185 = vector.extract_strided_slice %184 {offsets = [0, 0], sizes = [8, 384], strides = [1, 1]} : vector<8x512xf32> to vector<8x384xf32>
    %186 = arith.negf %185 : vector<8x384xf32>
    %187 = math.exp %186 : vector<8x384xf32>
    %cst_97 = arith.constant 1.000000e+00 : f32
    %188 = vector.broadcast %cst_97 : f32 to vector<8x384xf32>
    %189 = arith.addf %188, %187 : vector<8x384xf32>
    %190 = arith.divf %188, %189 : vector<8x384xf32>
    %191 = vector.extract_strided_slice %184 {offsets = [0, 384], sizes = [8, 128], strides = [1, 1]} : vector<8x512xf32> to vector<8x128xf32>
    %192 = math.tanh %191 : vector<8x128xf32>
    %193 = vector.extract_strided_slice %190 {offsets = [0, 128], sizes = [8, 128], strides = [1, 1]} : vector<8x384xf32> to vector<8x128xf32>
    %c0_98 = arith.constant 0 : index
    %c0_99 = arith.constant 0 : index
    %194 = vector.load %arg8[%c0_98, %c0_99] : memref<8x128xf32, #tpu.memory_space<vmem>>, vector<8x128xf32>
    %195 = arith.mulf %193, %194 : vector<8x128xf32>
    %196 = vector.extract_strided_slice %190 {offsets = [0, 0], sizes = [8, 128], strides = [1, 1]} : vector<8x384xf32> to vector<8x128xf32>
    %197 = arith.mulf %196, %192 : vector<8x128xf32>
    %198 = arith.addf %195, %197 : vector<8x128xf32>
    %199 = vector.extract_strided_slice %190 {offsets = [0, 256], sizes = [8, 128], strides = [1, 1]} : vector<8x384xf32> to vector<8x128xf32>
    %200 = math.tanh %198 : vector<8x128xf32>
    %201 = arith.mulf %199, %200 : vector<8x128xf32>
    %c0_100 = arith.constant 0 : index
    %c0_101 = arith.constant 0 : index
    %202 = vector.load %arg8[%c0_100, %c0_101] : memref<8x128xf32, #tpu.memory_space<vmem>>, vector<8x128xf32>
    tpu.vector_store %arg8[%c0_100, %c0_101], %198 {strides = array<i32>} : memref<8x128xf32, #tpu.memory_space<vmem>>, vector<8x128xf32>,
    %c0_102 = arith.constant 0 : index
    %c0_103 = arith.constant 0 : index
    %203 = vector.load %arg7[%c0_102, %c0_103] : memref<8x128xf32, #tpu.memory_space<vmem>>, vector<8x128xf32>
    tpu.vector_store %arg7[%c0_102, %c0_103], %201 {strides = array<i32>} : memref<8x128xf32, #tpu.memory_space<vmem>>, vector<8x128xf32>,
    %c6 = arith.constant 6 : index
    %c0_104 = arith.constant 0 : index
    %c0_105 = arith.constant 0 : index
    %204 = vector.load %arg6[%c6, %c0_104, %c0_105] : memref<10x8x128xf32, #tpu.memory_space<vmem>>, vector<1x8x128xf32>
    %205 = vector.shape_cast %204 : vector<1x8x128xf32> to vector<8x128xf32>
    %206 = vector.shape_cast %201 : vector<8x128xf32> to vector<1x8x128xf32>
    tpu.vector_store %arg6[%c6, %c0_104, %c0_105], %206 {strides = array<i32>} : memref<10x8x128xf32, #tpu.memory_space<vmem>>, vector<1x8x128xf32>,
    %c0_106 = arith.constant 0 : index
    %c0_107 = arith.constant 0 : index
    %207 = vector.load %arg7[%c0_106, %c0_107] : memref<8x128xf32, #tpu.memory_space<vmem>>, vector<8x128xf32>
    %208 = vector.extract_strided_slice %10 {offsets = [7, 0, 0], sizes = [1, 8, 512], strides = [1, 1, 1]} : vector<10x8x512xf32> to vector<1x8x512xf32>
    %209 = vector.shape_cast %208 : vector<1x8x512xf32> to vector<8x512xf32>
    %c0_108 = arith.constant 0 : index
    %c0_109 = arith.constant 0 : index
    %210 = vector.load %arg5[%c0_108, %c0_109] : memref<128x512xf32, #tpu.memory_space<vmem>>, vector<128x512xf32>
    %cst_110 = arith.constant dense<0.000000e+00> : vector<8x512xf32>
    %211 = tpu.matmul %207, %210, %cst_110 {dimension_numbers = #tpu.dot_dimension_numbers<[1], [0], [0], [1], [0, 0, 1, 1], [], []>} : vector<8x128xf32>, vector<128x512xf32>, vector<8x512xf32> -> vector<8x512xf32>
    %212 = arith.addf %209, %211 : vector<8x512xf32>
    %213 = vector.extract_strided_slice %212 {offsets = [0, 0], sizes = [8, 384], strides = [1, 1]} : vector<8x512xf32> to vector<8x384xf32>
    %214 = arith.negf %213 : vector<8x384xf32>
    %215 = math.exp %214 : vector<8x384xf32>
    %cst_111 = arith.constant 1.000000e+00 : f32
    %216 = vector.broadcast %cst_111 : f32 to vector<8x384xf32>
    %217 = arith.addf %216, %215 : vector<8x384xf32>
    %218 = arith.divf %216, %217 : vector<8x384xf32>
    %219 = vector.extract_strided_slice %212 {offsets = [0, 384], sizes = [8, 128], strides = [1, 1]} : vector<8x512xf32> to vector<8x128xf32>
    %220 = math.tanh %219 : vector<8x128xf32>
    %221 = vector.extract_strided_slice %218 {offsets = [0, 128], sizes = [8, 128], strides = [1, 1]} : vector<8x384xf32> to vector<8x128xf32>
    %c0_112 = arith.constant 0 : index
    %c0_113 = arith.constant 0 : index
    %222 = vector.load %arg8[%c0_112, %c0_113] : memref<8x128xf32, #tpu.memory_space<vmem>>, vector<8x128xf32>
    %223 = arith.mulf %221, %222 : vector<8x128xf32>
    %224 = vector.extract_strided_slice %218 {offsets = [0, 0], sizes = [8, 128], strides = [1, 1]} : vector<8x384xf32> to vector<8x128xf32>
    %225 = arith.mulf %224, %220 : vector<8x128xf32>
    %226 = arith.addf %223, %225 : vector<8x128xf32>
    %227 = vector.extract_strided_slice %218 {offsets = [0, 256], sizes = [8, 128], strides = [1, 1]} : vector<8x384xf32> to vector<8x128xf32>
    %228 = math.tanh %226 : vector<8x128xf32>
    %229 = arith.mulf %227, %228 : vector<8x128xf32>
    %c0_114 = arith.constant 0 : index
    %c0_115 = arith.constant 0 : index
    %230 = vector.load %arg8[%c0_114, %c0_115] : memref<8x128xf32, #tpu.memory_space<vmem>>, vector<8x128xf32>
    tpu.vector_store %arg8[%c0_114, %c0_115], %226 {strides = array<i32>} : memref<8x128xf32, #tpu.memory_space<vmem>>, vector<8x128xf32>,
    %c0_116 = arith.constant 0 : index
    %c0_117 = arith.constant 0 : index
    %231 = vector.load %arg7[%c0_116, %c0_117] : memref<8x128xf32, #tpu.memory_space<vmem>>, vector<8x128xf32>
    tpu.vector_store %arg7[%c0_116, %c0_117], %229 {strides = array<i32>} : memref<8x128xf32, #tpu.memory_space<vmem>>, vector<8x128xf32>,
    %c7 = arith.constant 7 : index
    %c0_118 = arith.constant 0 : index
    %c0_119 = arith.constant 0 : index
    %232 = vector.load %arg6[%c7, %c0_118, %c0_119] : memref<10x8x128xf32, #tpu.memory_space<vmem>>, vector<1x8x128xf32>
    %233 = vector.shape_cast %232 : vector<1x8x128xf32> to vector<8x128xf32>
    %234 = vector.shape_cast %229 : vector<8x128xf32> to vector<1x8x128xf32>
    tpu.vector_store %arg6[%c7, %c0_118, %c0_119], %234 {strides = array<i32>} : memref<10x8x128xf32, #tpu.memory_space<vmem>>, vector<1x8x128xf32>,
    %c0_120 = arith.constant 0 : index
    %c0_121 = arith.constant 0 : index
    %235 = vector.load %arg7[%c0_120, %c0_121] : memref<8x128xf32, #tpu.memory_space<vmem>>, vector<8x128xf32>
    %236 = vector.extract_strided_slice %10 {offsets = [8, 0, 0], sizes = [1, 8, 512], strides = [1, 1, 1]} : vector<10x8x512xf32> to vector<1x8x512xf32>
    %237 = vector.shape_cast %236 : vector<1x8x512xf32> to vector<8x512xf32>
    %c0_122 = arith.constant 0 : index
    %c0_123 = arith.constant 0 : index
    %238 = vector.load %arg5[%c0_122, %c0_123] : memref<128x512xf32, #tpu.memory_space<vmem>>, vector<128x512xf32>
    %cst_124 = arith.constant dense<0.000000e+00> : vector<8x512xf32>
    %239 = tpu.matmul %235, %238, %cst_124 {dimension_numbers = #tpu.dot_dimension_numbers<[1], [0], [0], [1], [0, 0, 1, 1], [], []>} : vector<8x128xf32>, vector<128x512xf32>, vector<8x512xf32> -> vector<8x512xf32>
    %240 = arith.addf %237, %239 : vector<8x512xf32>
    %241 = vector.extract_strided_slice %240 {offsets = [0, 0], sizes = [8, 384], strides = [1, 1]} : vector<8x512xf32> to vector<8x384xf32>
    %242 = arith.negf %241 : vector<8x384xf32>
    %243 = math.exp %242 : vector<8x384xf32>
    %cst_125 = arith.constant 1.000000e+00 : f32
    %244 = vector.broadcast %cst_125 : f32 to vector<8x384xf32>
    %245 = arith.addf %244, %243 : vector<8x384xf32>
    %246 = arith.divf %244, %245 : vector<8x384xf32>
    %247 = vector.extract_strided_slice %240 {offsets = [0, 384], sizes = [8, 128], strides = [1, 1]} : vector<8x512xf32> to vector<8x128xf32>
    %248 = math.tanh %247 : vector<8x128xf32>
    %249 = vector.extract_strided_slice %246 {offsets = [0, 128], sizes = [8, 128], strides = [1, 1]} : vector<8x384xf32> to vector<8x128xf32>
    %c0_126 = arith.constant 0 : index
    %c0_127 = arith.constant 0 : index
    %250 = vector.load %arg8[%c0_126, %c0_127] : memref<8x128xf32, #tpu.memory_space<vmem>>, vector<8x128xf32>
    %251 = arith.mulf %249, %250 : vector<8x128xf32>
    %252 = vector.extract_strided_slice %246 {offsets = [0, 0], sizes = [8, 128], strides = [1, 1]} : vector<8x384xf32> to vector<8x128xf32>
    %253 = arith.mulf %252, %248 : vector<8x128xf32>
    %254 = arith.addf %251, %253 : vector<8x128xf32>
    %255 = vector.extract_strided_slice %246 {offsets = [0, 256], sizes = [8, 128], strides = [1, 1]} : vector<8x384xf32> to vector<8x128xf32>
    %256 = math.tanh %254 : vector<8x128xf32>
    %257 = arith.mulf %255, %256 : vector<8x128xf32>
    %c0_128 = arith.constant 0 : index
    %c0_129 = arith.constant 0 : index
    %258 = vector.load %arg8[%c0_128, %c0_129] : memref<8x128xf32, #tpu.memory_space<vmem>>, vector<8x128xf32>
    tpu.vector_store %arg8[%c0_128, %c0_129], %254 {strides = array<i32>} : memref<8x128xf32, #tpu.memory_space<vmem>>, vector<8x128xf32>,
    %c0_130 = arith.constant 0 : index
    %c0_131 = arith.constant 0 : index
    %259 = vector.load %arg7[%c0_130, %c0_131] : memref<8x128xf32, #tpu.memory_space<vmem>>, vector<8x128xf32>
    tpu.vector_store %arg7[%c0_130, %c0_131], %257 {strides = array<i32>} : memref<8x128xf32, #tpu.memory_space<vmem>>, vector<8x128xf32>,
    %c8 = arith.constant 8 : index
    %c0_132 = arith.constant 0 : index
    %c0_133 = arith.constant 0 : index
    %260 = vector.load %arg6[%c8, %c0_132, %c0_133] : memref<10x8x128xf32, #tpu.memory_space<vmem>>, vector<1x8x128xf32>
    %261 = vector.shape_cast %260 : vector<1x8x128xf32> to vector<8x128xf32>
    %262 = vector.shape_cast %257 : vector<8x128xf32> to vector<1x8x128xf32>
    tpu.vector_store %arg6[%c8, %c0_132, %c0_133], %262 {strides = array<i32>} : memref<10x8x128xf32, #tpu.memory_space<vmem>>, vector<1x8x128xf32>,
    %c0_134 = arith.constant 0 : index
    %c0_135 = arith.constant 0 : index
    %263 = vector.load %arg7[%c0_134, %c0_135] : memref<8x128xf32, #tpu.memory_space<vmem>>, vector<8x128xf32>
    %264 = vector.extract_strided_slice %10 {offsets = [9, 0, 0], sizes = [1, 8, 512], strides = [1, 1, 1]} : vector<10x8x512xf32> to vector<1x8x512xf32>
    %265 = vector.shape_cast %264 : vector<1x8x512xf32> to vector<8x512xf32>
    %c0_136 = arith.constant 0 : index
    %c0_137 = arith.constant 0 : index
    %266 = vector.load %arg5[%c0_136, %c0_137] : memref<128x512xf32, #tpu.memory_space<vmem>>, vector<128x512xf32>
    %cst_138 = arith.constant dense<0.000000e+00> : vector<8x512xf32>
    %267 = tpu.matmul %263, %266, %cst_138 {dimension_numbers = #tpu.dot_dimension_numbers<[1], [0], [0], [1], [0, 0, 1, 1], [], []>} : vector<8x128xf32>, vector<128x512xf32>, vector<8x512xf32> -> vector<8x512xf32>
    %268 = arith.addf %265, %267 : vector<8x512xf32>
    %269 = vector.extract_strided_slice %268 {offsets = [0, 0], sizes = [8, 384], strides = [1, 1]} : vector<8x512xf32> to vector<8x384xf32>
    %270 = arith.negf %269 : vector<8x384xf32>
    %271 = math.exp %270 : vector<8x384xf32>
    %cst_139 = arith.constant 1.000000e+00 : f32
    %272 = vector.broadcast %cst_139 : f32 to vector<8x384xf32>
    %273 = arith.addf %272, %271 : vector<8x384xf32>
    %274 = arith.divf %272, %273 : vector<8x384xf32>
    %275 = vector.extract_strided_slice %268 {offsets = [0, 384], sizes = [8, 128], strides = [1, 1]} : vector<8x512xf32> to vector<8x128xf32>
    %276 = math.tanh %275 : vector<8x128xf32>
    %277 = vector.extract_strided_slice %274 {offsets = [0, 128], sizes = [8, 128], strides = [1, 1]} : vector<8x384xf32> to vector<8x128xf32>
    %c0_140 = arith.constant 0 : index
    %c0_141 = arith.constant 0 : index
    %278 = vector.load %arg8[%c0_140, %c0_141] : memref<8x128xf32, #tpu.memory_space<vmem>>, vector<8x128xf32>
    %279 = arith.mulf %277, %278 : vector<8x128xf32>
    %280 = vector.extract_strided_slice %274 {offsets = [0, 0], sizes = [8, 128], strides = [1, 1]} : vector<8x384xf32> to vector<8x128xf32>
    %281 = arith.mulf %280, %276 : vector<8x128xf32>
    %282 = arith.addf %279, %281 : vector<8x128xf32>
    %283 = vector.extract_strided_slice %274 {offsets = [0, 256], sizes = [8, 128], strides = [1, 1]} : vector<8x384xf32> to vector<8x128xf32>
    %284 = math.tanh %282 : vector<8x128xf32>
    %285 = arith.mulf %283, %284 : vector<8x128xf32>
    %c0_142 = arith.constant 0 : index
    %c0_143 = arith.constant 0 : index
    %286 = vector.load %arg8[%c0_142, %c0_143] : memref<8x128xf32, #tpu.memory_space<vmem>>, vector<8x128xf32>
    tpu.vector_store %arg8[%c0_142, %c0_143], %282 {strides = array<i32>} : memref<8x128xf32, #tpu.memory_space<vmem>>, vector<8x128xf32>,
    %c0_144 = arith.constant 0 : index
    %c0_145 = arith.constant 0 : index
    %287 = vector.load %arg7[%c0_144, %c0_145] : memref<8x128xf32, #tpu.memory_space<vmem>>, vector<8x128xf32>
    tpu.vector_store %arg7[%c0_144, %c0_145], %285 {strides = array<i32>} : memref<8x128xf32, #tpu.memory_space<vmem>>, vector<8x128xf32>,
    %c9 = arith.constant 9 : index
    %c0_146 = arith.constant 0 : index
    %c0_147 = arith.constant 0 : index
    %288 = vector.load %arg6[%c9, %c0_146, %c0_147] : memref<10x8x128xf32, #tpu.memory_space<vmem>>, vector<1x8x128xf32>
    %289 = vector.shape_cast %288 : vector<1x8x128xf32> to vector<8x128xf32>
    %290 = vector.shape_cast %285 : vector<8x128xf32> to vector<1x8x128xf32>
    tpu.vector_store %arg6[%c9, %c0_146, %c0_147], %290 {strides = array<i32>} : memref<10x8x128xf32, #tpu.memory_space<vmem>>, vector<1x8x128xf32>,
    return
  }
  func.func @transform_0(%arg0: i32, %arg1: i32) -> (i32, i32, i32) {
    %c0_i32 = arith.constant 0 : i32
    %c0_i32_0 = arith.constant 0 : i32
    return %arg1, %arg0, %c0_i32 : i32, i32, i32
  }
  func.func @transform_1(%arg0: i32, %arg1: i32) -> (i32, i32) {
    %c0_i32 = arith.constant 0 : i32
    %c0_i32_0 = arith.constant 0 : i32
    %c0_i32_1 = arith.constant 0 : i32
    return %c0_i32, %c0_i32_0 : i32, i32
  }
  func.func @transform_2(%arg0: i32, %arg1: i32) -> (i32, i32) {
    %c0_i32 = arith.constant 0 : i32
    %c0_i32_0 = arith.constant 0 : i32
    %c0_i32_1 = arith.constant 0 : i32
    return %c0_i32, %c0_i32_0 : i32, i32
  }
  func.func @transform_3(%arg0: i32, %arg1: i32) -> (i32, i32) {
    %c0_i32 = arith.constant 0 : i32
    %c0_i32_0 = arith.constant 0 : i32
    %c0_i32_1 = arith.constant 0 : i32
    return %c0_i32, %c0_i32_0 : i32, i32
  }
  func.func @transform_4(%arg0: i32, %arg1: i32) -> (i32, i32, i32) {
    %c0_i32 = arith.constant 0 : i32
    %c0_i32_0 = arith.constant 0 : i32
    return %arg1, %arg0, %c0_i32 : i32, i32, i32
  }
}

module attributes {stable_mosaic.version = 11 : i64} {
  func.func @matmul_bias_kernel(%arg0: i32, %arg1: i32, %arg2: memref<80x128xf32, #tpu.memory_space<vmem>>, %arg3: memref<128x256xf32, #tpu.memory_space<vmem>>, %arg4: memref<1x256xf32, #tpu.memory_space<vmem>>, %arg5: memref<80x256xf32, #tpu.memory_space<vmem>>) attributes {dimension_semantics = [#tpu.dimension_semantics<parallel>, #tpu.dimension_semantics<parallel>], iteration_bounds = array<i64: 1, 2>, scalar_prefetch = 0 : i64, scratch_operands = 0 : i64, tpu.core_type = #tpu.core_type<tc>, window_params = [{transform_indices = @transform_0, window_bounds = array<i64: 80, 128>}, {transform_indices = @transform_1, window_bounds = array<i64: 128, 256>}, {transform_indices = @transform_2, window_bounds = array<i64: 1, 256>}, {transform_indices = @transform_3, window_bounds = array<i64: 80, 256>}]} {
    %c0 = arith.constant 0 : index
    %c0_0 = arith.constant 0 : index
    %0 = vector.load %arg2[%c0, %c0_0] : memref<80x128xf32, #tpu.memory_space<vmem>>, vector<80x128xf32>
    %c0_1 = arith.constant 0 : index
    %c0_2 = arith.constant 0 : index
    %1 = vector.load %arg3[%c0_1, %c0_2] : memref<128x256xf32, #tpu.memory_space<vmem>>, vector<128x256xf32>
    %cst = arith.constant dense<0.000000e+00> : vector<80x256xf32>
    %2 = tpu.matmul %0, %1, %cst {dimension_numbers = #tpu.dot_dimension_numbers<[1], [0], [0], [1], [0, 0, 1, 1], [], []>} : vector<80x128xf32>, vector<128x256xf32>, vector<80x256xf32> -> vector<80x256xf32>
    %c0_3 = arith.constant 0 : index
    %c0_4 = arith.constant 0 : index
    %3 = vector.load %arg4[%c0_3, %c0_4] : memref<1x256xf32, #tpu.memory_space<vmem>>, vector<1x256xf32>
    %4 = vector.broadcast %3 : vector<1x256xf32> to vector<80x256xf32>
    %5 = arith.addf %2, %4 : vector<80x256xf32>
    %c0_5 = arith.constant 0 : index
    %c0_6 = arith.constant 0 : index
    %6 = vector.load %arg5[%c0_5, %c0_6] : memref<80x256xf32, #tpu.memory_space<vmem>>, vector<80x256xf32>
    tpu.vector_store %arg5[%c0_5, %c0_6], %5 {strides = array<i32>} : memref<80x256xf32, #tpu.memory_space<vmem>>, vector<80x256xf32>,
    return
  }
  func.func @transform_0(%arg0: i32, %arg1: i32) -> (i32, i32) {
    %c0_i32 = arith.constant 0 : i32
    %c0_i32_0 = arith.constant 0 : i32
    return %arg0, %c0_i32 : i32, i32
  }
  func.func @transform_1(%arg0: i32, %arg1: i32) -> (i32, i32) {
    %c0_i32 = arith.constant 0 : i32
    %c0_i32_0 = arith.constant 0 : i32
    return %c0_i32, %arg1 : i32, i32
  }
  func.func @transform_2(%arg0: i32, %arg1: i32) -> (i32, i32) {
    %c0_i32 = arith.constant 0 : i32
    %c0_i32_0 = arith.constant 0 : i32
    return %c0_i32, %arg1 : i32, i32
  }
  func.func @transform_3(%arg0: i32, %arg1: i32) -> (i32, i32) {
    %c0_i32 = arith.constant 0 : i32
    return %arg0, %arg1 : i32, i32
  }
}

</mosaic_0001>

<bundles_post_ra>
// kernel: lstm_decoder_forward.3
= control target key start
LH: loop header
LB: loop body
LE: loop exit
PB: predicated region body
PF: predicated region fallthrough
CT: control target
= control target key end

     0   :  { %s832_s12 = smov 0   ;;  %s834_s13 = smov 0   ;;  %s1118_s0 = inlined_call_operand.vmem [shape: f32[80,128], index: 0, kind: input, shape index: {}]   ;;  %s1119_s1 = inlined_call_operand.vmem [shape: f32[128,512], index: 1, kind: input, shape index: {}]   ;;  %s1120_s2 = inlined_call_operand.vmem [shape: f32[1,512], index: 2, kind: input, shape index: {}]   ;;  %s1121_s3 = inlined_call_operand.vmem [shape: f32[80,512], index: 3, kind: output, shape index: {}]  }
   0x1   :  { %s836_s14 = smov 0   ;;  %s838_s15 = smov 0  }
   0x2   :  { %s840_s16 = smov 0  }
   0x3 LB: > { %s22_s17 = sadd.s32 1, %s805_s15  ;;  %s664_s18 = sadd.s32 4294967295, %s809_s16   ;;  %s809_s16 = sphi %s840_s16, %s13_s16   ;;  %s805_s15 = sphi %s838_s15, %s1126_s15   ;;  %s801_s14 = sphi %s836_s14, %s1125_s14   ;;  %s797_s13 = sphi %s834_s13, %s1124_s13   ;;  %s793_s12 = sphi %s832_s12, %s1123_s12  }
   0x4   : > { %p23_p0 = scmp.ge.s32.totalorder %s22_s17, 2  ;;  %p65_p1 = scmp.ne.s32.totalorder %s797_s13, %s793_s12 }
   0x5   : > { %p66_p2 = scmp.eq.s32.totalorder %s809_s16, 0  ;;  %p123_p4 = scmp.eq.s32.totalorder %s664_s18, 1 }
   0x6   : > { %s1128_s17 = smov (%p23_p0, %s22_s17), 0  ;;  %s58_s20 = sadd.s32 1, %s797_s13 }
   0x7   : > { %p67_p3 = por %p66_p2, %p65_p1  ;;  %s55_s19 = ssub.s32 %s805_s15, %s1128_s17 }
   0x8   : > { %p56_p5 = scmp.eq.s32.totalorder %s55_s19, 0  ;;  %p867_p6 = por %p123_p4, %p65_p1 }
   0x9   : > { %p668_p7 = scmp.ge.s32.totalorder %s809_s16, 2 }
   0xa   : > { %s872_s22 = scalar_select %p56_p5, %s797_s13, %s58_s20  }
   0xb   : > { %154 = sbr.rel (%p668_p7) target bundleno = 38 (0x26), region = 20 }
  0x12   : > { %157 = sbr.rel (!%p67_p3) target bundleno = 38 (0x26), region = 24  ;;  %s159_s23 = sand.u32 (%p67_p3), 1, %s797_s13  }
  0x13   : > { %s679_s24 = sshll.u32 (%p67_p3), %s805_s15, 4  ;;  %s669_s25 = sshll.u32 (%p67_p3), %s159_s23, 8 }
  0x14   : > { %s880_s28 = scalar_lea.vmem (%p67_p3), %s1119_s1, %s679_s24  ;;  %s885_s29 = scalar_lea.vmem (%p67_p3), [#allocation2], %s669_s25 }
  0x15   : > { %v177_v0 = vld [vmem:[%s880_s28] sm:$0xff] (%p67_p3)  ;;  %v179_v1 = vld [vmem:[%s880_s28 + $0x8] sm:$0xff] (%p67_p3) }
  0x16   : > { %v181_v2 = vld [vmem:[%s880_s28 + $0x20] sm:$0xff] (%p67_p3)  ;;  %178 = vst [vmem:[%s885_s29] sm:$0xff] (%p67_p3), %v177_v0  ;;  %180 = vst [vmem:[%s885_s29 + $0x8] sm:$0xff] (%p67_p3), %v179_v1  ;;  %v183_v3 = vld [vmem:[%s880_s28 + $0x28] sm:$0xff] (%p67_p3) }
  0x17   : > { %182 = vst [vmem:[%s885_s29 + $0x10] sm:$0xff] (%p67_p3), %v181_v2  ;;  %v185_v4 = vld [vmem:[%s880_s28 + $0x40] sm:$0xff] (%p67_p3)  ;;  %v187_v5 = vld [vmem:[%s880_s28 + $0x48] sm:$0xff] (%p67_p3)  ;;  %184 = vst [vmem:[%s885_s29 + $0x18] sm:$0xff] (%p67_p3), %v183_v3 }
  0x18   : > { %186 = vst [vmem:[%s885_s29 + $0x20] sm:$0xff] (%p67_p3), %v185_v4  ;;  %188 = vst [vmem:[%s885_s29 + $0x28] sm:$0xff] (%p67_p3), %v187_v5  ;;  %v189_v6 = vld [vmem:[%s880_s28 + $0x60] sm:$0xff] (%p67_p3)  ;;  %v191_v7 = vld [vmem:[%s880_s28 + $0x68] sm:$0xff] (%p67_p3) }
  0x19   : > { %v193_v8 = vld [vmem:[%s880_s28 + $0x80] sm:$0xff]  ;;  %190 = vst [vmem:[%s885_s29 + $0x30] sm:$0xff] %v189_v6  ;;  %192 = vst [vmem:[%s885_s29 + $0x38] sm:$0xff] %v191_v7  ;;  %v195_v9 = vld [vmem:[%s880_s28 + $0x88] sm:$0xff] }
  0x1a   : > { %194 = vst [vmem:[%s885_s29 + $0x40] sm:$0xff] %v193_v8  ;;  %v197_v10 = vld [vmem:[%s880_s28 + $0xa0] sm:$0xff]  ;;  %v199_v11 = vld [vmem:[%s880_s28 + $0xa8] sm:$0xff]  ;;  %196 = vst [vmem:[%s885_s29 + $0x48] sm:$0xff] %v195_v9 }
  0x1b   : > { %198 = vst [vmem:[%s885_s29 + $0x50] sm:$0xff] %v197_v10  ;;  %200 = vst [vmem:[%s885_s29 + $0x58] sm:$0xff] %v199_v11  ;;  %v201_v12 = vld [vmem:[%s880_s28 + $0xc0] sm:$0xff]  ;;  %v203_v13 = vld [vmem:[%s880_s28 + $0xc8] sm:$0xff] }
  0x1c   : > { %v205_v14 = vld [vmem:[%s880_s28 + $0xe0] sm:$0xff]  ;;  %202 = vst [vmem:[%s885_s29 + $0x60] sm:$0xff] %v201_v12  ;;  %204 = vst [vmem:[%s885_s29 + $0x68] sm:$0xff] %v203_v13  ;;  %v207_v15 = vld [vmem:[%s880_s28 + $0xe8] sm:$0xff] }
  0x1d   : > { %206 = vst [vmem:[%s885_s29 + $0x70] sm:$0xff] %v205_v14  ;;  %v209_v16 = vld [vmem:[%s880_s28 + $0x100] sm:$0xff]  ;;  %v211_v17 = vld [vmem:[%s880_s28 + $0x108] sm:$0xff]  ;;  %208 = vst [vmem:[%s885_s29 + $0x78] sm:$0xff] %v207_v15 }
  0x1e   : > { %210 = vst [vmem:[%s885_s29 + $0x80] sm:$0xff] %v209_v16  ;;  %212 = vst [vmem:[%s885_s29 + $0x88] sm:$0xff] %v211_v17  ;;  %v213_v18 = vld [vmem:[%s880_s28 + $0x120] sm:$0xff]  ;;  %v215_v19 = vld [vmem:[%s880_s28 + $0x128] sm:$0xff] }
  0x1f   : > { %v217_v20 = vld [vmem:[%s880_s28 + $0x140] sm:$0xff]  ;;  %214 = vst [vmem:[%s885_s29 + $0x90] sm:$0xff] %v213_v18  ;;  %216 = vst [vmem:[%s885_s29 + $0x98] sm:$0xff] %v215_v19  ;;  %v219_v21 = vld [vmem:[%s880_s28 + $0x148] sm:$0xff] }
  0x20   : > { %218 = vst [vmem:[%s885_s29 + $0xa0] sm:$0xff] %v217_v20  ;;  %v221_v22 = vld [vmem:[%s880_s28 + $0x160] sm:$0xff]  ;;  %v223_v23 = vld [vmem:[%s880_s28 + $0x168] sm:$0xff]  ;;  %220 = vst [vmem:[%s885_s29 + $0xa8] sm:$0xff] %v219_v21 }
  0x21   : > { %222 = vst [vmem:[%s885_s29 + $0xb0] sm:$0xff] %v221_v22  ;;  %224 = vst [vmem:[%s885_s29 + $0xb8] sm:$0xff] %v223_v23  ;;  %v225_v24 = vld [vmem:[%s880_s28 + $0x180] sm:$0xff]  ;;  %v227_v25 = vld [vmem:[%s880_s28 + $0x188] sm:$0xff] }
  0x22   : > { %v229_v26 = vld [vmem:[%s880_s28 + $0x1a0] sm:$0xff]  ;;  %226 = vst [vmem:[%s885_s29 + $0xc0] sm:$0xff] %v225_v24  ;;  %228 = vst [vmem:[%s885_s29 + $0xc8] sm:$0xff] %v227_v25  ;;  %v231_v27 = vld [vmem:[%s880_s28 + $0x1a8] sm:$0xff] }
  0x23   : > { %230 = vst [vmem:[%s885_s29 + $0xd0] sm:$0xff] %v229_v26  ;;  %v233_v28 = vld [vmem:[%s880_s28 + $0x1c0] sm:$0xff]  ;;  %v235_v29 = vld [vmem:[%s880_s28 + $0x1c8] sm:$0xff]  ;;  %232 = vst [vmem:[%s885_s29 + $0xd8] sm:$0xff] %v231_v27 }
  0x24   : > { %234 = vst [vmem:[%s885_s29 + $0xe0] sm:$0xff] %v233_v28  ;;  %236 = vst [vmem:[%s885_s29 + $0xe8] sm:$0xff] %v235_v29  ;;  %v237_v30 = vld [vmem:[%s880_s28 + $0x1e0] sm:$0xff]  ;;  %v239_v31 = vld [vmem:[%s880_s28 + $0x1e8] sm:$0xff] }
  0x25   : > { %238 = vst [vmem:[%s885_s29 + $0xf0] sm:$0xff] %v237_v30  ;;  %240 = vst [vmem:[%s885_s29 + $0xf8] sm:$0xff] %v239_v31 }
  0x26 PF: > { %p672_p8 = scmp.ge.s32.totalorder %s809_s16, 1  ;;  %p253_p9 = scmp.lt.s32.totalorder %s809_s16, 3 }
  0x28   : > { %p254_p10 = pnand %p672_p8, %p253_p9 }
  0x29   : > { %s260_s30 = sand.u32 (!%p254_p10), 1, %s793_s12   ;;  %v811_v32 = vmov (!%p254_p10), 0.0   ;;  %v305_v17 = vld [vmem:[%s1118_s0] sm:$0xff] (!%p254_p10)  ;;  %v310_v18 = vld [vmem:[%s1118_s0 + $0x28] sm:$0xff] (!%p254_p10)  ;;  %v311_v20 = vld [vmem:[%s1118_s0 + $0x30] sm:$0xff] (!%p254_p10)  ;;  %s674_s8 = sshll.u32 (!%p254_p10), %s801_s14, 1  ;;  %v349_v27 = vlaneseq (!%p254_p10) }
  0x2a   : > { %257 = sbr.rel (%p254_p10) target bundleno = 319 (0x13f), region = 51  ;;  %s673_s4 = sshll.u32 (!%p254_p10), %s260_s30, 8  ;;  %423 = vmatprep.mubr.f32.mxu0 (!%p254_p10), %v811_v32  ;;  %453 = vmatprep.mubr.f32.mxu1 (!%p254_p10), %v811_v32  ;;  %v306_v19 = vld [vmem:[%s1118_s0 + $0x8] sm:$0xff] (!%p254_p10)  ;;  %v307_v21 = vld [vmem:[%s1118_s0 + $0x10] sm:$0xff] (!%p254_p10)  ;;  %v312_v22 = vld [vmem:[%s1118_s0 + $0x38] sm:$0xff] (!%p254_p10) }
  0x2b   : > { %s955_s5 = scalar_lea.vmem (!%p254_p10), [#allocation2], %s673_s4  ;;  %v308_v23 = vld [vmem:[%s1118_s0 + $0x18] sm:$0xff] (!%p254_p10)  ;;  %v313_v24 = vld [vmem:[%s1118_s0 + $0x40] sm:$0xff] (!%p254_p10)  ;;  %v314_v26 = vld [vmem:[%s1118_s0 + $0x48] sm:$0xff] (!%p254_p10)  ;;  %p299_p11 = scmp.lt.s32.totalorder (!%p254_p10), %s674_s8, 3  ;;  %v350_v28 = vshrl.u32 (!%p254_p10), %v349_v27, 7 }
  0x2c   : > { %v316_v33 = vld [vmem:[%s955_s5 + $0x8] sm:$0xff] (!%p254_p10)  ;;  %v318_v34 = vld [vmem:[%s955_s5 + $0x18] sm:$0xff] (!%p254_p10)  ;;  %v315_v35 = vld [vmem:[%s955_s5] sm:$0xff] (!%p254_p10)  ;;  %s729_s18 = smul.u32 (!%p254_p10), 160, %s260_s30 }
  0x2d   : > { %v681_v36 = vpack.c.bf16 (!%p254_p10), %v318_v34, %v316_v33  ;;  %v317_v37 = vld [vmem:[%s955_s5 + $0x10] sm:$0xff] (!%p254_p10)  ;;  %v320_v38 = vld [vmem:[%s955_s5 + $0x28] sm:$0xff] (!%p254_p10)  ;;  %v322_v39 = vld [vmem:[%s955_s5 + $0x38] sm:$0xff] (!%p254_p10)  ;;  %v351_v29 = vsub.s32 (!%p254_p10), 0, %v350_v28  ;;  %v355_v31 = vsub.s32 (!%p254_p10), 1, %v350_v28 }
  0x2e   : > { %v683_v40 = vpack.c.bf16 (!%p254_p10), %v317_v37, %v315_v35  ;;  %v685_v41 = vpack.c.bf16 (!%p254_p10), %v322_v39, %v320_v38  ;;  %v319_v42 = vld [vmem:[%s955_s5 + $0x20] sm:$0xff] (!%p254_p10)  ;;  %v321_v43 = vld [vmem:[%s955_s5 + $0x30] sm:$0xff] (!%p254_p10)  ;;  %v324_v44 = vld [vmem:[%s955_s5 + $0x48] sm:$0xff] (!%p254_p10)  ;;  %s1033_s19 = scalar_lea.vmem (!%p254_p10), [#allocation3], %s729_s18 }
  0x2f   : > { %682 = vmatprep.subr.bf16.mxu0 (!%p254_p10), %v681_v36  ;;  %713 = vmatprep.subr.bf16.mxu1 (!%p254_p10), %v681_v36  ;;  %v326_v45 = vld [vmem:[%s955_s5 + $0x58] sm:$0xff] (!%p254_p10)  ;;  %v687_v46 = vpack.c.bf16 (!%p254_p10), %v321_v43, %v319_v42  ;;  %v323_v48 = vld [vmem:[%s955_s5 + $0x40] sm:$0xff] (!%p254_p10)  ;;  %v325_v49 = vld [vmem:[%s955_s5 + $0x50] sm:$0xff] (!%p254_p10) }
  0x30   : > { %684 = vmatpush1.bf16.msra.mxu0 (!%p254_p10), %v683_v40  ;;  %721 = vmatpush1.bf16.msra.mxu1 (!%p254_p10), %v683_v40  ;;  %v689_v47 = vpack.c.bf16 (!%p254_p10), %v326_v45, %v324_v44  ;;  %v328_v50 = vld [vmem:[%s955_s5 + $0x68] sm:$0xff] (!%p254_p10)  ;;  %v330_v51 = vld [vmem:[%s955_s5 + $0x78] sm:$0xff] (!%p254_p10)  ;;  %v691_v52 = vpack.c.bf16 (!%p254_p10), %v325_v49, %v323_v48  ;;  %v327_v54 = vld [vmem:[%s955_s5 + $0x60] sm:$0xff] (!%p254_p10) }
  0x31   : > { %686 = vmatprep.subr.bf16.mxu0 %v685_v41  ;;  %714 = vmatprep.subr.bf16.mxu1 %v685_v41  ;;  %v693_v53 = vpack.c.bf16 %v330_v51, %v328_v50  ;;  %v329_v55 = vld [vmem:[%s955_s5 + $0x70] sm:$0xff]  ;;  %v332_v56 = vld [vmem:[%s955_s5 + $0x88] sm:$0xff]  ;;  %v334_v57 = vld [vmem:[%s955_s5 + $0x98] sm:$0xff]  ;;  %s1130_s8 = smov (!%p299_p11, %s674_s8), 3  ;;  %s680_s12 = sshll.u32 (%p867_p6), %s801_s14, 4 }
  0x32   : > { %v695_v58 = vpack.c.bf16 %v329_v55, %v327_v54  ;;  %v697_v59 = vpack.c.bf16 %v334_v57, %v332_v56  ;;  %v331_v60 = vld [vmem:[%s955_s5 + $0x80] sm:$0xff]  ;;  %v333_v61 = vld [vmem:[%s955_s5 + $0x90] sm:$0xff]  ;;  %v336_v62 = vld [vmem:[%s955_s5 + $0xa8] sm:$0xff]  ;;  %s301_s11 = scalar_lea.vmem %s1120_s2, %s1130_s8  ;;  %s1064_s23 = scalar_lea.vmem (%p867_p6), %s1121_s3, %s680_s12 }
  0x33   : > { %v338_v63 = vld [vmem:[%s955_s5 + $0xb8] sm:$0xff]  ;;  %v699_v0 = vpack.c.bf16 %v333_v61, %v331_v60  ;;  %v335_v2 = vld [vmem:[%s955_s5 + $0xa0] sm:$0xff]  ;;  %v337_v3 = vld [vmem:[%s955_s5 + $0xb0] sm:$0xff] }
  0x34   : > { %688 = vmatpush1.bf16.msra.mxu0 %v687_v46  ;;  %722 = vmatpush1.bf16.msra.mxu1 %v687_v46  ;;  %v701_v1 = vpack.c.bf16 %v338_v63, %v336_v62  ;;  %v340_v4 = vld [vmem:[%s955_s5 + $0xc8] sm:$0xff]  ;;  %v342_v5 = vld [vmem:[%s955_s5 + $0xd8] sm:$0xff]  ;;  %v703_v6 = vpack.c.bf16 %v337_v3, %v335_v2  ;;  %v339_v8 = vld [vmem:[%s955_s5 + $0xc0] sm:$0xff] }
  0x35   : > { %690 = vmatprep.subr.bf16.mxu0 %v689_v47  ;;  %715 = vmatprep.subr.bf16.mxu1 %v689_v47  ;;  %v705_v7 = vpack.c.bf16 %v342_v5, %v340_v4  ;;  %v341_v9 = vld [vmem:[%s955_s5 + $0xd0] sm:$0xff]  ;;  %v344_v10 = vld [vmem:[%s955_s5 + $0xe8] sm:$0xff]  ;;  %v346_v11 = vld [vmem:[%s955_s5 + $0xf8] sm:$0xff] }
  0x36   : > { %v707_v12 = vpack.c.bf16 %v341_v9, %v339_v8  ;;  %v709_v13 = vpack.c.bf16 %v346_v11, %v344_v10  ;;  %v343_v14 = vld [vmem:[%s955_s5 + $0xe0] sm:$0xff]  ;;  %v345_v15 = vld [vmem:[%s955_s5 + $0xf0] sm:$0xff] }
  0x37   : > { %v711_v16 = vpack.c.bf16 %v345_v15, %v343_v14  ;;  %v309_v25 = vld [vmem:[%s1118_s0 + $0x20] sm:$0xff] }
  0x38   : > { %692 = vmatpush1.bf16.msra.mxu0 %v691_v52  ;;  %723 = vmatpush1.bf16.msra.mxu1 %v691_v52  ;;  %v347_v30 = vld [vmem:[%s301_s11] sm:$0x3] }
  0x39   : > { %694 = vmatprep.subr.bf16.mxu0 %v693_v53  ;;  %716 = vmatprep.subr.bf16.mxu1 %v693_v53  ;;  %v356_v33 = vrot.slane %v347_v30, %v355_v31 }
  0x3c   : > { %696 = vmatpush1.bf16.msra.mxu0 %v695_v58  ;;  %724 = vmatpush1.bf16.msra.mxu1 %v695_v58 }
  0x3d   : > { %698 = vmatprep.subr.bf16.mxu0 %v697_v59  ;;  %717 = vmatprep.subr.bf16.mxu1 %v697_v59 }
  0x40   : > { %700 = vmatpush1.bf16.msra.mxu0 %v699_v0  ;;  %725 = vmatpush1.bf16.msra.mxu1 %v699_v0 }
  0x41   : > { %702 = vmatprep.subr.bf16.mxu0 %v701_v1  ;;  %718 = vmatprep.subr.bf16.mxu1 %v701_v1 }
  0x44   : > { %704 = vmatpush1.bf16.msra.mxu0 %v703_v6  ;;  %726 = vmatpush1.bf16.msra.mxu1 %v703_v6 }
  0x45   : > { %706 = vmatprep.subr.bf16.mxu0 %v705_v7  ;;  %719 = vmatprep.subr.bf16.mxu1 %v705_v7 }
  0x48   : > { %708 = vmatpush1.bf16.msra.mxu0 %v707_v12  ;;  %727 = vmatpush1.bf16.msra.mxu1 %v707_v12 }
  0x49   : > { %710 = vmatprep.subr.bf16.mxu0 %v709_v13  ;;  %720 = vmatprep.subr.bf16.mxu1 %v709_v13 }
  0x4c   : > { %712 = vmatpush1.bf16.msra.mxu0 %v711_v16  ;;  %728 = vmatpush1.bf16.msra.mxu1 %v711_v16 }
  0x4f   : > { %424 = vmatmul.mubr.f32.vlgmr.msra.gmra.mrb[0].mxu0 %v305_v17  ;;  %454 = vmatmul.mubr.f32.vlgmr.msra.gmra.mrb[0].mxu1 %v310_v18 }
  0x50   : > { %429 = vmatprep.mubr.f32.mxu0 %v811_v32  ;;  %459 = vmatprep.mubr.f32.mxu1 %v811_v32 }
  0x53   : > { %430 = vmatmul.mubr.f32.gmra.mrb[2].mxu0 %v306_v19  ;;  %460 = vmatmul.mubr.f32.gmra.mrb[2].mxu1 %v311_v20 }
  0x54   : > { %435 = vmatprep.mubr.f32.mxu0 %v811_v32  ;;  %465 = vmatprep.mubr.f32.mxu1 %v811_v32 }
  0x57   : > { %436 = vmatmul.mubr.f32.gmra.mrb[4].mxu0 %v307_v21  ;;  %466 = vmatmul.mubr.f32.gmra.mrb[4].mxu1 %v312_v22 }
  0x58   : > { %441 = vmatprep.mubr.f32.mxu0 %v811_v32  ;;  %471 = vmatprep.mubr.f32.mxu1 %v811_v32 }
  0x5b   : > { %442 = vmatmul.mubr.f32.gmra.mrb[6].mxu0 %v308_v23  ;;  %472 = vmatmul.mubr.f32.gmra.mrb[6].mxu1 %v313_v24 }
  0x5c   : > { %447 = vmatprep.mubr.f32.mxu0 %v811_v32  ;;  %477 = vmatprep.mubr.f32.mxu1 %v811_v32  ;;  %v352_v32 = vrot.slane %v347_v30, %v351_v29 }
  0x5f   : > { %448 = vmatmul.mubr.f32.gmra.mrb[8].mxu0 %v309_v25  ;;  %478 = vmatmul.mubr.f32.gmra.mrb[8].mxu1 %v314_v26 }
 0x122   : > { %v425_v34 = vpop.f32.mrb[0].mxu0  ;;  %v455_v35 = vpop.f32.mrb[0].mxu1 }
 0x123   : > { %v426_v36 = vadd.f32 %v425_v34, %v352_v32  ;;  %v456_v37 = vadd.f32 %v455_v35, %v352_v32  ;;  %v427_v38 = vpop.f32.mrb[1].mxu0  ;;  %v457_v39 = vpop.f32.mrb[1].mxu1 }
 0x124   : > { %v428_v40 = vadd.f32 %v427_v38, %v356_v33  ;;  %v458_v41 = vadd.f32 %v457_v39, %v356_v33 }
 0x125   : > { %484 = vst [vmem:[%s1033_s19] sm:$0xff] %v426_v36  ;;  %494 = vst [vmem:[%s1033_s19 + $0x50] sm:$0xff] %v456_v37 }
 0x126   : > { %485 = vst [vmem:[%s1033_s19 + $0x8] sm:$0xff] %v428_v40  ;;  %495 = vst [vmem:[%s1033_s19 + $0x58] sm:$0xff] %v458_v41  ;;  %v431_v42 = vpop.f32.mrb[2].mxu0  ;;  %v461_v43 = vpop.f32.mrb[2].mxu1 }
 0x127   : > { %v432_v44 = vadd.f32 %v431_v42, %v352_v32  ;;  %v462_v45 = vadd.f32 %v461_v43, %v352_v32  ;;  %v433_v46 = vpop.f32.mrb[3].mxu0  ;;  %v463_v47 = vpop.f32.mrb[3].mxu1 }
 0x128   : > { %v434_v48 = vadd.f32 %v433_v46, %v356_v33  ;;  %v464_v49 = vadd.f32 %v463_v47, %v356_v33 }
 0x129   : > { %486 = vst [vmem:[%s1033_s19 + $0x10] sm:$0xff] %v432_v44  ;;  %496 = vst [vmem:[%s1033_s19 + $0x60] sm:$0xff] %v462_v45 }
 0x12a   : > { %487 = vst [vmem:[%s1033_s19 + $0x18] sm:$0xff] %v434_v48  ;;  %497 = vst [vmem:[%s1033_s19 + $0x68] sm:$0xff] %v464_v49  ;;  %v437_v50 = vpop.f32.mrb[4].mxu0  ;;  %v467_v51 = vpop.f32.mrb[4].mxu1 }
 0x12b   : > { %v438_v52 = vadd.f32 %v437_v50, %v352_v32  ;;  %v468_v53 = vadd.f32 %v467_v51, %v352_v32  ;;  %v439_v54 = vpop.f32.mrb[5].mxu0  ;;  %v469_v55 = vpop.f32.mrb[5].mxu1 }
 0x12c   : > { %v440_v56 = vadd.f32 %v439_v54, %v356_v33  ;;  %v470_v57 = vadd.f32 %v469_v55, %v356_v33  ;;  %v529_v10 = vld [vmem:[%s1033_s19] sm:$0xff] (%p867_p6)  ;;  %v549_v20 = vld [vmem:[%s1033_s19 + $0x50] sm:$0xff] (%p867_p6) }
 0x12d   : > { %488 = vst [vmem:[%s1033_s19 + $0x20] sm:$0xff] %v438_v52  ;;  %498 = vst [vmem:[%s1033_s19 + $0x70] sm:$0xff] %v468_v53  ;;  %v531_v11 = vld [vmem:[%s1033_s19 + $0x8] sm:$0xff] (%p867_p6)  ;;  %v551_v21 = vld [vmem:[%s1033_s19 + $0x58] sm:$0xff] (%p867_p6) }
 0x12e   : > { %489 = vst [vmem:[%s1033_s19 + $0x28] sm:$0xff] %v440_v56  ;;  %499 = vst [vmem:[%s1033_s19 + $0x78] sm:$0xff] %v470_v57  ;;  %v443_v58 = vpop.f32.mrb[6].mxu0  ;;  %v473_v59 = vpop.f32.mrb[6].mxu1 }
 0x12f   : > { %v444_v60 = vadd.f32 %v443_v58, %v352_v32  ;;  %v474_v61 = vadd.f32 %v473_v59, %v352_v32  ;;  %v445_v62 = vpop.f32.mrb[7].mxu0  ;;  %v475_v63 = vpop.f32.mrb[7].mxu1  ;;  %530 = vst [vmem:[%s1064_s23] sm:$0xff] (%p867_p6), %v529_v10  ;;  %532 = vst [vmem:[%s1064_s23 + $0x8] sm:$0xff] (%p867_p6), %v531_v11 }
 0x130   : > { %v446_v0 = vadd.f32 %v445_v62, %v356_v33  ;;  %v476_v1 = vadd.f32 %v475_v63, %v356_v33  ;;  %510 = sbr.rel (!%p867_p6) target bundleno = 319 (0x13f), region = 59  ;;  %v533_v12 = vld [vmem:[%s1033_s19 + $0x10] sm:$0xff] (%p867_p6)  ;;  %550 = vst [vmem:[%s1064_s23 + $0xa0] sm:$0xff] (%p867_p6), %v549_v20  ;;  %552 = vst [vmem:[%s1064_s23 + $0xa8] sm:$0xff] (%p867_p6), %v551_v21  ;;  %v553_v22 = vld [vmem:[%s1033_s19 + $0x60] sm:$0xff] (%p867_p6) }
 0x131   : > { %490 = vst [vmem:[%s1033_s19 + $0x30] sm:$0xff] %v444_v60  ;;  %500 = vst [vmem:[%s1033_s19 + $0x80] sm:$0xff] %v474_v61  ;;  %v535_v13 = vld [vmem:[%s1033_s19 + $0x18] sm:$0xff] (%p867_p6)  ;;  %v555_v23 = vld [vmem:[%s1033_s19 + $0x68] sm:$0xff] (%p867_p6) }
 0x132   : > { %491 = vst [vmem:[%s1033_s19 + $0x38] sm:$0xff] %v446_v0  ;;  %501 = vst [vmem:[%s1033_s19 + $0x88] sm:$0xff] %v476_v1  ;;  %v449_v2 = vpop.f32.mrb[8].mxu0  ;;  %v479_v3 = vpop.f32.mrb[8].mxu1 }
 0x133   : > { %v450_v4 = vadd.f32 %v449_v2, %v352_v32  ;;  %v480_v5 = vadd.f32 %v479_v3, %v352_v32  ;;  %v451_v6 = vpop.f32.mrb[9].mxu0  ;;  %v481_v7 = vpop.f32.mrb[9].mxu1  ;;  %534 = vst [vmem:[%s1064_s23 + $0x20] sm:$0xff] (%p867_p6), %v533_v12  ;;  %536 = vst [vmem:[%s1064_s23 + $0x28] sm:$0xff] (%p867_p6), %v535_v13 }
 0x134   : > { %v452_v8 = vadd.f32 %v451_v6, %v356_v33  ;;  %v482_v9 = vadd.f32 %v481_v7, %v356_v33  ;;  %v537_v14 = vld [vmem:[%s1033_s19 + $0x20] sm:$0xff] (%p867_p6)  ;;  %v557_v24 = vld [vmem:[%s1033_s19 + $0x70] sm:$0xff] (%p867_p6)  ;;  %554 = vst [vmem:[%s1064_s23 + $0xc0] sm:$0xff] (%p867_p6), %v553_v22  ;;  %556 = vst [vmem:[%s1064_s23 + $0xc8] sm:$0xff] (%p867_p6), %v555_v23 }
 0x135   : > { %492 = vst [vmem:[%s1033_s19 + $0x40] sm:$0xff] %v450_v4  ;;  %502 = vst [vmem:[%s1033_s19 + $0x90] sm:$0xff] %v480_v5  ;;  %v539_v15 = vld [vmem:[%s1033_s19 + $0x28] sm:$0xff] (%p867_p6)  ;;  %v559_v25 = vld [vmem:[%s1033_s19 + $0x78] sm:$0xff] (%p867_p6) }
 0x136   : > { %493 = vst [vmem:[%s1033_s19 + $0x48] sm:$0xff] %v452_v8  ;;  %503 = vst [vmem:[%s1033_s19 + $0x98] sm:$0xff] %v482_v9 }
 0x137   : > { %538 = vst [vmem:[%s1064_s23 + $0x40] sm:$0xff] %v537_v14  ;;  %540 = vst [vmem:[%s1064_s23 + $0x48] sm:$0xff] %v539_v15 }
 0x138   : > { %v541_v16 = vld [vmem:[%s1033_s19 + $0x30] sm:$0xff]  ;;  %558 = vst [vmem:[%s1064_s23 + $0xe0] sm:$0xff] %v557_v24  ;;  %v561_v26 = vld [vmem:[%s1033_s19 + $0x80] sm:$0xff]  ;;  %560 = vst [vmem:[%s1064_s23 + $0xe8] sm:$0xff] %v559_v25 }
 0x139   : > { %v543_v17 = vld [vmem:[%s1033_s19 + $0x38] sm:$0xff]  ;;  %542 = vst [vmem:[%s1064_s23 + $0x60] sm:$0xff] %v541_v16  ;;  %v563_v27 = vld [vmem:[%s1033_s19 + $0x88] sm:$0xff]  ;;  %562 = vst [vmem:[%s1064_s23 + $0x100] sm:$0xff] %v561_v26 }
 0x13a   : > { %544 = vst [vmem:[%s1064_s23 + $0x68] sm:$0xff] %v543_v17  ;;  %564 = vst [vmem:[%s1064_s23 + $0x108] sm:$0xff] %v563_v27 }
 0x13c   : > { %v545_v18 = vld [vmem:[%s1033_s19 + $0x40] sm:$0xff]  ;;  %v565_v28 = vld [vmem:[%s1033_s19 + $0x90] sm:$0xff] }
 0x13d   : > { %546 = vst [vmem:[%s1064_s23 + $0x80] sm:$0xff] %v545_v18  ;;  %v547_v19 = vld [vmem:[%s1033_s19 + $0x48] sm:$0xff]  ;;  %v567_v29 = vld [vmem:[%s1033_s19 + $0x98] sm:$0xff]  ;;  %566 = vst [vmem:[%s1064_s23 + $0x120] sm:$0xff] %v565_v28 }
 0x13e   : > { %548 = vst [vmem:[%s1064_s23 + $0x88] sm:$0xff] %v547_v19  ;;  %568 = vst [vmem:[%s1064_s23 + $0x128] sm:$0xff] %v567_v29 }
 0x13f PF: > { %s13_s16 = sadd.s32 1, %s809_s16   ;;  %s1123_s12 = smov %s797_s13 }
 0x140   : > { %p10_p12 = scmp.ge.s32.totalorder %s13_s16, 4   ;;  %s1124_s13 = smov %s872_s22 }
 0x141   : > { %s1125_s14 = smov %s805_s15  ;;  %s1126_s15 = smov %s1128_s17 }
 0x142   :  { %12 = sbr.rel (!%p10_p12) target bundleno = 3 (0x3), region = 119 }

// kernel: lstm_decoder_forward.2
= control target key start
LH: loop header
LB: loop body
LE: loop exit
PB: predicated region body
PF: predicated region fallthrough
CT: control target
= control target key end

     0   :  { %v3756_v3 = vmov 0.0   ;;  %s5247_s1 = inlined_call_operand.vmem [shape: f32[128,512], index: 1, kind: input, shape index: {}]   ;;  %s5248_s3 = inlined_call_operand.vmem [shape: f32[128,512], index: 3, kind: input, shape index: {}]   ;;  %s5249_s0 = inlined_call_operand.vmem [shape: f32[10,8,128], index: 0, kind: input, shape index: {}]   ;;  %s5250_s2 = inlined_call_operand.vmem [shape: f32[1,512], index: 2, kind: input, shape index: {}]   ;;  %s5251_s4 = inlined_call_operand.vmem [shape: f32[10,8,128], index: 4, kind: output, shape index: {}]  }
   0x1   :  { %v34_v0 = vld [vmem:[%s5247_s1 + $0x8] sm:$0xff]  ;;  %v36_v2 = vld [vmem:[%s5247_s1 + $0x18] sm:$0xff]  ;;  %183 = vmatprep.mubr.f32.mxu0 %v3756_v3  ;;  %308 = vmatprep.mubr.f32.mxu1 %v3756_v3  ;;  %v33_v6 = vld [vmem:[%s5247_s1] sm:$0xff] }
   0x2   :  { %v38_v1 = vld [vmem:[%s5247_s1 + $0x28] sm:$0xff]  ;;  %v40_v5 = vld [vmem:[%s5247_s1 + $0x38] sm:$0xff]  ;;  %v37_v7 = vld [vmem:[%s5247_s1 + $0x20] sm:$0xff] }
   0x3   :  { %v2811_v4 = vpack.c.bf16 %v38_v1, %v34_v0  ;;  %v2843_v8 = vpack.c.bf16 %v40_v5, %v36_v2  ;;  %v2813_v9 = vpack.c.bf16 %v37_v7, %v33_v6  ;;  %v35_v10 = vld [vmem:[%s5247_s1 + $0x10] sm:$0xff]  ;;  %v42_v12 = vld [vmem:[%s5247_s1 + $0x48] sm:$0xff]  ;;  %v44_v15 = vld [vmem:[%s5247_s1 + $0x58] sm:$0xff] }
   0x4   :  { %v39_v11 = vld [vmem:[%s5247_s1 + $0x30] sm:$0xff]  ;;  %v46_v14 = vld [vmem:[%s5247_s1 + $0x68] sm:$0xff]  ;;  %v48_v16 = vld [vmem:[%s5247_s1 + $0x78] sm:$0xff] }
   0x5   :  { %2812 = vmatprep.subr.bf16.mxu0 %v2811_v4  ;;  %v2845_v13 = vpack.c.bf16 %v39_v11, %v35_v10  ;;  %2844 = vmatprep.subr.bf16.mxu1 %v2843_v8  ;;  %v2815_v17 = vpack.c.bf16 %v46_v14, %v42_v12  ;;  %v2847_v18 = vpack.c.bf16 %v48_v16, %v44_v15  ;;  %v41_v19 = vld [vmem:[%s5247_s1 + $0x40] sm:$0xff]  ;;  %v43_v21 = vld [vmem:[%s5247_s1 + $0x50] sm:$0xff]  ;;  %v50_v24 = vld [vmem:[%s5247_s1 + $0x88] sm:$0xff] }
   0x6   :  { %2814 = vmatpush1.bf16.msra.mxu0 %v2813_v9  ;;  %v45_v20 = vld [vmem:[%s5247_s1 + $0x60] sm:$0xff]  ;;  %v47_v23 = vld [vmem:[%s5247_s1 + $0x70] sm:$0xff]  ;;  %v54_v25 = vld [vmem:[%s5247_s1 + $0xa8] sm:$0xff] }
   0x7   :  { %2846 = vmatpush1.bf16.msra.mxu1 %v2845_v13  ;;  %v2817_v22 = vpack.c.bf16 %v45_v20, %v41_v19  ;;  %2816 = vmatprep.subr.bf16.mxu0 %v2815_v17  ;;  %v2849_v26 = vpack.c.bf16 %v47_v23, %v43_v21  ;;  %v2819_v27 = vpack.c.bf16 %v54_v25, %v50_v24  ;;  %v52_v28 = vld [vmem:[%s5247_s1 + $0x98] sm:$0xff]  ;;  %v49_v30 = vld [vmem:[%s5247_s1 + $0x80] sm:$0xff]  ;;  %v51_v33 = vld [vmem:[%s5247_s1 + $0x90] sm:$0xff] }
   0x8   :  { %2848 = vmatprep.subr.bf16.mxu1 %v2847_v18  ;;  %v56_v29 = vld [vmem:[%s5247_s1 + $0xb8] sm:$0xff]  ;;  %v53_v32 = vld [vmem:[%s5247_s1 + $0xa0] sm:$0xff]  ;;  %v55_v34 = vld [vmem:[%s5247_s1 + $0xb0] sm:$0xff] }
   0x9   :  { %v2851_v31 = vpack.c.bf16 %v56_v29, %v52_v28  ;;  %v2821_v35 = vpack.c.bf16 %v53_v32, %v49_v30  ;;  %v58_v36 = vld [vmem:[%s5247_s1 + $0xc8] sm:$0xff]  ;;  %v60_v38 = vld [vmem:[%s5247_s1 + $0xd8] sm:$0xff]  ;;  %v2853_v39 = vpack.c.bf16 %v55_v34, %v51_v33  ;;  %v57_v42 = vld [vmem:[%s5247_s1 + $0xc0] sm:$0xff] }
   0xa   :  { %2818 = vmatpush1.bf16.msra.mxu0 %v2817_v22  ;;  %v62_v37 = vld [vmem:[%s5247_s1 + $0xe8] sm:$0xff]  ;;  %v64_v41 = vld [vmem:[%s5247_s1 + $0xf8] sm:$0xff]  ;;  %v61_v43 = vld [vmem:[%s5247_s1 + $0xe0] sm:$0xff] }
   0xb   :  { %2850 = vmatpush1.bf16.msra.mxu1 %v2849_v26  ;;  %2820 = vmatprep.subr.bf16.mxu0 %v2819_v27  ;;  %v2823_v40 = vpack.c.bf16 %v62_v37, %v58_v36  ;;  %v2855_v44 = vpack.c.bf16 %v64_v41, %v60_v38  ;;  %v59_v45 = vld [vmem:[%s5247_s1 + $0xd0] sm:$0xff]  ;;  %v66_v47 = vld [vmem:[%s5247_s1 + $0x108] sm:$0xff]  ;;  %v68_v49 = vld [vmem:[%s5247_s1 + $0x118] sm:$0xff]  ;;  %v2825_v51 = vpack.c.bf16 %v61_v43, %v57_v42 }
   0xc   :  { %2852 = vmatprep.subr.bf16.mxu1 %v2851_v31  ;;  %v63_v46 = vld [vmem:[%s5247_s1 + $0xf0] sm:$0xff]  ;;  %v70_v48 = vld [vmem:[%s5247_s1 + $0x128] sm:$0xff]  ;;  %v72_v50 = vld [vmem:[%s5247_s1 + $0x138] sm:$0xff] }
   0xd   :  { %v2857_v52 = vpack.c.bf16 %v63_v46, %v59_v45  ;;  %v2827_v53 = vpack.c.bf16 %v70_v48, %v66_v47  ;;  %v65_v54 = vld [vmem:[%s5247_s1 + $0x100] sm:$0xff]  ;;  %v67_v56 = vld [vmem:[%s5247_s1 + $0x110] sm:$0xff]  ;;  %v2859_v57 = vpack.c.bf16 %v72_v50, %v68_v49  ;;  %v74_v59 = vld [vmem:[%s5247_s1 + $0x148] sm:$0xff] }
   0xe   :  { %2822 = vmatpush1.bf16.msra.mxu0 %v2821_v35  ;;  %v69_v55 = vld [vmem:[%s5247_s1 + $0x120] sm:$0xff]  ;;  %v71_v58 = vld [vmem:[%s5247_s1 + $0x130] sm:$0xff]  ;;  %v78_v60 = vld [vmem:[%s5247_s1 + $0x168] sm:$0xff] }
   0xf   :  { %2854 = vmatpush1.bf16.msra.mxu1 %v2853_v39  ;;  %2824 = vmatprep.subr.bf16.mxu0 %v2823_v40  ;;  %v76_v61 = vld [vmem:[%s5247_s1 + $0x158] sm:$0xff]  ;;  %v2829_v63 = vpack.c.bf16 %v69_v55, %v65_v54  ;;  %v2861_v0 = vpack.c.bf16 %v71_v58, %v67_v56  ;;  %v2831_v1 = vpack.c.bf16 %v78_v60, %v74_v59  ;;  %v73_v2 = vld [vmem:[%s5247_s1 + $0x140] sm:$0xff]  ;;  %v75_v5 = vld [vmem:[%s5247_s1 + $0x150] sm:$0xff] }
  0x10   :  { %2856 = vmatprep.subr.bf16.mxu1 %v2855_v44  ;;  %v80_v62 = vld [vmem:[%s5247_s1 + $0x178] sm:$0xff]  ;;  %v77_v4 = vld [vmem:[%s5247_s1 + $0x160] sm:$0xff]  ;;  %v79_v7 = vld [vmem:[%s5247_s1 + $0x170] sm:$0xff] }
  0x11   :  { %v2863_v6 = vpack.c.bf16 %v80_v62, %v76_v61  ;;  %v82_v8 = vld [vmem:[%s5247_s1 + $0x188] sm:$0xff]  ;;  %v84_v10 = vld [vmem:[%s5247_s1 + $0x198] sm:$0xff]  ;;  %v2833_v12 = vpack.c.bf16 %v77_v4, %v73_v2  ;;  %v2865_v13 = vpack.c.bf16 %v79_v7, %v75_v5  ;;  %v81_v15 = vld [vmem:[%s5247_s1 + $0x180] sm:$0xff] }
  0x12   :  { %2826 = vmatpush1.bf16.msra.mxu0 %v2825_v51  ;;  %v86_v9 = vld [vmem:[%s5247_s1 + $0x1a8] sm:$0xff]  ;;  %v88_v11 = vld [vmem:[%s5247_s1 + $0x1b8] sm:$0xff]  ;;  %v85_v16 = vld [vmem:[%s5247_s1 + $0x1a0] sm:$0xff] }
  0x13   :  { %2858 = vmatpush1.bf16.msra.mxu1 %v2857_v52  ;;  %2828 = vmatprep.subr.bf16.mxu0 %v2827_v53  ;;  %v2835_v14 = vpack.c.bf16 %v86_v9, %v82_v8  ;;  %v83_v17 = vld [vmem:[%s5247_s1 + $0x190] sm:$0xff]  ;;  %v2867_v18 = vpack.c.bf16 %v88_v11, %v84_v10  ;;  %v90_v20 = vld [vmem:[%s5247_s1 + $0x1c8] sm:$0xff]  ;;  %v92_v22 = vld [vmem:[%s5247_s1 + $0x1d8] sm:$0xff]  ;;  %v2837_v24 = vpack.c.bf16 %v85_v16, %v81_v15 }
  0x14   :  { %2860 = vmatprep.subr.bf16.mxu1 %v2859_v57  ;;  %v87_v19 = vld [vmem:[%s5247_s1 + $0x1b0] sm:$0xff]  ;;  %v94_v21 = vld [vmem:[%s5247_s1 + $0x1e8] sm:$0xff]  ;;  %v96_v23 = vld [vmem:[%s5247_s1 + $0x1f8] sm:$0xff] }
  0x15   :  { %v2869_v25 = vpack.c.bf16 %v87_v19, %v83_v17  ;;  %v2839_v26 = vpack.c.bf16 %v94_v21, %v90_v20  ;;  %v89_v27 = vld [vmem:[%s5247_s1 + $0x1c0] sm:$0xff]  ;;  %v91_v29 = vld [vmem:[%s5247_s1 + $0x1d0] sm:$0xff]  ;;  %v2871_v30 = vpack.c.bf16 %v96_v23, %v92_v22  ;;  %v371_v32 = vld [vmem:[%s5248_s3 + $0x8] sm:$0xff] }
  0x16   :  { %2830 = vmatpush1.bf16.msra.mxu0 %v2829_v63  ;;  %v93_v28 = vld [vmem:[%s5247_s1 + $0x1e0] sm:$0xff]  ;;  %v95_v31 = vld [vmem:[%s5247_s1 + $0x1f0] sm:$0xff]  ;;  %v375_v33 = vld [vmem:[%s5248_s3 + $0x28] sm:$0xff] }
  0x17   :  { %2862 = vmatpush1.bf16.msra.mxu1 %v2861_v0  ;;  %2832 = vmatprep.subr.bf16.mxu0 %v2831_v1  ;;  %v373_v34 = vld [vmem:[%s5248_s3 + $0x18] sm:$0xff]  ;;  %v2841_v36 = vpack.c.bf16 %v93_v28, %v89_v27  ;;  %v2873_v37 = vpack.c.bf16 %v95_v31, %v91_v29  ;;  %v3988_v38 = vpack.c.bf16 %v375_v33, %v371_v32  ;;  %v370_v39 = vld [vmem:[%s5248_s3] sm:$0xff]  ;;  %v379_v41 = vld [vmem:[%s5248_s3 + $0x48] sm:$0xff] }
  0x18   :  { %2864 = vmatprep.subr.bf16.mxu1 %v2863_v6  ;;  %v377_v35 = vld [vmem:[%s5248_s3 + $0x38] sm:$0xff]  ;;  %v374_v40 = vld [vmem:[%s5248_s3 + $0x20] sm:$0xff]  ;;  %v383_v43 = vld [vmem:[%s5248_s3 + $0x68] sm:$0xff] }
  0x19   :  { %v3999_v42 = vpack.c.bf16 %v377_v35, %v373_v34  ;;  %v372_v44 = vld [vmem:[%s5248_s3 + $0x10] sm:$0xff]  ;;  %v23_v46 = vld [vmem:[%s5249_s0] sm:$0xff]  ;;  %v4013_v47 = vpack.c.bf16 %v374_v40, %v370_v39  ;;  %v381_v48 = vld [vmem:[%s5248_s3 + $0x58] sm:$0xff]  ;;  %v4028_v52 = vpack.c.bf16 %v383_v43, %v379_v41 }
  0x1a   :  { %2834 = vmatpush1.bf16.msra.mxu0 %v2833_v12  ;;  %v376_v45 = vld [vmem:[%s5248_s3 + $0x30] sm:$0xff]  ;;  %v385_v49 = vld [vmem:[%s5248_s3 + $0x78] sm:$0xff]  ;;  %v378_v50 = vld [vmem:[%s5248_s3 + $0x40] sm:$0xff] }
  0x1b   :  { %2866 = vmatpush1.bf16.msra.mxu1 %v2865_v13  ;;  %2836 = vmatprep.subr.bf16.mxu0 %v2835_v14  ;;  %v382_v51 = vld [vmem:[%s5248_s3 + $0x60] sm:$0xff]  ;;  %v4031_v53 = vpack.c.bf16 %v376_v45, %v372_v44  ;;  %v387_v54 = vld [vmem:[%s5248_s3 + $0x88] sm:$0xff]  ;;  %v4039_v56 = vpack.c.bf16 %v385_v49, %v381_v48  ;;  %v380_v57 = vld [vmem:[%s5248_s3 + $0x50] sm:$0xff] }
  0x1c   :  { %2868 = vmatprep.subr.bf16.mxu1 %v2867_v18  ;;  %v391_v55 = vld [vmem:[%s5248_s3 + $0xa8] sm:$0xff]  ;;  %v384_v58 = vld [vmem:[%s5248_s3 + $0x70] sm:$0xff]  ;;  %v4051_v60 = vpack.c.bf16 %v382_v51, %v378_v50  ;;  %v389_v61 = vld [vmem:[%s5248_s3 + $0x98] sm:$0xff] }
  0x1d   :  { %v24_v59 = vld [vmem:[%s5249_s0 + $0x8] sm:$0xff]  ;;  %v393_v62 = vld [vmem:[%s5248_s3 + $0xb8] sm:$0xff]  ;;  %v4063_v63 = vpack.c.bf16 %v391_v55, %v387_v54  ;;  %v386_v0 = vld [vmem:[%s5248_s3 + $0x80] sm:$0xff]  ;;  %v4071_v2 = vpack.c.bf16 %v384_v58, %v380_v57 }
  0x1e   :  { %2838 = vmatpush1.bf16.msra.mxu0 %v2837_v24  ;;  %v390_v1 = vld [vmem:[%s5248_s3 + $0xa0] sm:$0xff]  ;;  %v395_v4 = vld [vmem:[%s5248_s3 + $0xc8] sm:$0xff]  ;;  %v4080_v6 = vpack.c.bf16 %v393_v62, %v389_v61  ;;  %v388_v7 = vld [vmem:[%s5248_s3 + $0x90] sm:$0xff] }
  0x1f   :  { %2870 = vmatpush1.bf16.msra.mxu1 %v2869_v25  ;;  %2840 = vmatprep.subr.bf16.mxu0 %v2839_v26  ;;  %v399_v5 = vld [vmem:[%s5248_s3 + $0xe8] sm:$0xff]  ;;  %v392_v8 = vld [vmem:[%s5248_s3 + $0xb0] sm:$0xff]  ;;  %v397_v10 = vld [vmem:[%s5248_s3 + $0xd8] sm:$0xff]  ;;  %v4100_v12 = vpack.c.bf16 %v390_v1, %v386_v0 }
  0x20   :  { %2872 = vmatprep.subr.bf16.mxu1 %v2871_v30  ;;  %v25_v9 = vld [vmem:[%s5249_s0 + $0x10] sm:$0xff]  ;;  %v401_v11 = vld [vmem:[%s5248_s3 + $0xf8] sm:$0xff]  ;;  %v4104_v13 = vpack.c.bf16 %v399_v5, %v395_v4  ;;  %v394_v14 = vld [vmem:[%s5248_s3 + $0xc0] sm:$0xff]  ;;  %v4112_v16 = vpack.c.bf16 %v392_v8, %v388_v7 }
  0x21   :  { %v398_v15 = vld [vmem:[%s5248_s3 + $0xe0] sm:$0xff]  ;;  %v403_v17 = vld [vmem:[%s5248_s3 + $0x108] sm:$0xff]  ;;  %v4121_v19 = vpack.c.bf16 %v401_v11, %v397_v10  ;;  %v396_v20 = vld [vmem:[%s5248_s3 + $0xd0] sm:$0xff] }
  0x22   :  { %2842 = vmatpush1.bf16.msra.mxu0 %v2841_v36  ;;  %v407_v18 = vld [vmem:[%s5248_s3 + $0x128] sm:$0xff]  ;;  %v400_v21 = vld [vmem:[%s5248_s3 + $0xf0] sm:$0xff]  ;;  %v26_v22 = vld [vmem:[%s5249_s0 + $0x18] sm:$0xff]  ;;  %v4141_v25 = vpack.c.bf16 %v398_v15, %v394_v14 }
  0x23   :  { %2874 = vmatpush1.bf16.msra.mxu1 %v2873_v37  ;;  %2876 = vmatprep.subr.bf16.mxu0 %v3988_v38  ;;  %v405_v23 = vld [vmem:[%s5248_s3 + $0x118] sm:$0xff]  ;;  %v4145_v26 = vpack.c.bf16 %v407_v18, %v403_v17  ;;  %v402_v27 = vld [vmem:[%s5248_s3 + $0x100] sm:$0xff]  ;;  %v4153_v29 = vpack.c.bf16 %v400_v21, %v396_v20  ;;  %v411_v30 = vld [vmem:[%s5248_s3 + $0x148] sm:$0xff] }
  0x24   :  { %2908 = vmatprep.subr.bf16.mxu1 %v3999_v42  ;;  %v409_v24 = vld [vmem:[%s5248_s3 + $0x138] sm:$0xff]  ;;  %v406_v28 = vld [vmem:[%s5248_s3 + $0x120] sm:$0xff]  ;;  %v415_v32 = vld [vmem:[%s5248_s3 + $0x168] sm:$0xff] }
  0x25   :  { %184 = vmatmul.mubr.f32.vlgmr.msra.gmra.mrb[0].mxu0 %v23_v46  ;;  %v4159_v31 = vpack.c.bf16 %v409_v24, %v405_v23  ;;  %v404_v33 = vld [vmem:[%s5248_s3 + $0x110] sm:$0xff]  ;;  %v27_v35 = vld [vmem:[%s5249_s0 + $0x20] sm:$0xff]  ;;  %v413_v36 = vld [vmem:[%s5248_s3 + $0x158] sm:$0xff]  ;;  %v4182_v39 = vpack.c.bf16 %v406_v28, %v402_v27  ;;  %v4186_v40 = vpack.c.bf16 %v415_v32, %v411_v30  ;;  %v99_v32 = vlaneseq }
  0x26   :  { %309 = vmatmul.mubr.f32.vlgmr.msra.gmra.mrb[0].mxu1 %v23_v46  ;;  %2878 = vmatpush1.bf16.msra.mxu0 %v4013_v47  ;;  %v408_v34 = vld [vmem:[%s5248_s3 + $0x130] sm:$0xff]  ;;  %v417_v37 = vld [vmem:[%s5248_s3 + $0x178] sm:$0xff]  ;;  %v410_v43 = vld [vmem:[%s5248_s3 + $0x140] sm:$0xff] }
  0x27   :  { %189 = vmatprep.mubr.f32.mxu0 %v3756_v3  ;;  %314 = vmatprep.mubr.f32.mxu1 %v3756_v3  ;;  %v4188_v41 = vpack.c.bf16 %v408_v34, %v404_v33  ;;  %v414_v44 = vld [vmem:[%s5248_s3 + $0x160] sm:$0xff]  ;;  %v412_v45 = vld [vmem:[%s5248_s3 + $0x150] sm:$0xff]  ;;  %v4200_v46 = vpack.c.bf16 %v417_v37, %v413_v36  ;;  %v419_v49 = vld [vmem:[%s5248_s3 + $0x188] sm:$0xff]  ;;  %v100_v33 = vshrl.u32 %v99_v32, 7 }
  0x28   :  { %2880 = vmatprep.subr.bf16.mxu0 %v4028_v52  ;;  %2910 = vmatpush1.bf16.msra.mxu1 %v4031_v53  ;;  %v416_v48 = vld [vmem:[%s5248_s3 + $0x170] sm:$0xff]  ;;  %v423_v50 = vld [vmem:[%s5248_s3 + $0x1a8] sm:$0xff]  ;;  %v421_v54 = vld [vmem:[%s5248_s3 + $0x198] sm:$0xff]  ;;  %v4223_v57 = vpack.c.bf16 %v414_v44, %v410_v43 }
  0x29   :  { %190 = vmatmul.mubr.f32.gmra.mrb[2].mxu0 %v24_v59  ;;  %2912 = vmatprep.subr.bf16.mxu1 %v4039_v56  ;;  %v28_v51 = vld [vmem:[%s5249_s0 + $0x28] sm:$0xff]  ;;  %v425_v55 = vld [vmem:[%s5248_s3 + $0x1b8] sm:$0xff]  ;;  %v4227_v58 = vpack.c.bf16 %v416_v48, %v412_v45  ;;  %v418_v61 = vld [vmem:[%s5248_s3 + $0x180] sm:$0xff]  ;;  %v101_v34 = vsub.s32 0, %v100_v33  ;;  %v105_v36 = vsub.s32 1, %v100_v33  ;;  %v109_v45 = vsub.s32 2, %v100_v33 }
  0x2a   :  { %315 = vmatmul.mubr.f32.gmra.mrb[2].mxu1 %v24_v59  ;;  %2882 = vmatpush1.bf16.msra.mxu0 %v4051_v60  ;;  %v4229_v59 = vpack.c.bf16 %v423_v50, %v419_v49  ;;  %v422_v62 = vld [vmem:[%s5248_s3 + $0x1a0] sm:$0xff]  ;;  %v420_v0 = vld [vmem:[%s5248_s3 + $0x190] sm:$0xff]  ;;  %v4241_v1 = vpack.c.bf16 %v425_v55, %v421_v54  ;;  %v427_v5 = vld [vmem:[%s5248_s3 + $0x1c8] sm:$0xff] }
  0x2b   :  { %195 = vmatprep.mubr.f32.mxu0 %v3756_v3  ;;  %320 = vmatprep.mubr.f32.mxu1 %v3756_v3  ;;  %v424_v4 = vld [vmem:[%s5248_s3 + $0x1b0] sm:$0xff]  ;;  %v431_v7 = vld [vmem:[%s5248_s3 + $0x1e8] sm:$0xff]  ;;  %v433_v10 = vld [vmem:[%s5248_s3 + $0x1f8] sm:$0xff]  ;;  %v4264_v11 = vpack.c.bf16 %v422_v62, %v418_v61  ;;  %v113_v62 = vsub.s32 3, %v100_v33 }
  0x2c   :  { %2884 = vmatprep.subr.bf16.mxu0 %v4063_v63  ;;  %2914 = vmatpush1.bf16.msra.mxu1 %v4071_v2  ;;  %v29_v8 = vld [vmem:[%s5249_s0 + $0x30] sm:$0xff]  ;;  %v4268_v14 = vpack.c.bf16 %v424_v4, %v420_v0  ;;  %v4270_v15 = vpack.c.bf16 %v431_v7, %v427_v5  ;;  %v426_v17 = vld [vmem:[%s5248_s3 + $0x1c0] sm:$0xff]  ;;  %v30_v23 = vld [vmem:[%s5249_s0 + $0x38] sm:$0xff] }
  0x2d   :  { %196 = vmatmul.mubr.f32.gmra.mrb[4].mxu0 %v25_v9  ;;  %2916 = vmatprep.subr.bf16.mxu1 %v4080_v6  ;;  %v430_v18 = vld [vmem:[%s5248_s3 + $0x1e0] sm:$0xff]  ;;  %v428_v21 = vld [vmem:[%s5248_s3 + $0x1d0] sm:$0xff]  ;;  %v32_v30 = vld [vmem:[%s5249_s0 + $0x48] sm:$0xff] }
  0x2e   :  { %321 = vmatmul.mubr.f32.gmra.mrb[4].mxu1 %v25_v9  ;;  %201 = vmatprep.mubr.f32.mxu0 %v3756_v3  ;;  %v429_v9 = vld [vmem:[%s5248_s3 + $0x1d8] sm:$0xff]  ;;  %v4293_v24 = vpack.c.bf16 %v430_v18, %v426_v17  ;;  %v31_v28 = vld [vmem:[%s5249_s0 + $0x40] sm:$0xff] }
  0x2f   :  { %326 = vmatprep.mubr.f32.mxu1 %v3756_v3  ;;  %2886 = vmatpush1.bf16.msra.mxu0 %v4100_v12  ;;  %v4279_v20 = vpack.c.bf16 %v433_v10, %v429_v9 }
  0x30   :  { %2888 = vmatprep.subr.bf16.mxu0 %v4104_v13  ;;  %2918 = vmatpush1.bf16.msra.mxu1 %v4112_v16 }
  0x31   :  { %202 = vmatmul.mubr.f32.gmra.mrb[6].mxu0 %v26_v22  ;;  %2920 = vmatprep.subr.bf16.mxu1 %v4121_v19 }
  0x32   :  { %327 = vmatmul.mubr.f32.gmra.mrb[6].mxu1 %v26_v22  ;;  %207 = vmatprep.mubr.f32.mxu0 %v3756_v3  ;;  %v432_v22 = vld [vmem:[%s5248_s3 + $0x1f0] sm:$0xff] }
  0x33   :  { %332 = vmatprep.mubr.f32.mxu1 %v3756_v3  ;;  %2890 = vmatpush1.bf16.msra.mxu0 %v4141_v25  ;;  %v4297_v27 = vpack.c.bf16 %v432_v22, %v428_v21 }
  0x34   :  { %2892 = vmatprep.subr.bf16.mxu0 %v4145_v26  ;;  %2922 = vmatpush1.bf16.msra.mxu1 %v4153_v29 }
  0x35   :  { %208 = vmatmul.mubr.f32.gmra.mrb[8].mxu0 %v27_v35  ;;  %2924 = vmatprep.subr.bf16.mxu1 %v4159_v31 }
  0x36   :  { %333 = vmatmul.mubr.f32.gmra.mrb[8].mxu1 %v27_v35  ;;  %213 = vmatprep.mubr.f32.mxu0 %v3756_v3  ;;  %v97_v35 = vld [vmem:[%s5250_s2] sm:$0xf] }
  0x37   :  { %338 = vmatprep.mubr.f32.mxu1 %v3756_v3  ;;  %2894 = vmatpush1.bf16.msra.mxu0 %v4182_v39  ;;  %v4355_v37 = vrot.slane %v97_v35, %v101_v34  ;;  %v4357_v43 = vrot.slane %v97_v35, %v105_v36  ;;  %v4361_v55 = vrot.slane %v97_v35, %v109_v45 }
  0x38   :  { %2896 = vmatprep.subr.bf16.mxu0 %v4186_v40  ;;  %2926 = vmatpush1.bf16.msra.mxu1 %v4188_v41  ;;  %v4364_v4 = vrot.slane %v97_v35, %v113_v62 }
  0x39   :  { %214 = vmatmul.mubr.f32.gmra.mrb[10].mxu0 %v28_v51  ;;  %2928 = vmatprep.subr.bf16.mxu1 %v4200_v46 }
  0x3a   :  { %339 = vmatmul.mubr.f32.gmra.mrb[10].mxu1 %v28_v51  ;;  %219 = vmatprep.mubr.f32.mxu0 %v3756_v3 }
  0x3b   :  { %344 = vmatprep.mubr.f32.mxu1 %v3756_v3  ;;  %2898 = vmatpush1.bf16.msra.mxu0 %v4223_v57 }
  0x3c   :  { %2930 = vmatpush1.bf16.msra.mxu1 %v4227_v58  ;;  %2900 = vmatprep.subr.bf16.mxu0 %v4229_v59 }
  0x3d   :  { %220 = vmatmul.mubr.f32.gmra.mrb[12].mxu0 %v29_v8  ;;  %2932 = vmatprep.subr.bf16.mxu1 %v4241_v1 }
  0x3e   :  { %345 = vmatmul.mubr.f32.gmra.mrb[12].mxu1 %v29_v8  ;;  %225 = vmatprep.mubr.f32.mxu0 %v3756_v3 }
  0x3f   :  { %350 = vmatprep.mubr.f32.mxu1 %v3756_v3  ;;  %2902 = vmatpush1.bf16.msra.mxu0 %v4264_v11 }
  0x40   :  { %2934 = vmatpush1.bf16.msra.mxu1 %v4268_v14  ;;  %2904 = vmatprep.subr.bf16.mxu0 %v4270_v15 }
  0x41   :  { %226 = vmatmul.mubr.f32.gmra.mrb[14].mxu0 %v30_v23  ;;  %2936 = vmatprep.subr.bf16.mxu1 %v4279_v20 }
  0x42   :  { %351 = vmatmul.mubr.f32.gmra.mrb[14].mxu1 %v30_v23  ;;  %231 = vmatprep.mubr.f32.mxu0 %v3756_v3 }
  0x43   :  { %356 = vmatprep.mubr.f32.mxu1 %v3756_v3  ;;  %2906 = vmatpush1.bf16.msra.mxu0 %v4293_v24 }
  0x44   :  { %2938 = vmatpush1.bf16.msra.mxu1 %v4297_v27  ;;  %2940 = vmatprep.subr.bf16.mxu0 %v3988_v38 }
  0x45   :  { %232 = vmatmul.mubr.f32.gmra.mrb[16].mxu0 %v31_v28  ;;  %2972 = vmatprep.subr.bf16.mxu1 %v3999_v42 }
  0x46   :  { %357 = vmatmul.mubr.f32.gmra.mrb[16].mxu1 %v31_v28  ;;  %237 = vmatprep.mubr.f32.mxu0 %v3756_v3 }
  0x47   :  { %362 = vmatprep.mubr.f32.mxu1 %v3756_v3 }
  0x49   :  { %238 = vmatmul.mubr.f32.gmra.mrb[18].mxu0 %v32_v30 }
  0x4a   :  { %363 = vmatmul.mubr.f32.gmra.mrb[18].mxu1 %v32_v30  ;;  %498 = vmatprep.mubr.f32.mxu0 %v3756_v3 }
  0x4b   :  { %569 = vmatprep.mubr.f32.mxu1 %v3756_v3 }
  0x4d   :  { %499 = vmatmul.mubr.f32.vlgmr.msra.gmra.mrb[0].mxu0 %v3756_v3 }
  0x4e   :  { %570 = vmatmul.mubr.f32.vlgmr.msra.gmra.mrb[0].mxu1 %v3756_v3  ;;  %2942 = vmatpush1.bf16.msra.mxu0 %v4013_v47 }
  0x4f   :  { %2974 = vmatpush1.bf16.msra.mxu1 %v4031_v53  ;;  %2944 = vmatprep.subr.bf16.mxu0 %v4028_v52 }
  0x50   :  { %2976 = vmatprep.subr.bf16.mxu1 %v4039_v56  ;;  %737 = vmatprep.mubr.f32.mxu0 %v3756_v3 }
  0x51   :  { %808 = vmatprep.mubr.f32.mxu1 %v3756_v3 }
  0x52   :  { %2946 = vmatpush1.bf16.msra.mxu0 %v4051_v60 }
  0x53   :  { %2978 = vmatpush1.bf16.msra.mxu1 %v4071_v2  ;;  %2948 = vmatprep.subr.bf16.mxu0 %v4063_v63 }
  0x54   :  { %2980 = vmatprep.subr.bf16.mxu1 %v4080_v6 }
  0x56   :  { %2950 = vmatpush1.bf16.msra.mxu0 %v4100_v12 }
  0x57   :  { %2982 = vmatpush1.bf16.msra.mxu1 %v4112_v16  ;;  %2952 = vmatprep.subr.bf16.mxu0 %v4104_v13 }
  0x58   :  { %2984 = vmatprep.subr.bf16.mxu1 %v4121_v19 }
  0x5a   :  { %2954 = vmatpush1.bf16.msra.mxu0 %v4141_v25 }
  0x5b   :  { %2986 = vmatpush1.bf16.msra.mxu1 %v4153_v29  ;;  %2956 = vmatprep.subr.bf16.mxu0 %v4145_v26 }
  0x5c   :  { %2988 = vmatprep.subr.bf16.mxu1 %v4159_v31 }
  0x5e   :  { %2958 = vmatpush1.bf16.msra.mxu0 %v4182_v39 }
  0x5f   :  { %2990 = vmatpush1.bf16.msra.mxu1 %v4188_v41  ;;  %2960 = vmatprep.subr.bf16.mxu0 %v4186_v40 }
  0x60   :  { %2992 = vmatprep.subr.bf16.mxu1 %v4200_v46 }
  0x62   :  { %2962 = vmatpush1.bf16.msra.mxu0 %v4223_v57 }
  0x63   :  { %2994 = vmatpush1.bf16.msra.mxu1 %v4227_v58  ;;  %2964 = vmatprep.subr.bf16.mxu0 %v4229_v59 }
  0x64   :  { %2996 = vmatprep.subr.bf16.mxu1 %v4241_v1 }
  0x66   :  { %2966 = vmatpush1.bf16.msra.mxu0 %v4264_v11 }
  0x67   :  { %2998 = vmatpush1.bf16.msra.mxu1 %v4268_v14  ;;  %2968 = vmatprep.subr.bf16.mxu0 %v4270_v15 }
  0x68   :  { %3000 = vmatprep.subr.bf16.mxu1 %v4279_v20 }
  0x6a   :  { %2970 = vmatpush1.bf16.msra.mxu0 %v4293_v24 }
  0x6b   :  { %3002 = vmatpush1.bf16.msra.mxu1 %v4297_v27  ;;  %3004 = vmatprep.subr.bf16.mxu0 %v3988_v38 }
  0x6c   :  { %3036 = vmatprep.subr.bf16.mxu1 %v3999_v42 }
 0x120   :  { %v500_v44 = vpop.f32.mrb[0].mxu0 }
 0x121   :  { %v3515_v48 = vadd.f32 %v500_v44, %v4355_v37  ;;  %v571_v49 = vpop.f32.mrb[0].mxu1  ;;  %v502_v38 = vpop.f32.mrb[1].mxu0 }
 0x122   :  { %v3516_v50 = vadd.f32 %v502_v38, %v4357_v43  ;;  %v573_v51 = vpop.f32.mrb[1].mxu1  ;;  %v3535_v0 = vadd.f32 %v571_v49, %v4361_v55 }
 0x123   :  { %v2772_v54 = vmul.f32 -1.442695, %v3515_v48  ;;  %v3536_v7 = vadd.f32 %v573_v51, %v4364_v4 }
 0x124   :  { %v2773_v61 = vmul.f32 -1.442695, %v3516_v50  ;;  %v2774_v5 = vmul.f32 -1.442695, %v3535_v0 }
 0x125   :  { %3596 = vpow2.f32 %v2772_v54 }
 0x126   :  { %3598 = vpow2.f32 %v2773_v61 }
 0x127   :  { %3600 = vpow2.f32 %v2774_v5 }
 0x128   :  { %3602 = vtanh.f32 %v3536_v7 }
 0x12f   :  { %v3597_v8 = vpop.eup %3596 }
 0x130   :  { %v589_v9 = vadd.f32 1.0, %v3597_v8  ;;  %v3599_v10 = vpop.eup %3598 }
 0x131   :  { %v590_v17 = vadd.f32 1.0, %v3599_v10  ;;  %v3601_v18 = vpop.eup %3600  ;;  %v1090_v10 = vld [vmem:[%s5248_s3 + $0x8] sm:$0xff] }
 0x132   :  { %3604 = vrcp.f32 %v589_v9  ;;  %v3603_v21 = vpop.eup %3602  ;;  %v591_v30 = vadd.f32 1.0, %v3601_v18 }
 0x133   :  { %3606 = vrcp.f32 %v590_v17  ;;  %v1094_v17 = vld [vmem:[%s5248_s3 + $0x28] sm:$0xff] }
 0x134   :  { %3608 = vrcp.f32 %v591_v30  ;;  %v4425_v18 = vpack.c.bf16 %v1094_v17, %v1090_v10  ;;  %v1095_v30 = vld [vmem:[%s5248_s3 + $0x30] sm:$0xff]  ;;  %v1336_v17 = vld [vmem:[%s5248_s3 + $0x38] sm:$0xff] }
 0x13c   :  { %v3605_v22 = vpop.eup %3604 }
 0x13d   :  { %v601_v23 = vmul.f32 %v3605_v22, %v3603_v21  ;;  %v3607_v28 = vpop.eup %3606  ;;  %v1089_v21 = vld [vmem:[%s5248_s3] sm:$0xff] }
 0x13e   :  { %v600_v32 = vmul.f32 0.0, %v3607_v28  ;;  %v3609_v34 = vpop.eup %3608  ;;  %v1093_v22 = vld [vmem:[%s5248_s3 + $0x20] sm:$0xff] }
 0x13f   :  { %v4436_v28 = vpack.c.bf16 %v1093_v22, %v1089_v21  ;;  %v1340_v22 = vld [vmem:[%s5248_s3 + $0x58] sm:$0xff] }
 0x140   :  { %v4367_v33 = vadd.f32 %v601_v23, %v600_v32  ;;  %v1091_v23 = vld [vmem:[%s5248_s3 + $0x10] sm:$0xff] }
 0x141   :  { %v4442_v32 = vpack.c.bf16 %v1095_v30, %v1091_v23  ;;  %v1344_v23 = vld [vmem:[%s5248_s3 + $0x78] sm:$0xff] }
 0x142   :  { %3610 = vtanh.f32 %v4367_v33  ;;  %v4577_v30 = vpack.c.bf16 %v1344_v23, %v1340_v22  ;;  %v1383_v22 = vld [vmem:[%s5248_s3 + $0x1b0] sm:$0xff]  ;;  %v1386_v23 = vld [vmem:[%s5248_s3 + $0x1c8] sm:$0xff] }
 0x14c   :  { %v3611_v35 = vpop.eup %3610 }
 0x14d   :  { %v604_v36 = vmul.f32 %v3611_v35, %v3609_v34  ;;  %v1102_v34 = vld [vmem:[%s5248_s3 + $0x68] sm:$0xff] }
 0x14f   :  { %607 = vst [vmem:[%s5251_s4] sm:$0xff] %v604_v36  ;;  %738 = vmatmul.mubr.f32.vlgmr.msra.gmra.mrb[2].mxu0 %v604_v36  ;;  %809 = vmatmul.mubr.f32.vlgmr.msra.gmra.mrb[2].mxu1 %v604_v36  ;;  %v1097_v36 = vld [vmem:[%s5248_s3 + $0x40] sm:$0xff] }
 0x150   :  { %3006 = vmatpush1.bf16.msra.mxu0 %v4013_v47  ;;  %3038 = vmatpush1.bf16.msra.mxu1 %v4031_v53 }
 0x151   :  { %3008 = vmatprep.subr.bf16.mxu0 %v4028_v52  ;;  %3040 = vmatprep.subr.bf16.mxu1 %v4039_v56 }
 0x152   :  { %977 = vmatprep.mubr.f32.mxu0 %v3756_v3  ;;  %1048 = vmatprep.mubr.f32.mxu1 %v3756_v3 }
 0x154   :  { %3010 = vmatpush1.bf16.msra.mxu0 %v4051_v60  ;;  %3042 = vmatpush1.bf16.msra.mxu1 %v4071_v2 }
 0x155   :  { %3012 = vmatprep.subr.bf16.mxu0 %v4063_v63  ;;  %3044 = vmatprep.subr.bf16.mxu1 %v4080_v6 }
 0x158   :  { %3014 = vmatpush1.bf16.msra.mxu0 %v4100_v12  ;;  %3046 = vmatpush1.bf16.msra.mxu1 %v4112_v16 }
 0x159   :  { %3016 = vmatprep.subr.bf16.mxu0 %v4104_v13  ;;  %3048 = vmatprep.subr.bf16.mxu1 %v4121_v19 }
 0x15c   :  { %3018 = vmatpush1.bf16.msra.mxu0 %v4141_v25  ;;  %3050 = vmatpush1.bf16.msra.mxu1 %v4153_v29 }
 0x15d   :  { %3020 = vmatprep.subr.bf16.mxu0 %v4145_v26  ;;  %3052 = vmatprep.subr.bf16.mxu1 %v4159_v31 }
 0x160   :  { %3022 = vmatpush1.bf16.msra.mxu0 %v4182_v39  ;;  %3054 = vmatpush1.bf16.msra.mxu1 %v4188_v41 }
 0x161   :  { %3024 = vmatprep.subr.bf16.mxu0 %v4186_v40  ;;  %3056 = vmatprep.subr.bf16.mxu1 %v4200_v46 }
 0x164   :  { %3026 = vmatpush1.bf16.msra.mxu0 %v4223_v57  ;;  %3058 = vmatpush1.bf16.msra.mxu1 %v4227_v58 }
 0x165   :  { %3028 = vmatprep.subr.bf16.mxu0 %v4229_v59  ;;  %3060 = vmatprep.subr.bf16.mxu1 %v4241_v1 }
 0x168   :  { %3030 = vmatpush1.bf16.msra.mxu0 %v4264_v11  ;;  %3062 = vmatpush1.bf16.msra.mxu1 %v4268_v14 }
 0x169   :  { %3032 = vmatprep.subr.bf16.mxu0 %v4270_v15  ;;  %3064 = vmatprep.subr.bf16.mxu1 %v4279_v20 }
 0x16c   :  { %3034 = vmatpush1.bf16.msra.mxu0 %v4293_v24  ;;  %3066 = vmatpush1.bf16.msra.mxu1 %v4297_v27 }
 0x16d   :  { %3100 = vmatprep.subr.bf16.mxu1 %v3999_v42  ;;  %3068 = vmatprep.subr.bf16.mxu0 %v4425_v18 }
 0x222   :  { %v739_v47 = vpop.f32.mrb[2].mxu0  ;;  %v810_v52 = vpop.f32.mrb[2].mxu1 }
 0x223   :  { %v3517_v53 = vadd.f32 %v739_v47, %v4355_v37  ;;  %v741_v60 = vpop.f32.mrb[3].mxu0  ;;  %v812_v63 = vpop.f32.mrb[3].mxu1  ;;  %v3537_v26 = vadd.f32 %v810_v52, %v4361_v55  ;;  %v1101_v47 = vld [vmem:[%s5248_s3 + $0x60] sm:$0xff] }
 0x224   :  { %v3518_v12 = vadd.f32 %v741_v60, %v4357_v43  ;;  %v3538_v39 = vadd.f32 %v812_v63, %v4364_v4  ;;  %v4461_v52 = vpack.c.bf16 %v1101_v47, %v1097_v36  ;;  %v1110_v60 = vld [vmem:[%s5248_s3 + $0xa8] sm:$0xff]  ;;  %v1348_v47 = vld [vmem:[%s5248_s3 + $0x98] sm:$0xff] }
 0x225   :  { %v2775_v13 = vmul.f32 -1.442695, %v3517_v53  ;;  %v2777_v44 = vmul.f32 -1.442695, %v3537_v26  ;;  %v1106_v53 = vld [vmem:[%s5248_s3 + $0x88] sm:$0xff] }
 0x226   :  { %v2776_v25 = vmul.f32 -1.442695, %v3518_v12  ;;  %v4472_v63 = vpack.c.bf16 %v1110_v60, %v1106_v53  ;;  %v1109_v12 = vld [vmem:[%s5248_s3 + $0xa0] sm:$0xff]  ;;  %v1352_v53 = vld [vmem:[%s5248_s3 + $0xb8] sm:$0xff] }
 0x227   :  { %3612 = vpow2.f32 %v2775_v13  ;;  %v4595_v60 = vpack.c.bf16 %v1352_v53, %v1348_v47  ;;  %v1388_v53 = vld [vmem:[%s5248_s3 + $0x1d8] sm:$0xff] }
 0x228   :  { %3614 = vpow2.f32 %v2776_v25  ;;  %v1118_v25 = vld [vmem:[%s5248_s3 + $0xe8] sm:$0xff] }
 0x229   :  { %3616 = vtanh.f32 %v3538_v39  ;;  %v1117_v39 = vld [vmem:[%s5248_s3 + $0xe0] sm:$0xff] }
 0x22a   :  { %3618 = vpow2.f32 %v2777_v44 }
 0x231   :  { %v3613_v45 = vpop.eup %3612 }
 0x232   :  { %v828_v48 = vadd.f32 1.0, %v3613_v45  ;;  %v3615_v42 = vpop.eup %3614  ;;  %v1126_v45 = vld [vmem:[%s5248_s3 + $0x128] sm:$0xff] }
 0x233   :  { %v829_v49 = vadd.f32 1.0, %v3615_v42  ;;  %v3617_v38 = vpop.eup %3616  ;;  %v1125_v42 = vld [vmem:[%s5248_s3 + $0x120] sm:$0xff] }
 0x234   :  { %3620 = vrcp.f32 %v828_v48  ;;  %v3619_v50 = vpop.eup %3618 }
 0x235   :  { %3622 = vrcp.f32 %v829_v49  ;;  %v830_v62 = vadd.f32 1.0, %v3619_v50 }
 0x237   :  { %3624 = vrcp.f32 %v830_v62 }
 0x23e   :  { %v3621_v51 = vpop.eup %3620 }
 0x23f   :  { %v840_v54 = vmul.f32 %v3621_v51, %v3617_v38  ;;  %v3623_v61 = vpop.eup %3622 }
 0x240   :  { %v839_v0 = vmul.f32 %v3623_v61, %v4367_v33  ;;  %v1098_v33 = vld [vmem:[%s5248_s3 + $0x48] sm:$0xff] }
 0x241   :  { %v3625_v7 = vpop.eup %3624  ;;  %v4452_v35 = vpack.c.bf16 %v1102_v34, %v1098_v33  ;;  %v1339_v33 = vld [vmem:[%s5248_s3 + $0x50] sm:$0xff] }
 0x242   :  { %v4411_v5 = vadd.f32 %v840_v54, %v839_v0  ;;  %v1343_v34 = vld [vmem:[%s5248_s3 + $0x70] sm:$0xff] }
 0x243   :  { %v4585_v36 = vpack.c.bf16 %v1343_v34, %v1339_v33  ;;  %v1390_v33 = vld [vmem:[%s5248_s3 + $0x1e8] sm:$0xff] }
 0x244   :  { %3626 = vtanh.f32 %v4411_v5  ;;  %v4719_v47 = vpack.c.bf16 %v1390_v33, %v1386_v23 }
 0x24e   :  { %v3627_v8 = vpop.eup %3626 }
 0x24f   :  { %v843_v9 = vmul.f32 %v3627_v8, %v3625_v7 }
 0x251   :  { %2778 = vst [vmem:[%s5251_s4 + $0x8] sm:$0xff] %v843_v9  ;;  %978 = vmatmul.mubr.f32.vlgmr.msra.gmra.mrb[4].mxu0 %v843_v9  ;;  %1049 = vmatmul.mubr.f32.vlgmr.msra.gmra.mrb[4].mxu1 %v843_v9 }
 0x252   :  { %1217 = vmatprep.mubr.f32.mxu0 %v3756_v3  ;;  %1288 = vmatprep.mubr.f32.mxu1 %v3756_v3 }
 0x253   :  { %3070 = vmatpush1.bf16.msra.mxu0 %v4436_v28  ;;  %3102 = vmatpush1.bf16.msra.mxu1 %v4442_v32 }
 0x254   :  { %3104 = vmatprep.subr.bf16.mxu1 %v4039_v56  ;;  %3072 = vmatprep.subr.bf16.mxu0 %v4452_v35  ;;  %v1105_v56 = vld [vmem:[%s5248_s3 + $0x80] sm:$0xff] }
 0x255   :  { %v4481_v13 = vpack.c.bf16 %v1109_v12, %v1105_v56  ;;  %v1347_v56 = vld [vmem:[%s5248_s3 + $0x90] sm:$0xff] }
 0x256   :  { %v1351_v12 = vld [vmem:[%s5248_s3 + $0xb0] sm:$0xff] }
 0x257   :  { %3074 = vmatpush1.bf16.msra.mxu0 %v4461_v52  ;;  %3106 = vmatpush1.bf16.msra.mxu1 %v4071_v2  ;;  %v1114_v2 = vld [vmem:[%s5248_s3 + $0xc8] sm:$0xff] }
 0x258   :  { %3108 = vmatprep.subr.bf16.mxu1 %v4080_v6  ;;  %3076 = vmatprep.subr.bf16.mxu0 %v4472_v63  ;;  %v4492_v26 = vpack.c.bf16 %v1118_v25, %v1114_v2  ;;  %v1113_v6 = vld [vmem:[%s5248_s3 + $0xc0] sm:$0xff]  ;;  %v4603_v2 = vpack.c.bf16 %v1351_v12, %v1347_v56  ;;  %v1356_v25 = vld [vmem:[%s5248_s3 + $0xd8] sm:$0xff] }
 0x259   :  { %v4501_v44 = vpack.c.bf16 %v1117_v39, %v1113_v6  ;;  %v1360_v6 = vld [vmem:[%s5248_s3 + $0xf8] sm:$0xff]  ;;  %v1385_v12 = vld [vmem:[%s5248_s3 + $0x1c0] sm:$0xff] }
 0x25a   :  { %v4613_v39 = vpack.c.bf16 %v1360_v6, %v1356_v25  ;;  %v1392_v56 = vld [vmem:[%s5248_s3 + $0x1f8] sm:$0xff]  ;;  %v1389_v6 = vld [vmem:[%s5248_s3 + $0x1e0] sm:$0xff] }
 0x25b   :  { %3078 = vmatpush1.bf16.msra.mxu0 %v4481_v13  ;;  %3110 = vmatpush1.bf16.msra.mxu1 %v4112_v16  ;;  %v1122_v16 = vld [vmem:[%s5248_s3 + $0x108] sm:$0xff]  ;;  %v4730_v25 = vpack.c.bf16 %v1392_v56, %v1388_v53 }
 0x25c   :  { %3112 = vmatprep.subr.bf16.mxu1 %v4121_v19  ;;  %3080 = vmatprep.subr.bf16.mxu0 %v4492_v26  ;;  %v4512_v48 = vpack.c.bf16 %v1126_v45, %v1122_v16  ;;  %v1121_v19 = vld [vmem:[%s5248_s3 + $0x100] sm:$0xff]  ;;  %v1355_v16 = vld [vmem:[%s5248_s3 + $0xd0] sm:$0xff] }
 0x25d   :  { %v4521_v49 = vpack.c.bf16 %v1125_v42, %v1121_v19  ;;  %v1359_v45 = vld [vmem:[%s5248_s3 + $0xf0] sm:$0xff]  ;;  %v1364_v42 = vld [vmem:[%s5248_s3 + $0x118] sm:$0xff] }
 0x25e   :  { %v4621_v19 = vpack.c.bf16 %v1359_v45, %v1355_v16  ;;  %v1387_v16 = vld [vmem:[%s5248_s3 + $0x1d0] sm:$0xff] }
 0x25f   :  { %3082 = vmatpush1.bf16.msra.mxu0 %v4501_v44  ;;  %3114 = vmatpush1.bf16.msra.mxu1 %v4153_v29  ;;  %v1391_v45 = vld [vmem:[%s5248_s3 + $0x1f0] sm:$0xff] }
 0x260   :  { %3116 = vmatprep.subr.bf16.mxu1 %v4159_v31  ;;  %3084 = vmatprep.subr.bf16.mxu0 %v4512_v48 }
 0x263   :  { %3086 = vmatpush1.bf16.msra.mxu0 %v4521_v49  ;;  %3118 = vmatpush1.bf16.msra.mxu1 %v4188_v41 }
 0x264   :  { %3088 = vmatprep.subr.bf16.mxu0 %v4186_v40  ;;  %3120 = vmatprep.subr.bf16.mxu1 %v4200_v46 }
 0x267   :  { %3090 = vmatpush1.bf16.msra.mxu0 %v4223_v57  ;;  %3122 = vmatpush1.bf16.msra.mxu1 %v4227_v58 }
 0x268   :  { %3092 = vmatprep.subr.bf16.mxu0 %v4229_v59  ;;  %3124 = vmatprep.subr.bf16.mxu1 %v4241_v1 }
 0x26b   :  { %3094 = vmatpush1.bf16.msra.mxu0 %v4264_v11  ;;  %3126 = vmatpush1.bf16.msra.mxu1 %v4268_v14 }
 0x26c   :  { %3096 = vmatprep.subr.bf16.mxu0 %v4270_v15  ;;  %3128 = vmatprep.subr.bf16.mxu1 %v4279_v20 }
 0x26f   :  { %3098 = vmatpush1.bf16.msra.mxu0 %v4293_v24  ;;  %3130 = vmatpush1.bf16.msra.mxu1 %v4297_v27 }
 0x270   :  { %3132 = vmatprep.subr.bf16.mxu0 %v4425_v18 }
 0x324   :  { %v979_v29 = vpop.f32.mrb[4].mxu0  ;;  %v1050_v31 = vpop.f32.mrb[4].mxu1 }
 0x325   :  { %v3519_v40 = vadd.f32 %v979_v29, %v4355_v37  ;;  %v981_v41 = vpop.f32.mrb[5].mxu0  ;;  %v1052_v46 = vpop.f32.mrb[5].mxu1  ;;  %v3539_v1 = vadd.f32 %v1050_v31, %v4361_v55  ;;  %v1368_v29 = vld [vmem:[%s5248_s3 + $0x138] sm:$0xff] }
 0x326   :  { %v3520_v57 = vadd.f32 %v981_v41, %v4357_v43  ;;  %v3540_v11 = vadd.f32 %v1052_v46, %v4364_v4  ;;  %v4631_v31 = vpack.c.bf16 %v1368_v29, %v1364_v42  ;;  %v1367_v41 = vld [vmem:[%s5248_s3 + $0x130] sm:$0xff]  ;;  %v4742_v42 = vpack.c.bf16 %v1389_v6, %v1385_v12 }
 0x327   :  { %v2779_v58 = vmul.f32 -1.442695, %v3519_v40  ;;  %v2781_v14 = vmul.f32 -1.442695, %v3539_v1  ;;  %v1363_v40 = vld [vmem:[%s5248_s3 + $0x110] sm:$0xff]  ;;  %v4746_v29 = vpack.c.bf16 %v1391_v45, %v1387_v16 }
 0x328   :  { %v2780_v59 = vmul.f32 -1.442695, %v3520_v57  ;;  %v4639_v46 = vpack.c.bf16 %v1367_v41, %v1363_v40  ;;  %v1370_v57 = vld [vmem:[%s5248_s3 + $0x148] sm:$0xff] }
 0x329   :  { %3628 = vpow2.f32 %v2779_v58  ;;  %v1374_v58 = vld [vmem:[%s5248_s3 + $0x168] sm:$0xff] }
 0x32a   :  { %3630 = vpow2.f32 %v2780_v59  ;;  %v1372_v59 = vld [vmem:[%s5248_s3 + $0x158] sm:$0xff]  ;;  %v4652_v1 = vpack.c.bf16 %v1374_v58, %v1370_v57 }
 0x32b   :  { %3632 = vtanh.f32 %v3540_v11  ;;  %v1376_v11 = vld [vmem:[%s5248_s3 + $0x178] sm:$0xff] }
 0x32c   :  { %3634 = vpow2.f32 %v2781_v14  ;;  %v1369_v14 = vld [vmem:[%s5248_s3 + $0x140] sm:$0xff] }
 0x333   :  { %v3629_v15 = vpop.eup %3628 }
 0x334   :  { %v1068_v20 = vadd.f32 1.0, %v3629_v15  ;;  %v3631_v24 = vpop.eup %3630  ;;  %v1373_v15 = vld [vmem:[%s5248_s3 + $0x160] sm:$0xff] }
 0x335   :  { %v1069_v27 = vadd.f32 1.0, %v3631_v24  ;;  %v3633_v38 = vpop.eup %3632  ;;  %v4665_v24 = vpack.c.bf16 %v1373_v15, %v1369_v14 }
 0x336   :  { %3636 = vrcp.f32 %v1068_v20  ;;  %v3635_v50 = vpop.eup %3634  ;;  %v4663_v20 = vpack.c.bf16 %v1376_v11, %v1372_v59 }
 0x337   :  { %3638 = vrcp.f32 %v1069_v27  ;;  %v1070_v62 = vadd.f32 1.0, %v3635_v50  ;;  %v1371_v27 = vld [vmem:[%s5248_s3 + $0x150] sm:$0xff]  ;;  %v1378_v50 = vld [vmem:[%s5248_s3 + $0x188] sm:$0xff] }
 0x339   :  { %3640 = vrcp.f32 %v1070_v62  ;;  %v1384_v62 = vld [vmem:[%s5248_s3 + $0x1b8] sm:$0xff] }
 0x340   :  { %v3637_v51 = vpop.eup %3636 }
 0x341   :  { %v1080_v54 = vmul.f32 %v3637_v51, %v3633_v38  ;;  %v3639_v61 = vpop.eup %3638  ;;  %v1375_v38 = vld [vmem:[%s5248_s3 + $0x170] sm:$0xff] }
 0x342   :  { %v1079_v0 = vmul.f32 %v3639_v61, %v4411_v5  ;;  %v1332_v5 = vld [vmem:[%s5248_s3 + $0x18] sm:$0xff]  ;;  %v4677_v51 = vpack.c.bf16 %v1375_v38, %v1371_v27 }
 0x343   :  { %v3641_v8 = vpop.eup %3640  ;;  %v4567_v21 = vpack.c.bf16 %v1336_v17, %v1332_v5  ;;  %v1380_v61 = vld [vmem:[%s5248_s3 + $0x198] sm:$0xff]  ;;  %v1379_v5 = vld [vmem:[%s5248_s3 + $0x190] sm:$0xff] }
 0x344   :  { %v4544_v7 = vadd.f32 %v1080_v54, %v1079_v0  ;;  %v1382_v54 = vld [vmem:[%s5248_s3 + $0x1a8] sm:$0xff]  ;;  %v4717_v34 = vpack.c.bf16 %v1383_v22, %v1379_v5 }
 0x345   :  { %3164 = vmatprep.subr.bf16.mxu1 %v4567_v21  ;;  %v4690_v0 = vpack.c.bf16 %v1382_v54, %v1378_v50 }
 0x346   :  { %3642 = vtanh.f32 %v4544_v7 }
 0x350   :  { %v3643_v9 = vpop.eup %3642 }
 0x351   :  { %v1083_v10 = vmul.f32 %v3643_v9, %v3641_v8  ;;  %v4692_v8 = vpack.c.bf16 %v1384_v62, %v1380_v61  ;;  %v1377_v9 = vld [vmem:[%s5248_s3 + $0x180] sm:$0xff] }
 0x353   :  { %2782 = vst [vmem:[%s5251_s4 + $0x10] sm:$0xff] %v1083_v10  ;;  %1218 = vmatmul.mubr.f32.vlgmr.msra.gmra.mrb[6].mxu0 %v1083_v10  ;;  %1289 = vmatmul.mubr.f32.vlgmr.msra.gmra.mrb[6].mxu1 %v1083_v10  ;;  %v1381_v10 = vld [vmem:[%s5248_s3 + $0x1a0] sm:$0xff] }
 0x354   :  { %3134 = vmatpush1.bf16.msra.mxu0 %v4436_v28  ;;  %1457 = vmatprep.mubr.f32.mxu0 %v3756_v3  ;;  %v4704_v17 = vpack.c.bf16 %v1381_v10, %v1377_v9 }
 0x355   :  { %3136 = vmatprep.subr.bf16.mxu0 %v4452_v35  ;;  %1528 = vmatprep.mubr.f32.mxu1 %v3756_v3 }
 0x356   :  { %3166 = vmatpush1.bf16.msra.mxu1 %v4442_v32 }
 0x357   :  { %3168 = vmatprep.subr.bf16.mxu1 %v4577_v30 }
 0x358   :  { %3138 = vmatpush1.bf16.msra.mxu0 %v4461_v52 }
 0x359   :  { %3140 = vmatprep.subr.bf16.mxu0 %v4472_v63 }
 0x35a   :  { %3170 = vmatpush1.bf16.msra.mxu1 %v4585_v36 }
 0x35b   :  { %3172 = vmatprep.subr.bf16.mxu1 %v4595_v60 }
 0x35c   :  { %3142 = vmatpush1.bf16.msra.mxu0 %v4481_v13 }
 0x35d   :  { %3144 = vmatprep.subr.bf16.mxu0 %v4492_v26 }
 0x35e   :  { %3174 = vmatpush1.bf16.msra.mxu1 %v4603_v2 }
 0x35f   :  { %3176 = vmatprep.subr.bf16.mxu1 %v4613_v39 }
 0x360   :  { %3146 = vmatpush1.bf16.msra.mxu0 %v4501_v44 }
 0x361   :  { %3148 = vmatprep.subr.bf16.mxu0 %v4512_v48 }
 0x362   :  { %3178 = vmatpush1.bf16.msra.mxu1 %v4621_v19 }
 0x363   :  { %3180 = vmatprep.subr.bf16.mxu1 %v4631_v31 }
 0x364   :  { %3150 = vmatpush1.bf16.msra.mxu0 %v4521_v49 }
 0x365   :  { %3152 = vmatprep.subr.bf16.mxu0 %v4652_v1 }
 0x366   :  { %3182 = vmatpush1.bf16.msra.mxu1 %v4639_v46 }
 0x367   :  { %3184 = vmatprep.subr.bf16.mxu1 %v4663_v20 }
 0x368   :  { %3154 = vmatpush1.bf16.msra.mxu0 %v4665_v24 }
 0x369   :  { %3156 = vmatprep.subr.bf16.mxu0 %v4690_v0 }
 0x36a   :  { %3186 = vmatpush1.bf16.msra.mxu1 %v4677_v51 }
 0x36b   :  { %3188 = vmatprep.subr.bf16.mxu1 %v4692_v8 }
 0x36c   :  { %3158 = vmatpush1.bf16.msra.mxu0 %v4704_v17 }
 0x36d   :  { %3160 = vmatprep.subr.bf16.mxu0 %v4719_v47 }
 0x36e   :  { %3190 = vmatpush1.bf16.msra.mxu1 %v4717_v34 }
 0x36f   :  { %3192 = vmatprep.subr.bf16.mxu1 %v4730_v25 }
 0x370   :  { %3162 = vmatpush1.bf16.msra.mxu0 %v4742_v42 }
 0x371   :  { %3196 = vmatprep.subr.bf16.mxu0 %v4425_v18 }
 0x372   :  { %3194 = vmatpush1.bf16.msra.mxu1 %v4746_v29 }
 0x373   :  { %3228 = vmatprep.subr.bf16.mxu1 %v4567_v21 }
 0x426   :  { %v1219_v40 = vpop.f32.mrb[6].mxu0  ;;  %v1290_v41 = vpop.f32.mrb[6].mxu1 }
 0x427   :  { %v3521_v57 = vadd.f32 %v1219_v40, %v4355_v37  ;;  %v1221_v58 = vpop.f32.mrb[7].mxu0  ;;  %v1292_v59 = vpop.f32.mrb[7].mxu1  ;;  %v3541_v27 = vadd.f32 %v1290_v41, %v4361_v55 }
 0x428   :  { %v3522_v11 = vadd.f32 %v1221_v58, %v4357_v43  ;;  %v3542_v38 = vadd.f32 %v1292_v59, %v4364_v4 }
 0x429   :  { %v2783_v14 = vmul.f32 -1.442695, %v3521_v57  ;;  %v2785_v50 = vmul.f32 -1.442695, %v3541_v27 }
 0x42a   :  { %v2784_v15 = vmul.f32 -1.442695, %v3522_v11 }
 0x42b   :  { %3644 = vpow2.f32 %v2783_v14 }
 0x42c   :  { %3646 = vpow2.f32 %v2784_v15 }
 0x42d   :  { %3648 = vtanh.f32 %v3542_v38 }
 0x42e   :  { %3650 = vpow2.f32 %v2785_v50 }
 0x435   :  { %v3645_v54 = vpop.eup %3644 }
 0x436   :  { %v1308_v61 = vadd.f32 1.0, %v3645_v54  ;;  %v3647_v62 = vpop.eup %3646 }
 0x437   :  { %v1309_v9 = vadd.f32 1.0, %v3647_v62  ;;  %v3649_v10 = vpop.eup %3648 }
 0x438   :  { %3652 = vrcp.f32 %v1308_v61  ;;  %v3651_v5 = vpop.eup %3650 }
 0x439   :  { %3654 = vrcp.f32 %v1309_v9  ;;  %v1310_v53 = vadd.f32 1.0, %v3651_v5 }
 0x43b   :  { %3656 = vrcp.f32 %v1310_v53 }
 0x442   :  { %v3653_v22 = vpop.eup %3652 }
 0x443   :  { %v1320_v23 = vmul.f32 %v3653_v22, %v3649_v10  ;;  %v3655_v33 = vpop.eup %3654 }
 0x444   :  { %v1319_v56 = vmul.f32 %v3655_v33, %v4544_v7 }
 0x445   :  { %v3657_v6 = vpop.eup %3656 }
 0x446   :  { %v4758_v12 = vadd.f32 %v1320_v23, %v1319_v56 }
 0x448   :  { %3658 = vtanh.f32 %v4758_v12 }
 0x452   :  { %v3659_v16 = vpop.eup %3658 }
 0x453   :  { %v1323_v45 = vmul.f32 %v3659_v16, %v3657_v6 }
 0x455   :  { %2786 = vst [vmem:[%s5251_s4 + $0x18] sm:$0xff] %v1323_v45  ;;  %1458 = vmatmul.mubr.f32.vlgmr.msra.gmra.mrb[8].mxu0 %v1323_v45  ;;  %1529 = vmatmul.mubr.f32.vlgmr.msra.gmra.mrb[8].mxu1 %v1323_v45 }
 0x456   :  { %3198 = vmatpush1.bf16.msra.mxu0 %v4436_v28  ;;  %3230 = vmatpush1.bf16.msra.mxu1 %v4442_v32 }
 0x457   :  { %3200 = vmatprep.subr.bf16.mxu0 %v4452_v35  ;;  %3232 = vmatprep.subr.bf16.mxu1 %v4577_v30 }
 0x458   :  { %1697 = vmatprep.mubr.f32.mxu0 %v3756_v3  ;;  %1768 = vmatprep.mubr.f32.mxu1 %v3756_v3 }
 0x45a   :  { %3202 = vmatpush1.bf16.msra.mxu0 %v4461_v52  ;;  %3234 = vmatpush1.bf16.msra.mxu1 %v4585_v36 }
 0x45b   :  { %3204 = vmatprep.subr.bf16.mxu0 %v4472_v63  ;;  %3236 = vmatprep.subr.bf16.mxu1 %v4595_v60 }
 0x45e   :  { %3206 = vmatpush1.bf16.msra.mxu0 %v4481_v13  ;;  %3238 = vmatpush1.bf16.msra.mxu1 %v4603_v2 }
 0x45f   :  { %3208 = vmatprep.subr.bf16.mxu0 %v4492_v26  ;;  %3240 = vmatprep.subr.bf16.mxu1 %v4613_v39 }
 0x462   :  { %3210 = vmatpush1.bf16.msra.mxu0 %v4501_v44  ;;  %3242 = vmatpush1.bf16.msra.mxu1 %v4621_v19 }
 0x463   :  { %3212 = vmatprep.subr.bf16.mxu0 %v4512_v48  ;;  %3244 = vmatprep.subr.bf16.mxu1 %v4631_v31 }
 0x466   :  { %3214 = vmatpush1.bf16.msra.mxu0 %v4521_v49  ;;  %3246 = vmatpush1.bf16.msra.mxu1 %v4639_v46 }
 0x467   :  { %3216 = vmatprep.subr.bf16.mxu0 %v4652_v1  ;;  %3248 = vmatprep.subr.bf16.mxu1 %v4663_v20 }
 0x46a   :  { %3218 = vmatpush1.bf16.msra.mxu0 %v4665_v24  ;;  %3250 = vmatpush1.bf16.msra.mxu1 %v4677_v51 }
 0x46b   :  { %3220 = vmatprep.subr.bf16.mxu0 %v4690_v0  ;;  %3252 = vmatprep.subr.bf16.mxu1 %v4692_v8 }
 0x46e   :  { %3222 = vmatpush1.bf16.msra.mxu0 %v4704_v17  ;;  %3254 = vmatpush1.bf16.msra.mxu1 %v4717_v34 }
 0x46f   :  { %3224 = vmatprep.subr.bf16.mxu0 %v4719_v47  ;;  %3256 = vmatprep.subr.bf16.mxu1 %v4730_v25 }
 0x472   :  { %3226 = vmatpush1.bf16.msra.mxu0 %v4742_v42  ;;  %3258 = vmatpush1.bf16.msra.mxu1 %v4746_v29 }
 0x473   :  { %3260 = vmatprep.subr.bf16.mxu0 %v4425_v18  ;;  %3292 = vmatprep.subr.bf16.mxu1 %v4567_v21 }
 0x528   :  { %v1459_v7 = vpop.f32.mrb[8].mxu0  ;;  %v1530_v40 = vpop.f32.mrb[8].mxu1 }
 0x529   :  { %v3523_v41 = vadd.f32 %v1459_v7, %v4355_v37  ;;  %v1461_v57 = vpop.f32.mrb[9].mxu0  ;;  %v1532_v58 = vpop.f32.mrb[9].mxu1  ;;  %v3543_v15 = vadd.f32 %v1530_v40, %v4361_v55 }
 0x52a   :  { %v3524_v59 = vadd.f32 %v1461_v57, %v4357_v43  ;;  %v3544_v27 = vadd.f32 %v1532_v58, %v4364_v4 }
 0x52b   :  { %v2787_v11 = vmul.f32 -1.442695, %v3523_v41  ;;  %v2789_v38 = vmul.f32 -1.442695, %v3543_v15 }
 0x52c   :  { %v2788_v14 = vmul.f32 -1.442695, %v3524_v59 }
 0x52d   :  { %3660 = vpow2.f32 %v2787_v11 }
 0x52e   :  { %3662 = vpow2.f32 %v2788_v14 }
 0x52f   :  { %3664 = vtanh.f32 %v3544_v27 }
 0x530   :  { %3666 = vpow2.f32 %v2789_v38 }
 0x537   :  { %v3661_v18 = vpop.eup %3660 }
 0x538   :  { %v1548_v50 = vadd.f32 1.0, %v3661_v18  ;;  %v3663_v54 = vpop.eup %3662 }
 0x539   :  { %v1549_v61 = vadd.f32 1.0, %v3663_v54  ;;  %v3665_v62 = vpop.eup %3664  ;;  %v2050_v54 = vld [vmem:[%s5248_s3 + $0x8] sm:$0xff] }
 0x53a   :  { %3668 = vrcp.f32 %v1548_v50  ;;  %v3667_v9 = vpop.eup %3666 }
 0x53b   :  { %3670 = vrcp.f32 %v1549_v61  ;;  %v1550_v23 = vadd.f32 1.0, %v3667_v9  ;;  %v2054_v61 = vld [vmem:[%s5248_s3 + $0x28] sm:$0xff]  ;;  %v2049_v9 = vld [vmem:[%s5248_s3] sm:$0xff] }
 0x53d   :  { %3672 = vrcp.f32 %v1550_v23  ;;  %v2055_v23 = vld [vmem:[%s5248_s3 + $0x30] sm:$0xff] }
 0x544   :  { %v3669_v10 = vpop.eup %3668 }
 0x545   :  { %v1560_v5 = vmul.f32 %v3669_v10, %v3665_v62  ;;  %v3671_v22 = vpop.eup %3670  ;;  %v4861_v62 = vpack.c.bf16 %v2054_v61, %v2050_v54  ;;  %v2053_v10 = vld [vmem:[%s5248_s3 + $0x20] sm:$0xff]  ;;  %v2296_v61 = vld [vmem:[%s5248_s3 + $0x38] sm:$0xff] }
 0x546   :  { %v1559_v33 = vmul.f32 %v3671_v22, %v4758_v12  ;;  %v4872_v22 = vpack.c.bf16 %v2053_v10, %v2049_v9  ;;  %v2300_v10 = vld [vmem:[%s5248_s3 + $0x58] sm:$0xff] }
 0x547   :  { %v3673_v56 = vpop.eup %3672 }
 0x548   :  { %v4803_v53 = vadd.f32 %v1560_v5, %v1559_v33  ;;  %v2051_v5 = vld [vmem:[%s5248_s3 + $0x10] sm:$0xff] }
 0x549   :  { %v4878_v33 = vpack.c.bf16 %v2055_v23, %v2051_v5  ;;  %v2304_v5 = vld [vmem:[%s5248_s3 + $0x78] sm:$0xff] }
 0x54a   :  { %3674 = vtanh.f32 %v4803_v53  ;;  %v5013_v23 = vpack.c.bf16 %v2304_v5, %v2300_v10  ;;  %v2343_v10 = vld [vmem:[%s5248_s3 + $0x1b0] sm:$0xff]  ;;  %v2346_v5 = vld [vmem:[%s5248_s3 + $0x1c8] sm:$0xff] }
 0x554   :  { %v3675_v6 = vpop.eup %3674 }
 0x555   :  { %v1563_v16 = vmul.f32 %v3675_v6, %v3673_v56  ;;  %v2062_v56 = vld [vmem:[%s5248_s3 + $0x68] sm:$0xff] }
 0x557   :  { %2790 = vst [vmem:[%s5251_s4 + $0x20] sm:$0xff] %v1563_v16  ;;  %1698 = vmatmul.mubr.f32.vlgmr.msra.gmra.mrb[10].mxu0 %v1563_v16  ;;  %1769 = vmatmul.mubr.f32.vlgmr.msra.gmra.mrb[10].mxu1 %v1563_v16  ;;  %v2057_v16 = vld [vmem:[%s5248_s3 + $0x40] sm:$0xff] }
 0x558   :  { %3262 = vmatpush1.bf16.msra.mxu0 %v4436_v28  ;;  %3294 = vmatpush1.bf16.msra.mxu1 %v4442_v32 }
 0x559   :  { %3264 = vmatprep.subr.bf16.mxu0 %v4452_v35  ;;  %3296 = vmatprep.subr.bf16.mxu1 %v4577_v30 }
 0x55a   :  { %1937 = vmatprep.mubr.f32.mxu0 %v3756_v3  ;;  %2008 = vmatprep.mubr.f32.mxu1 %v3756_v3 }
 0x55c   :  { %3266 = vmatpush1.bf16.msra.mxu0 %v4461_v52  ;;  %3298 = vmatpush1.bf16.msra.mxu1 %v4585_v36 }
 0x55d   :  { %3268 = vmatprep.subr.bf16.mxu0 %v4472_v63  ;;  %3300 = vmatprep.subr.bf16.mxu1 %v4595_v60 }
 0x560   :  { %3270 = vmatpush1.bf16.msra.mxu0 %v4481_v13  ;;  %3302 = vmatpush1.bf16.msra.mxu1 %v4603_v2 }
 0x561   :  { %3272 = vmatprep.subr.bf16.mxu0 %v4492_v26  ;;  %3304 = vmatprep.subr.bf16.mxu1 %v4613_v39 }
 0x564   :  { %3274 = vmatpush1.bf16.msra.mxu0 %v4501_v44  ;;  %3306 = vmatpush1.bf16.msra.mxu1 %v4621_v19 }
 0x565   :  { %3276 = vmatprep.subr.bf16.mxu0 %v4512_v48  ;;  %3308 = vmatprep.subr.bf16.mxu1 %v4631_v31 }
 0x568   :  { %3278 = vmatpush1.bf16.msra.mxu0 %v4521_v49  ;;  %3310 = vmatpush1.bf16.msra.mxu1 %v4639_v46 }
 0x569   :  { %3280 = vmatprep.subr.bf16.mxu0 %v4652_v1  ;;  %3312 = vmatprep.subr.bf16.mxu1 %v4663_v20 }
 0x56c   :  { %3282 = vmatpush1.bf16.msra.mxu0 %v4665_v24  ;;  %3314 = vmatpush1.bf16.msra.mxu1 %v4677_v51 }
 0x56d   :  { %3284 = vmatprep.subr.bf16.mxu0 %v4690_v0  ;;  %3316 = vmatprep.subr.bf16.mxu1 %v4692_v8 }
 0x570   :  { %3286 = vmatpush1.bf16.msra.mxu0 %v4704_v17  ;;  %3318 = vmatpush1.bf16.msra.mxu1 %v4717_v34 }
 0x571   :  { %3288 = vmatprep.subr.bf16.mxu0 %v4719_v47  ;;  %3320 = vmatprep.subr.bf16.mxu1 %v4730_v25 }
 0x574   :  { %3290 = vmatpush1.bf16.msra.mxu0 %v4742_v42  ;;  %3322 = vmatpush1.bf16.msra.mxu1 %v4746_v29 }
 0x575   :  { %3356 = vmatprep.subr.bf16.mxu1 %v4567_v21  ;;  %3324 = vmatprep.subr.bf16.mxu0 %v4861_v62 }
 0x62a   :  { %v1699_v28 = vpop.f32.mrb[10].mxu0  ;;  %v1770_v32 = vpop.f32.mrb[10].mxu1 }
 0x62b   :  { %v3525_v35 = vadd.f32 %v1699_v28, %v4355_v37  ;;  %v1701_v52 = vpop.f32.mrb[11].mxu0  ;;  %v1772_v63 = vpop.f32.mrb[11].mxu1  ;;  %v3545_v48 = vadd.f32 %v1770_v32, %v4361_v55  ;;  %v2061_v28 = vld [vmem:[%s5248_s3 + $0x60] sm:$0xff] }
 0x62c   :  { %v3526_v13 = vadd.f32 %v1701_v52, %v4357_v43  ;;  %v3546_v49 = vadd.f32 %v1772_v63, %v4364_v4  ;;  %v4897_v32 = vpack.c.bf16 %v2061_v28, %v2057_v16  ;;  %v2070_v52 = vld [vmem:[%s5248_s3 + $0xa8] sm:$0xff]  ;;  %v2308_v28 = vld [vmem:[%s5248_s3 + $0x98] sm:$0xff] }
 0x62d   :  { %v2791_v26 = vmul.f32 -1.442695, %v3525_v35  ;;  %v2793_v12 = vmul.f32 -1.442695, %v3545_v48  ;;  %v2066_v35 = vld [vmem:[%s5248_s3 + $0x88] sm:$0xff] }
 0x62e   :  { %v2792_v44 = vmul.f32 -1.442695, %v3526_v13  ;;  %v4908_v63 = vpack.c.bf16 %v2070_v52, %v2066_v35  ;;  %v2069_v13 = vld [vmem:[%s5248_s3 + $0xa0] sm:$0xff]  ;;  %v2312_v35 = vld [vmem:[%s5248_s3 + $0xb8] sm:$0xff] }
 0x62f   :  { %3676 = vpow2.f32 %v2791_v26  ;;  %v5031_v52 = vpack.c.bf16 %v2312_v35, %v2308_v28  ;;  %v2348_v35 = vld [vmem:[%s5248_s3 + $0x1d8] sm:$0xff] }
 0x630   :  { %3678 = vpow2.f32 %v2792_v44  ;;  %v2078_v44 = vld [vmem:[%s5248_s3 + $0xe8] sm:$0xff] }
 0x631   :  { %3680 = vtanh.f32 %v3546_v49  ;;  %v2077_v49 = vld [vmem:[%s5248_s3 + $0xe0] sm:$0xff] }
 0x632   :  { %3682 = vpow2.f32 %v2793_v12 }
 0x639   :  { %v3677_v45 = vpop.eup %3676 }
 0x63a   :  { %v1788_v7 = vadd.f32 1.0, %v3677_v45  ;;  %v3679_v21 = vpop.eup %3678  ;;  %v2086_v45 = vld [vmem:[%s5248_s3 + $0x128] sm:$0xff] }
 0x63b   :  { %v1789_v40 = vadd.f32 1.0, %v3679_v21  ;;  %v3681_v41 = vpop.eup %3680  ;;  %v2085_v21 = vld [vmem:[%s5248_s3 + $0x120] sm:$0xff] }
 0x63c   :  { %3684 = vrcp.f32 %v1788_v7  ;;  %v3683_v57 = vpop.eup %3682 }
 0x63d   :  { %3686 = vrcp.f32 %v1789_v40  ;;  %v1790_v14 = vadd.f32 1.0, %v3683_v57 }
 0x63f   :  { %3688 = vrcp.f32 %v1790_v14 }
 0x646   :  { %v3685_v58 = vpop.eup %3684 }
 0x647   :  { %v1800_v59 = vmul.f32 %v3685_v58, %v3681_v41  ;;  %v3687_v11 = vpop.eup %3686 }
 0x648   :  { %v1799_v15 = vmul.f32 %v3687_v11, %v4803_v53  ;;  %v2058_v53 = vld [vmem:[%s5248_s3 + $0x48] sm:$0xff] }
 0x649   :  { %v3689_v38 = vpop.eup %3688  ;;  %v4888_v6 = vpack.c.bf16 %v2062_v56, %v2058_v53  ;;  %v2299_v53 = vld [vmem:[%s5248_s3 + $0x50] sm:$0xff] }
 0x64a   :  { %v4847_v27 = vadd.f32 %v1800_v59, %v1799_v15  ;;  %v2303_v56 = vld [vmem:[%s5248_s3 + $0x70] sm:$0xff] }
 0x64b   :  { %v5021_v16 = vpack.c.bf16 %v2303_v56, %v2299_v53  ;;  %v2350_v53 = vld [vmem:[%s5248_s3 + $0x1e8] sm:$0xff] }
 0x64c   :  { %3690 = vtanh.f32 %v4847_v27  ;;  %v5155_v28 = vpack.c.bf16 %v2350_v53, %v2346_v5 }
 0x656   :  { %v3691_v18 = vpop.eup %3690 }
 0x657   :  { %v1803_v50 = vmul.f32 %v3691_v18, %v3689_v38 }
 0x659   :  { %2794 = vst [vmem:[%s5251_s4 + $0x28] sm:$0xff] %v1803_v50  ;;  %1938 = vmatmul.mubr.f32.vlgmr.msra.gmra.mrb[12].mxu0 %v1803_v50  ;;  %2009 = vmatmul.mubr.f32.vlgmr.msra.gmra.mrb[12].mxu1 %v1803_v50 }
 0x65a   :  { %2177 = vmatprep.mubr.f32.mxu0 %v3756_v3  ;;  %2248 = vmatprep.mubr.f32.mxu1 %v3756_v3 }
 0x65b   :  { %3326 = vmatpush1.bf16.msra.mxu0 %v4872_v22  ;;  %3358 = vmatpush1.bf16.msra.mxu1 %v4878_v33 }
 0x65c   :  { %3360 = vmatprep.subr.bf16.mxu1 %v4577_v30  ;;  %3328 = vmatprep.subr.bf16.mxu0 %v4888_v6  ;;  %v2065_v30 = vld [vmem:[%s5248_s3 + $0x80] sm:$0xff] }
 0x65d   :  { %v4917_v26 = vpack.c.bf16 %v2069_v13, %v2065_v30  ;;  %v2307_v30 = vld [vmem:[%s5248_s3 + $0x90] sm:$0xff] }
 0x65e   :  { %v2311_v13 = vld [vmem:[%s5248_s3 + $0xb0] sm:$0xff] }
 0x65f   :  { %3330 = vmatpush1.bf16.msra.mxu0 %v4897_v32  ;;  %3362 = vmatpush1.bf16.msra.mxu1 %v4585_v36  ;;  %v2074_v36 = vld [vmem:[%s5248_s3 + $0xc8] sm:$0xff] }
 0x660   :  { %3364 = vmatprep.subr.bf16.mxu1 %v4595_v60  ;;  %3332 = vmatprep.subr.bf16.mxu0 %v4908_v63  ;;  %v4928_v48 = vpack.c.bf16 %v2078_v44, %v2074_v36  ;;  %v2073_v60 = vld [vmem:[%s5248_s3 + $0xc0] sm:$0xff]  ;;  %v5039_v36 = vpack.c.bf16 %v2311_v13, %v2307_v30  ;;  %v2316_v44 = vld [vmem:[%s5248_s3 + $0xd8] sm:$0xff] }
 0x661   :  { %v4937_v12 = vpack.c.bf16 %v2077_v49, %v2073_v60  ;;  %v2320_v60 = vld [vmem:[%s5248_s3 + $0xf8] sm:$0xff]  ;;  %v2345_v13 = vld [vmem:[%s5248_s3 + $0x1c0] sm:$0xff] }
 0x662   :  { %v5049_v49 = vpack.c.bf16 %v2320_v60, %v2316_v44  ;;  %v2352_v30 = vld [vmem:[%s5248_s3 + $0x1f8] sm:$0xff]  ;;  %v2349_v60 = vld [vmem:[%s5248_s3 + $0x1e0] sm:$0xff] }
 0x663   :  { %3334 = vmatpush1.bf16.msra.mxu0 %v4917_v26  ;;  %3366 = vmatpush1.bf16.msra.mxu1 %v4603_v2  ;;  %v2082_v2 = vld [vmem:[%s5248_s3 + $0x108] sm:$0xff]  ;;  %v5166_v44 = vpack.c.bf16 %v2352_v30, %v2348_v35 }
 0x664   :  { %3368 = vmatprep.subr.bf16.mxu1 %v4613_v39  ;;  %3336 = vmatprep.subr.bf16.mxu0 %v4928_v48  ;;  %v4948_v7 = vpack.c.bf16 %v2086_v45, %v2082_v2  ;;  %v2081_v39 = vld [vmem:[%s5248_s3 + $0x100] sm:$0xff]  ;;  %v2315_v2 = vld [vmem:[%s5248_s3 + $0xd0] sm:$0xff] }
 0x665   :  { %v4957_v40 = vpack.c.bf16 %v2085_v21, %v2081_v39  ;;  %v2319_v45 = vld [vmem:[%s5248_s3 + $0xf0] sm:$0xff]  ;;  %v2324_v21 = vld [vmem:[%s5248_s3 + $0x118] sm:$0xff] }
 0x666   :  { %v5057_v39 = vpack.c.bf16 %v2319_v45, %v2315_v2  ;;  %v2347_v2 = vld [vmem:[%s5248_s3 + $0x1d0] sm:$0xff] }
 0x667   :  { %3338 = vmatpush1.bf16.msra.mxu0 %v4937_v12  ;;  %3370 = vmatpush1.bf16.msra.mxu1 %v4621_v19  ;;  %v2351_v45 = vld [vmem:[%s5248_s3 + $0x1f0] sm:$0xff] }
 0x668   :  { %3372 = vmatprep.subr.bf16.mxu1 %v4631_v31  ;;  %3340 = vmatprep.subr.bf16.mxu0 %v4948_v7 }
 0x66b   :  { %3342 = vmatpush1.bf16.msra.mxu0 %v4957_v40  ;;  %3374 = vmatpush1.bf16.msra.mxu1 %v4639_v46 }
 0x66c   :  { %3344 = vmatprep.subr.bf16.mxu0 %v4652_v1  ;;  %3376 = vmatprep.subr.bf16.mxu1 %v4663_v20 }
 0x66f   :  { %3346 = vmatpush1.bf16.msra.mxu0 %v4665_v24  ;;  %3378 = vmatpush1.bf16.msra.mxu1 %v4677_v51 }
 0x670   :  { %3348 = vmatprep.subr.bf16.mxu0 %v4690_v0  ;;  %3380 = vmatprep.subr.bf16.mxu1 %v4692_v8 }
 0x673   :  { %3350 = vmatpush1.bf16.msra.mxu0 %v4704_v17  ;;  %3382 = vmatpush1.bf16.msra.mxu1 %v4717_v34 }
 0x674   :  { %3352 = vmatprep.subr.bf16.mxu0 %v4719_v47  ;;  %3384 = vmatprep.subr.bf16.mxu1 %v4730_v25 }
 0x677   :  { %3354 = vmatpush1.bf16.msra.mxu0 %v4742_v42  ;;  %3386 = vmatpush1.bf16.msra.mxu1 %v4746_v29 }
 0x678   :  { %3388 = vmatprep.subr.bf16.mxu0 %v4861_v62 }
 0x72c   :  { %v1939_v19 = vpop.f32.mrb[12].mxu0  ;;  %v2010_v31 = vpop.f32.mrb[12].mxu1 }
 0x72d   :  { %v3527_v46 = vadd.f32 %v1939_v19, %v4355_v37  ;;  %v1941_v1 = vpop.f32.mrb[13].mxu0  ;;  %v2012_v20 = vpop.f32.mrb[13].mxu1  ;;  %v3547_v8 = vadd.f32 %v2010_v31, %v4361_v55  ;;  %v2328_v19 = vld [vmem:[%s5248_s3 + $0x138] sm:$0xff] }
 0x72e   :  { %v3528_v24 = vadd.f32 %v1941_v1, %v4357_v43  ;;  %v3548_v17 = vadd.f32 %v2012_v20, %v4364_v4  ;;  %v5067_v31 = vpack.c.bf16 %v2328_v19, %v2324_v21  ;;  %v2327_v1 = vld [vmem:[%s5248_s3 + $0x130] sm:$0xff]  ;;  %v5178_v21 = vpack.c.bf16 %v2349_v60, %v2345_v13 }
 0x72f   :  { %v2795_v51 = vmul.f32 -1.442695, %v3527_v46  ;;  %v2797_v34 = vmul.f32 -1.442695, %v3547_v8  ;;  %v2323_v46 = vld [vmem:[%s5248_s3 + $0x110] sm:$0xff]  ;;  %v5182_v19 = vpack.c.bf16 %v2351_v45, %v2347_v2 }
 0x730   :  { %v2796_v0 = vmul.f32 -1.442695, %v3528_v24  ;;  %v5075_v20 = vpack.c.bf16 %v2327_v1, %v2323_v46  ;;  %v2330_v24 = vld [vmem:[%s5248_s3 + $0x148] sm:$0xff] }
 0x731   :  { %3692 = vpow2.f32 %v2795_v51  ;;  %v2334_v51 = vld [vmem:[%s5248_s3 + $0x168] sm:$0xff] }
 0x732   :  { %3694 = vpow2.f32 %v2796_v0  ;;  %v2332_v0 = vld [vmem:[%s5248_s3 + $0x158] sm:$0xff]  ;;  %v5088_v8 = vpack.c.bf16 %v2334_v51, %v2330_v24 }
 0x733   :  { %3696 = vtanh.f32 %v3548_v17  ;;  %v2336_v17 = vld [vmem:[%s5248_s3 + $0x178] sm:$0xff] }
 0x734   :  { %3698 = vpow2.f32 %v2797_v34  ;;  %v2329_v34 = vld [vmem:[%s5248_s3 + $0x140] sm:$0xff] }
 0x73b   :  { %v3693_v47 = vpop.eup %3692 }
 0x73c   :  { %v2028_v25 = vadd.f32 1.0, %v3693_v47  ;;  %v3695_v42 = vpop.eup %3694  ;;  %v2333_v47 = vld [vmem:[%s5248_s3 + $0x160] sm:$0xff] }
 0x73d   :  { %v2029_v29 = vadd.f32 1.0, %v3695_v42  ;;  %v3697_v41 = vpop.eup %3696  ;;  %v5101_v42 = vpack.c.bf16 %v2333_v47, %v2329_v34 }
 0x73e   :  { %3700 = vrcp.f32 %v2028_v25  ;;  %v3699_v57 = vpop.eup %3698  ;;  %v5099_v25 = vpack.c.bf16 %v2336_v17, %v2332_v0 }
 0x73f   :  { %3702 = vrcp.f32 %v2029_v29  ;;  %v2030_v14 = vadd.f32 1.0, %v3699_v57  ;;  %v2331_v29 = vld [vmem:[%s5248_s3 + $0x150] sm:$0xff]  ;;  %v2338_v57 = vld [vmem:[%s5248_s3 + $0x188] sm:$0xff] }
 0x741   :  { %3704 = vrcp.f32 %v2030_v14  ;;  %v2344_v14 = vld [vmem:[%s5248_s3 + $0x1b8] sm:$0xff] }
 0x748   :  { %v3701_v58 = vpop.eup %3700 }
 0x749   :  { %v2040_v59 = vmul.f32 %v3701_v58, %v3697_v41  ;;  %v3703_v11 = vpop.eup %3702  ;;  %v2335_v41 = vld [vmem:[%s5248_s3 + $0x170] sm:$0xff] }
 0x74a   :  { %v2039_v15 = vmul.f32 %v3703_v11, %v4847_v27  ;;  %v2292_v27 = vld [vmem:[%s5248_s3 + $0x18] sm:$0xff]  ;;  %v5113_v58 = vpack.c.bf16 %v2335_v41, %v2331_v29 }
 0x74b   :  { %v3705_v18 = vpop.eup %3704  ;;  %v5003_v9 = vpack.c.bf16 %v2296_v61, %v2292_v27  ;;  %v2340_v11 = vld [vmem:[%s5248_s3 + $0x198] sm:$0xff]  ;;  %v2339_v27 = vld [vmem:[%s5248_s3 + $0x190] sm:$0xff] }
 0x74c   :  { %v4980_v38 = vadd.f32 %v2040_v59, %v2039_v15  ;;  %v2342_v59 = vld [vmem:[%s5248_s3 + $0x1a8] sm:$0xff]  ;;  %v5153_v56 = vpack.c.bf16 %v2343_v10, %v2339_v27 }
 0x74d   :  { %3420 = vmatprep.subr.bf16.mxu1 %v5003_v9  ;;  %v5126_v15 = vpack.c.bf16 %v2342_v59, %v2338_v57 }
 0x74e   :  { %3706 = vtanh.f32 %v4980_v38 }
 0x758   :  { %v3707_v50 = vpop.eup %3706 }
 0x759   :  { %v2043_v54 = vmul.f32 %v3707_v50, %v3705_v18  ;;  %v5128_v18 = vpack.c.bf16 %v2344_v14, %v2340_v11  ;;  %v2337_v50 = vld [vmem:[%s5248_s3 + $0x180] sm:$0xff] }
 0x75b   :  { %2798 = vst [vmem:[%s5251_s4 + $0x30] sm:$0xff] %v2043_v54  ;;  %2178 = vmatmul.mubr.f32.vlgmr.msra.gmra.mrb[14].mxu0 %v2043_v54  ;;  %2249 = vmatmul.mubr.f32.vlgmr.msra.gmra.mrb[14].mxu1 %v2043_v54  ;;  %v2341_v54 = vld [vmem:[%s5248_s3 + $0x1a0] sm:$0xff] }
 0x75c   :  { %3390 = vmatpush1.bf16.msra.mxu0 %v4872_v22  ;;  %2417 = vmatprep.mubr.f32.mxu0 %v3756_v3  ;;  %v5140_v61 = vpack.c.bf16 %v2341_v54, %v2337_v50 }
 0x75d   :  { %3392 = vmatprep.subr.bf16.mxu0 %v4888_v6  ;;  %2488 = vmatprep.mubr.f32.mxu1 %v3756_v3 }
 0x75e   :  { %3422 = vmatpush1.bf16.msra.mxu1 %v4878_v33 }
 0x75f   :  { %3424 = vmatprep.subr.bf16.mxu1 %v5013_v23 }
 0x760   :  { %3394 = vmatpush1.bf16.msra.mxu0 %v4897_v32 }
 0x761   :  { %3396 = vmatprep.subr.bf16.mxu0 %v4908_v63 }
 0x762   :  { %3426 = vmatpush1.bf16.msra.mxu1 %v5021_v16 }
 0x763   :  { %3428 = vmatprep.subr.bf16.mxu1 %v5031_v52 }
 0x764   :  { %3398 = vmatpush1.bf16.msra.mxu0 %v4917_v26 }
 0x765   :  { %3400 = vmatprep.subr.bf16.mxu0 %v4928_v48 }
 0x766   :  { %3430 = vmatpush1.bf16.msra.mxu1 %v5039_v36 }
 0x767   :  { %3432 = vmatprep.subr.bf16.mxu1 %v5049_v49 }
 0x768   :  { %3402 = vmatpush1.bf16.msra.mxu0 %v4937_v12 }
 0x769   :  { %3404 = vmatprep.subr.bf16.mxu0 %v4948_v7 }
 0x76a   :  { %3434 = vmatpush1.bf16.msra.mxu1 %v5057_v39 }
 0x76b   :  { %3436 = vmatprep.subr.bf16.mxu1 %v5067_v31 }
 0x76c   :  { %3406 = vmatpush1.bf16.msra.mxu0 %v4957_v40 }
 0x76d   :  { %3408 = vmatprep.subr.bf16.mxu0 %v5088_v8 }
 0x76e   :  { %3438 = vmatpush1.bf16.msra.mxu1 %v5075_v20 }
 0x76f   :  { %3440 = vmatprep.subr.bf16.mxu1 %v5099_v25 }
 0x770   :  { %3410 = vmatpush1.bf16.msra.mxu0 %v5101_v42 }
 0x771   :  { %3412 = vmatprep.subr.bf16.mxu0 %v5126_v15 }
 0x772   :  { %3442 = vmatpush1.bf16.msra.mxu1 %v5113_v58 }
 0x773   :  { %3444 = vmatprep.subr.bf16.mxu1 %v5128_v18 }
 0x774   :  { %3414 = vmatpush1.bf16.msra.mxu0 %v5140_v61 }
 0x775   :  { %3416 = vmatprep.subr.bf16.mxu0 %v5155_v28 }
 0x776   :  { %3446 = vmatpush1.bf16.msra.mxu1 %v5153_v56 }
 0x777   :  { %3448 = vmatprep.subr.bf16.mxu1 %v5166_v44 }
 0x778   :  { %3418 = vmatpush1.bf16.msra.mxu0 %v5178_v21 }
 0x779   :  { %3452 = vmatprep.subr.bf16.mxu0 %v4861_v62 }
 0x77a   :  { %3450 = vmatpush1.bf16.msra.mxu1 %v5182_v19 }
 0x77b   :  { %3484 = vmatprep.subr.bf16.mxu1 %v5003_v9 }
 0x82e   :  { %v2179_v46 = vpop.f32.mrb[14].mxu0  ;;  %v2250_v1 = vpop.f32.mrb[14].mxu1 }
 0x82f   :  { %v3529_v24 = vadd.f32 %v2179_v46, %v4355_v37  ;;  %v2181_v51 = vpop.f32.mrb[15].mxu0  ;;  %v2252_v0 = vpop.f32.mrb[15].mxu1  ;;  %v3549_v29 = vadd.f32 %v2250_v1, %v4361_v55 }
 0x830   :  { %v3530_v17 = vadd.f32 %v2181_v51, %v4357_v43  ;;  %v3550_v41 = vadd.f32 %v2252_v0, %v4364_v4 }
 0x831   :  { %v2799_v34 = vmul.f32 -1.442695, %v3529_v24  ;;  %v2801_v57 = vmul.f32 -1.442695, %v3549_v29 }
 0x832   :  { %v2800_v47 = vmul.f32 -1.442695, %v3530_v17 }
 0x833   :  { %3708 = vpow2.f32 %v2799_v34 }
 0x834   :  { %3710 = vpow2.f32 %v2800_v47 }
 0x835   :  { %3712 = vtanh.f32 %v3550_v41 }
 0x836   :  { %3714 = vpow2.f32 %v2801_v57 }
 0x83d   :  { %v3709_v62 = vpop.eup %3708 }
 0x83e   :  { %v2268_v59 = vadd.f32 1.0, %v3709_v62  ;;  %v3711_v9 = vpop.eup %3710 }
 0x83f   :  { %v2269_v11 = vadd.f32 1.0, %v3711_v9  ;;  %v3713_v14 = vpop.eup %3712 }
 0x840   :  { %3716 = vrcp.f32 %v2268_v59  ;;  %v3715_v50 = vpop.eup %3714 }
 0x841   :  { %3718 = vrcp.f32 %v2269_v11  ;;  %v2270_v5 = vadd.f32 1.0, %v3715_v50 }
 0x843   :  { %3720 = vrcp.f32 %v2270_v5 }
 0x84a   :  { %v3717_v54 = vpop.eup %3716 }
 0x84b   :  { %v2280_v27 = vmul.f32 %v3717_v54, %v3713_v14  ;;  %v3719_v10 = vpop.eup %3718 }
 0x84c   :  { %v2279_v53 = vmul.f32 %v3719_v10, %v4980_v38 }
 0x84d   :  { %v3721_v30 = vpop.eup %3720 }
 0x84e   :  { %v5194_v35 = vadd.f32 %v2280_v27, %v2279_v53 }
 0x850   :  { %3722 = vtanh.f32 %v5194_v35 }
 0x85a   :  { %v3723_v13 = vpop.eup %3722 }
 0x85b   :  { %v2283_v60 = vmul.f32 %v3723_v13, %v3721_v30 }
 0x85d   :  { %2802 = vst [vmem:[%s5251_s4 + $0x38] sm:$0xff] %v2283_v60  ;;  %2418 = vmatmul.mubr.f32.vlgmr.msra.gmra.mrb[16].mxu0 %v2283_v60  ;;  %2489 = vmatmul.mubr.f32.vlgmr.msra.gmra.mrb[16].mxu1 %v2283_v60 }
 0x85e   :  { %3454 = vmatpush1.bf16.msra.mxu0 %v4872_v22  ;;  %3486 = vmatpush1.bf16.msra.mxu1 %v4878_v33 }
 0x85f   :  { %3456 = vmatprep.subr.bf16.mxu0 %v4888_v6  ;;  %3488 = vmatprep.subr.bf16.mxu1 %v5013_v23 }
 0x860   :  { %2657 = vmatprep.mubr.f32.mxu0 %v3756_v3  ;;  %2728 = vmatprep.mubr.f32.mxu1 %v3756_v3 }
 0x862   :  { %3458 = vmatpush1.bf16.msra.mxu0 %v4897_v32  ;;  %3490 = vmatpush1.bf16.msra.mxu1 %v5021_v16 }
 0x863   :  { %3460 = vmatprep.subr.bf16.mxu0 %v4908_v63  ;;  %3492 = vmatprep.subr.bf16.mxu1 %v5031_v52 }
 0x866   :  { %3462 = vmatpush1.bf16.msra.mxu0 %v4917_v26  ;;  %3494 = vmatpush1.bf16.msra.mxu1 %v5039_v36 }
 0x867   :  { %3464 = vmatprep.subr.bf16.mxu0 %v4928_v48  ;;  %3496 = vmatprep.subr.bf16.mxu1 %v5049_v49 }
 0x86a   :  { %3466 = vmatpush1.bf16.msra.mxu0 %v4937_v12  ;;  %3498 = vmatpush1.bf16.msra.mxu1 %v5057_v39 }
 0x86b   :  { %3468 = vmatprep.subr.bf16.mxu0 %v4948_v7  ;;  %3500 = vmatprep.subr.bf16.mxu1 %v5067_v31 }
 0x86e   :  { %3470 = vmatpush1.bf16.msra.mxu0 %v4957_v40  ;;  %3502 = vmatpush1.bf16.msra.mxu1 %v5075_v20 }
 0x86f   :  { %3472 = vmatprep.subr.bf16.mxu0 %v5088_v8  ;;  %3504 = vmatprep.subr.bf16.mxu1 %v5099_v25 }
 0x872   :  { %3474 = vmatpush1.bf16.msra.mxu0 %v5101_v42  ;;  %3506 = vmatpush1.bf16.msra.mxu1 %v5113_v58 }
 0x873   :  { %3476 = vmatprep.subr.bf16.mxu0 %v5126_v15  ;;  %3508 = vmatprep.subr.bf16.mxu1 %v5128_v18 }
 0x876   :  { %3478 = vmatpush1.bf16.msra.mxu0 %v5140_v61  ;;  %3510 = vmatpush1.bf16.msra.mxu1 %v5153_v56 }
 0x877   :  { %3480 = vmatprep.subr.bf16.mxu0 %v5155_v28  ;;  %3512 = vmatprep.subr.bf16.mxu1 %v5166_v44 }
 0x87a   :  { %3482 = vmatpush1.bf16.msra.mxu0 %v5178_v21  ;;  %3514 = vmatpush1.bf16.msra.mxu1 %v5182_v19 }
 0x930   :  { %v2419_v3 = vpop.f32.mrb[16].mxu0  ;;  %v2490_v22 = vpop.f32.mrb[16].mxu1 }
 0x931   :  { %v3531_v33 = vadd.f32 %v2419_v3, %v4355_v37  ;;  %v2421_v6 = vpop.f32.mrb[17].mxu0  ;;  %v2492_v32 = vpop.f32.mrb[17].mxu1  ;;  %v3551_v12 = vadd.f32 %v2490_v22, %v4361_v55 }
 0x932   :  { %v3532_v63 = vadd.f32 %v2421_v6, %v4357_v43  ;;  %v3552_v7 = vadd.f32 %v2492_v32, %v4364_v4 }
 0x933   :  { %v2803_v26 = vmul.f32 -1.442695, %v3531_v33  ;;  %v2805_v40 = vmul.f32 -1.442695, %v3551_v12 }
 0x934   :  { %v2804_v48 = vmul.f32 -1.442695, %v3532_v63 }
 0x935   :  { %3724 = vpow2.f32 %v2803_v26 }
 0x936   :  { %3726 = vpow2.f32 %v2804_v48 }
 0x937   :  { %3728 = vtanh.f32 %v3552_v7 }
 0x938   :  { %3730 = vpow2.f32 %v2805_v40 }
 0x93f   :  { %v3725_v38 = vpop.eup %3724 }
 0x940   :  { %v2508_v23 = vadd.f32 1.0, %v3725_v38  ;;  %v3727_v16 = vpop.eup %3726 }
 0x941   :  { %v2509_v52 = vadd.f32 1.0, %v3727_v16  ;;  %v3729_v36 = vpop.eup %3728 }
 0x942   :  { %3732 = vrcp.f32 %v2508_v23  ;;  %v3731_v49 = vpop.eup %3730 }
 0x943   :  { %3734 = vrcp.f32 %v2509_v52  ;;  %v2510_v8 = vadd.f32 1.0, %v3731_v49 }
 0x945   :  { %3736 = vrcp.f32 %v2510_v8 }
 0x94c   :  { %v3733_v39 = vpop.eup %3732 }
 0x94d   :  { %v2520_v31 = vmul.f32 %v3733_v39, %v3729_v36  ;;  %v3735_v20 = vpop.eup %3734 }
 0x94e   :  { %v2519_v25 = vmul.f32 %v3735_v20, %v5194_v35 }
 0x94f   :  { %v3737_v58 = vpop.eup %3736 }
 0x950   :  { %v2521_v42 = vadd.f32 %v2520_v31, %v2519_v25 }
 0x952   :  { %3738 = vtanh.f32 %v2521_v42 }
 0x95c   :  { %v3739_v15 = vpop.eup %3738 }
 0x95d   :  { %v2523_v18 = vmul.f32 %v3739_v15, %v3737_v58 }
 0x95f   :  { %2806 = vst [vmem:[%s5251_s4 + $0x40] sm:$0xff] %v2523_v18  ;;  %2658 = vmatmul.mubr.f32.vlgmr.msra.gmra.mrb[18].mxu0 %v2523_v18  ;;  %2729 = vmatmul.mubr.f32.vlgmr.msra.gmra.mrb[18].mxu1 %v2523_v18 }
 0xa32   :  { %v2659_v61 = vpop.f32.mrb[18].mxu0  ;;  %v2730_v56 = vpop.f32.mrb[18].mxu1 }
 0xa33   :  { %v3533_v28 = vadd.f32 %v2659_v61, %v4355_v37  ;;  %v2661_v44 = vpop.f32.mrb[19].mxu0  ;;  %v2732_v2 = vpop.f32.mrb[19].mxu1  ;;  %v3553_v46 = vadd.f32 %v2730_v56, %v4361_v55 }
 0xa34   :  { %v3534_v45 = vadd.f32 %v2661_v44, %v4357_v43  ;;  %v3554_v1 = vadd.f32 %v2732_v2, %v4364_v4 }
 0xa35   :  { %v2807_v21 = vmul.f32 -1.442695, %v3533_v28  ;;  %v2809_v24 = vmul.f32 -1.442695, %v3553_v46 }
 0xa36   :  { %v2808_v19 = vmul.f32 -1.442695, %v3534_v45 }
 0xa37   :  { %3740 = vpow2.f32 %v2807_v21 }
 0xa38   :  { %3742 = vpow2.f32 %v2808_v19 }
 0xa39   :  { %3744 = vtanh.f32 %v3554_v1 }
 0xa3a   :  { %3746 = vpow2.f32 %v2809_v24 }
 0xa41   :  { %v3741_v51 = vpop.eup %3740 }
 0xa42   :  { %v2748_v0 = vadd.f32 1.0, %v3741_v51  ;;  %v3743_v17 = vpop.eup %3742 }
 0xa43   :  { %v2749_v37 = vadd.f32 1.0, %v3743_v17  ;;  %v3745_v34 = vpop.eup %3744 }
 0xa44   :  { %3748 = vrcp.f32 %v2748_v0  ;;  %v3747_v47 = vpop.eup %3746 }
 0xa45   :  { %3750 = vrcp.f32 %v2749_v37  ;;  %v2750_v57 = vadd.f32 1.0, %v3747_v47 }
 0xa47   :  { %3752 = vrcp.f32 %v2750_v57 }
 0xa4e   :  { %v3749_v43 = vpop.eup %3748 }
 0xa4f   :  { %v2760_v29 = vmul.f32 %v3749_v43, %v3745_v34  ;;  %v3751_v41 = vpop.eup %3750 }
 0xa50   :  { %v2759_v62 = vmul.f32 %v3751_v41, %v2521_v42 }
 0xa51   :  { %v3753_v55 = vpop.eup %3752 }
 0xa52   :  { %v2761_v59 = vadd.f32 %v2760_v29, %v2759_v62 }
 0xa54   :  { %3754 = vtanh.f32 %v2761_v59 }
 0xa5e   :  { %v3755_v4 = vpop.eup %3754 }
 0xa5f   :  { %v2763_v9 = vmul.f32 %v3755_v4, %v3753_v55 }
 0xa61   :  { %2810 = vst [vmem:[%s5251_s4 + $0x48] sm:$0xff] %v2763_v9 }

</bundles_post_ra>
